<compile_context>
chip_gen: v5e
topology: v5e:2x2
jax: 0.10.0
libtpu: 0.0.40
codegen_flags: <defaults>
</compile_context>

<pallas_src>
import numpy as np

import jax
import jax.numpy as jnp
from jax import lax
from jax.experimental import pallas as pl
from jax.experimental.pallas import tpu as pltpu


# --------------------------------------------------------------------------
# Config (small shapes consistent with the module's constraints)
# --------------------------------------------------------------------------
CFG = dict(
    input_channels=4,
    kernel_size=8,        # even => conv_block1 / res_layer1 lengths match
    stride=1,
    dropout=0.35,
    final_out_channels=16,
    seq_length=16,
    features_len=2,       # length of encoder output after 4x (conv + pool)
    num_classes=5,
)
BATCH = 2
BN_EPS = 1e-5


# --------------------------------------------------------------------------
# Trace-time constant 0/1 selection matrices (passed as operands, never
# rebuilt with iota/where inside the kernel)
# --------------------------------------------------------------------------
def _stuff_mat(n_in, stride=2):
    """S[i, j] = 1 iff i == stride * j  (ConvTranspose zero-stuffing)."""
    n_out = (n_in - 1) * stride + 1
    m = np.zeros((n_out, n_in), np.float32)
    m[np.arange(n_in) * stride, np.arange(n_in)] = 1.0
    return jnp.asarray(m)


def _pool_gather_mat(lout):
    """G[i, j] = 1 iff j == 2 * i  (stride-2 row gather after adjacent max)."""
    n_in = 2 * lout - 1
    m = np.zeros((lout, n_in), np.float32)
    m[np.arange(lout), 2 * np.arange(lout)] = 1.0
    return jnp.asarray(m)


# --------------------------------------------------------------------------
# Trace-time parameter packing: BN folded, conv weights reshaped to
# (K*Cin, Cout) im2col form, everything placed into ONE (R, 128) buffer.
# --------------------------------------------------------------------------
def _pack_all(P, cfg):
    K = cfg['kernel_size']
    pieces, offs, biases = [], {}, []
    row = 0

    def add(name, mat):
        nonlocal row
        mat = jnp.asarray(mat, jnp.float32)
        r, c = int(mat.shape[0]), int(mat.shape[1])
        rp = -(-r // 8) * 8                       # 8-row (sublane) alignment
        pieces.append(jnp.pad(mat, ((0, rp - r), (0, 128 - c))))
        offs[name] = (row, r, c)
        row += rp

    def fold_bn(bn, bias=None):
        gamma, beta, mean, var = bn
        scale = gamma / jnp.sqrt(var + BN_EPS)
        shift = beta - mean * scale
        if bias is not None:
            shift = shift + bias * scale
        return scale, shift

    def add_conv(name, w, bn=None, bias=None):
        """Conv1d weight (Cout, Cin, K) -> (K*Cin, Cout); BN folded in."""
        w = jnp.asarray(w, jnp.float32)
        Cout, Cin, Kk = w.shape
        if bn is not None:
            scale, shift = fold_bn(bn, bias)
            w = w * scale[:, None, None]
            b = shift
        else:
            b = (jnp.asarray(bias, jnp.float32) if bias is not None
                 else jnp.zeros((Cout,), jnp.float32))
        add(name, jnp.transpose(w, (2, 1, 0)).reshape(Kk * Cin, Cout))
        biases.append((name, b))

    def add_deconv(name, w, bn):
        """ConvTranspose1d weight (Cin, Cout, K) -> equivalent-conv weight
        (K*Cin, Cout): kernel flipped, channels swapped, BN folded in."""
        w = jnp.asarray(w, jnp.float32)
        Cin, Cout, Kk = w.shape
        scale, shift = fold_bn(bn)
        taps = jnp.flip(w, axis=2).transpose(2, 0, 1) * scale[None, None, :]
        add(name, taps.reshape(Kk * Cin, Cout))
        biases.append((name, shift))

    # ---- encoder ----
    add_conv('w1_1', P['w1_1'], bn=P['bn1_1'])
    add_conv('w1_2', P['w1_2'], bn=P['bn1_2'])
    add_conv('res1', P['res1_w'], bias=P['res1_b'])
    add_conv('w2_1', P['w2_1'], bn=P['bn2_1'])
    add_conv('w2_2', P['w2_2'], bn=P['bn2_2'])
    add_conv('res2', P['res2_w'], bias=P['res2_b'])
    add_conv('w3_1', P['w3_1'], bn=P['bn3_1'])
    add_conv('w3_2', P['w3_2'], bn=P['bn3_2'])
    add_conv('res3', P['res3_w'], bias=P['res3_b'])
    add_conv('w4_1', P['w4_1'], bn=P['bn4_1'])
    add_conv('w4_2', P['w4_2'], bn=P['bn4_2'])
    add_conv('res4', P['res4_w'], bias=P['res4_b'])
    # ---- decoder ----
    for name in ('d1_1', 'd1_2', 'd1_3', 'd2_1', 'd2_2', 'd2_3',
                 'd3_1', 'd3_2', 'd3_3', 'd4_1'):
        add_deconv(name, P[name], P['dbn' + name[1:]])
    # Linear over the length axis: bias folded in as an augmented column
    add('lin', jnp.concatenate(
        [jnp.asarray(P['lin_w'], jnp.float32),
         jnp.asarray(P['lin_b'], jnp.float32)[:, None]], axis=1))
    # logits head: flattened (FL*F, NC) matmul (length-major flattening of the
    # channels-last encoder tile matches PyTorch's (c, l) reshape order)
    add_conv('logits',
             jnp.asarray(P['log_w'], jnp.float32).reshape(
                 cfg['num_classes'], cfg['final_out_channels'],
                 cfg['features_len']),
             bias=P['log_b'])
    # precomputed selection matrices (constants; lengths follow from CFG and
    # are shape-checked at kernel trace time)
    add('pool1', _pool_gather_mat(9))
    add('pool2', _pool_gather_mat(5))
    add('pool3', _pool_gather_mat(3))
    add('pool4', _pool_gather_mat(2))
    add('s1', _stuff_mat(2))
    add('s2', _stuff_mat(4))
    add('s3', _stuff_mat(8))
    # bias rows: one row per layer, appended as a single block
    nb = len(biases)
    nbp = -(-nb // 8) * 8
    bblock = jnp.zeros((nbp, 128), jnp.float32)
    for i, (name, vec) in enumerate(biases):
        bblock = bblock.at[i, :vec.shape[0]].set(vec)
        offs['b:' + name] = (row + i, 1, int(vec.shape[0]))
    pieces.append(bblock)
    row += nbp

    return jnp.concatenate(pieces, axis=0), offs


# --------------------------------------------------------------------------
# The single fused kernel: whole forward pass for one batch element
# --------------------------------------------------------------------------
def _make_kernel(offs, cfg, out_rows):
    K = cfg['kernel_size']
    FL, F = cfg['features_len'], cfg['final_out_channels']
    NC, SEQ, C = cfg['num_classes'], cfg['seq_length'], cfg['input_channels']
    f32 = jnp.float32

    def kernel(x_ref, w_ref, o_ref):
        def wslice(name):
            r0, nr, nc = offs[name]
            return w_ref[r0:r0 + nr, 0:nc]

        def brow(name):
            r0, _, nc = offs['b:' + name]
            return w_ref[r0:r0 + 1, 0:nc]

        def conv(x, name, *, k, dilation=1, padding=0, relu=False):
            """Conv1d (stride 1) as ONE matmul on an im2col (L_out, k*Cin) tile."""
            L, cin = x.shape
            if padding > 0:
                z = jnp.zeros((padding, cin), f32)
                xp = jnp.concatenate([z, x, z], axis=0)
            else:
                xp = x
            lout = L + 2 * padding - dilation * (k - 1)
            if k == 1:
                lhs = xp
            else:
                lhs = jnp.concatenate(
                    [xp[t * dilation:t * dilation + lout, :] for t in range(k)],
                    axis=1)
            acc = jnp.dot(lhs, wslice(name), preferred_element_type=f32)
            acc = acc + brow(name)
            if relu:
                acc = jnp.maximum(acc, 0.0)
            return acc

        def deconv(x, name, *, k, dilation=1, padding=0, stride=1, stuff=None):
            """ConvTranspose1d + BN + ReLU == conv(zero-stuffed x, flipped
            kernel) with effective padding dilation*(k-1) - padding."""
            if stride > 1:
                # zero-stuffing as a tiny precomputed 0/1 matmul
                x = jnp.dot(wslice(stuff), x, preferred_element_type=f32)
            pad_eff = dilation * (k - 1) - padding
            assert pad_eff >= 0, "negative effective padding not supported"
            return conv(x, name, k=k, dilation=dilation, padding=pad_eff,
                        relu=True)

        def relu_pool(x, name):
            """ReLU -> MaxPool1d(kernel=2, stride=2, padding=1).
            Zero padding is exact ONLY because pooling is applied post-ReLU
            (values >= 0), matching PyTorch's -inf padded max."""
            L, cin = x.shape
            lout = L // 2 + 1
            s = jnp.maximum(x, 0.0)
            rpad = 2 * lout - L - 1
            parts = [jnp.zeros((1, cin), f32), s]
            if rpad > 0:
                parts.append(jnp.zeros((rpad, cin), f32))
            sp = jnp.concatenate(parts, axis=0)          # (2*lout, cin)
            m = jnp.maximum(sp[:-1, :], sp[1:, :])       # adjacent-pair max
            return jnp.dot(wslice(name), m, preferred_element_type=f32)

        x = x_ref[0].astype(f32)                          # (L0, Cin) channels-last

        # ---- encoder: conv_block{1..4} + res_layer{1..4} + relu_pool ----
        h = conv(x, 'w1_1', k=2, relu=True)
        h = conv(h, 'w1_2', k=K, padding=K // 2)
        x = relu_pool(h + conv(x, 'res1', k=1), 'pool1')
        h = conv(x, 'w2_1', k=2, dilation=3, padding=1, relu=True)
        h = conv(h, 'w2_2', k=8, padding=4)
        x = relu_pool(h + conv(x, 'res2', k=1), 'pool2')
        h = conv(x, 'w3_1', k=2, dilation=5, padding=2, relu=True)
        h = conv(h, 'w3_2', k=8, padding=4)
        x = relu_pool(h + conv(x, 'res3', k=1), 'pool3')
        h = conv(x, 'w4_1', k=2, dilation=5, padding=2, relu=True)
        h = conv(h, 'w4_2', k=2, padding=1)
        x = relu_pool(h + conv(x, 'res4', k=1), 'pool4')
        assert x.shape == (FL, F), x.shape                # encoder features

        # ---- decoder (ConvTranspose1d + BN + ReLU chain) ----
        d = x
        d = deconv(d, 'd1_1', k=2, padding=1)                       # layer1
        d = deconv(d, 'd1_2', k=2, dilation=5, padding=2)
        d = deconv(d, 'd1_3', k=2, stride=2, stuff='s1')
        d = deconv(d, 'd2_1', k=8, padding=4)                       # layer2
        d = deconv(d, 'd2_2', k=2, dilation=5, padding=2)
        d = deconv(d, 'd2_3', k=2, stride=2, stuff='s2')
        d = deconv(d, 'd3_1', k=8, padding=4)                       # layer3
        d = deconv(d, 'd3_2', k=2, dilation=3, padding=1)
        d = deconv(d, 'd3_3', k=2, stride=2, stuff='s3')
        d = deconv(d, 'd4_1', k=K, padding=K // 2)                  # layer4

        # Linear over the length axis (+ ReLU); bias folded via ones row.
        d_aug = jnp.concatenate([d, jnp.ones((1, d.shape[1]), f32)], axis=0)
        dec = jnp.maximum(
            jnp.dot(wslice('lin'), d_aug, preferred_element_type=f32), 0.0)
        assert dec.shape == (SEQ, C), dec.shape

        # logits: flatten encoder features -> single (1, FL*F) x (FL*F, NC) matmul
        lhs = jnp.concatenate([x[t:t + 1, :] for t in range(FL)], axis=1)
        logits = (jnp.dot(lhs, wslice('logits'), preferred_element_type=f32)
                  + brow('logits'))

        # ---- single lane-dense output slab (out_rows, 128) ----
        def lpad(v):
            r, c = v.shape
            if c < 128:
                v = jnp.concatenate([v, jnp.zeros((r, 128 - c), f32)], axis=1)
            return v

        used = 1 + FL + SEQ
        slab = jnp.concatenate(
            [lpad(logits), lpad(x), lpad(dec),
             jnp.zeros((out_rows - used, 128), f32)], axis=0)
        o_ref[0] = slab

    return kernel


# --------------------------------------------------------------------------
# Forward wrapper: one fused pallas_call for the whole network
# --------------------------------------------------------------------------
def forward(x_in, P):
    cfg = CFG
    C = cfg['input_channels']
    # TODO(synk): stride > 1 would need precomputed output-gather matrices;
    # the module's constraints here pin stride == 1.
    assert cfg['stride'] == 1
    if x_in.shape[1] != C:                       # fragile if C == seq_length
        x_in = jnp.transpose(x_in, (0, 2, 1))
    B, _, L0 = x_in.shape
    x_cl = jnp.transpose(x_in, (0, 2, 1)).astype(jnp.float32)   # (B, L, C)

    packed, offs = _pack_all(P, cfg)
    FL, F = cfg['features_len'], cfg['final_out_channels']
    NC, SEQ = cfg['num_classes'], cfg['seq_length']
    out_rows = -(-(1 + FL + SEQ) // 8) * 8

    kernel = _make_kernel(offs, cfg, out_rows)

    slab = pl.pallas_call(
        kernel,
        out_shape=jax.ShapeDtypeStruct((B, out_rows, 128), jnp.float32),
        grid=(B,),
        in_specs=[pl.BlockSpec((1, L0, C), lambda b: (b, 0, 0)),
                  pl.BlockSpec(packed.shape, lambda b: (0, 0))],
        out_specs=pl.BlockSpec((1, out_rows, 128), lambda b: (b, 0, 0)),
        compiler_params=pltpu.CompilerParams(
            dimension_semantics=("parallel",)),   # v7x: one batch item per TC
    )(x_cl, packed)

    logits = slab[:, 0, :NC]
    x_enc = jnp.transpose(slab[:, 1:1 + FL, :F], (0, 2, 1))        # (B,F,FL) NCL
    d_out = jnp.transpose(slab[:, 1 + FL:1 + FL + SEQ, :C], (0, 2, 1))  # (B,C,SEQ)
    return logits, x_enc, d_out


# --------------------------------------------------------------------------
# Deterministic synthetic parameters
# --------------------------------------------------------------------------
def init_params(key, cfg):
    C, K, F = cfg['input_channels'], cfg['kernel_size'], cfg['final_out_channels']
    ks = iter(jax.random.split(key, 256))

    def w(*shape):
        return 0.1 * jax.random.normal(next(ks), shape, jnp.float32)

    def bnp(c):
        return (1.0 + 0.1 * jax.random.normal(next(ks), (c,), jnp.float32),  # gamma
                0.1 * jax.random.normal(next(ks), (c,), jnp.float32),        # beta
                0.1 * jax.random.normal(next(ks), (c,), jnp.float32),        # running_mean
                0.5 + jax.random.uniform(next(ks), (c,), jnp.float32))       # running_var

    P = {}
    P['w1_1'] = w(32, C, 2);      P['bn1_1'] = bnp(32)
    P['w1_2'] = w(32, 32, K);     P['bn1_2'] = bnp(32)
    P['res1_w'] = w(32, C, 1);    P['res1_b'] = w(32)
    P['w2_1'] = w(64, 32, 2);     P['bn2_1'] = bnp(64)
    P['w2_2'] = w(64, 64, 8);     P['bn2_2'] = bnp(64)
    P['res2_w'] = w(64, 32, 1);   P['res2_b'] = w(64)
    P['w3_1'] = w(128, 64, 2);    P['bn3_1'] = bnp(128)
    P['w3_2'] = w(128, 128, 8);   P['bn3_2'] = bnp(128)
    P['res3_w'] = w(128, 64, 1);  P['res3_b'] = w(128)
    P['w4_1'] = w(F, 128, 2);     P['bn4_1'] = bnp(F)
    P['w4_2'] = w(F, F, 2);       P['bn4_2'] = bnp(F)
    P['res4_w'] = w(F, 128, 1);   P['res4_b'] = w(F)
    # decoder (ConvTranspose1d weights: (Cin, Cout, K))
    P['d1_1'] = w(F, 128, 2);     P['dbn1_1'] = bnp(128)
    P['d1_2'] = w(128, 128, 2);   P['dbn1_2'] = bnp(128)
    P['d1_3'] = w(128, 128, 2);   P['dbn1_3'] = bnp(128)
    P['d2_1'] = w(128, 64, 8);    P['dbn2_1'] = bnp(64)
    P['d2_2'] = w(64, 64, 2);     P['dbn2_2'] = bnp(64)
    P['d2_3'] = w(64, 64, 2);     P['dbn2_3'] = bnp(64)
    P['d3_1'] = w(64, 32, 8);     P['dbn3_1'] = bnp(32)
    P['d3_2'] = w(32, 32, 2);     P['dbn3_2'] = bnp(32)
    P['d3_3'] = w(32, 32, 2);     P['dbn3_3'] = bnp(32)
    P['d4_1'] = w(32, C, K);      P['dbn4_1'] = bnp(C)
    lin_in = (cfg['features_len'] * 8 - 1) * cfg['stride'] - 2 * (K // 2) + K
    P['lin_w'] = w(cfg['seq_length'], lin_in)
    P['lin_b'] = w(cfg['seq_length'])
    P['log_w'] = w(cfg['num_classes'], cfg['features_len'] * F)
    P['log_b'] = w(cfg['num_classes'])
    return P


# --------------------------------------------------------------------------
# Plain-JAX/XLA reference of the PyTorch module (for a runtime numerics check)
# --------------------------------------------------------------------------
def _ref_conv(x, w, b=None, *, stride=1, dilation=1, padding=0):
    y = lax.conv_general_dilated(
        x, w, window_strides=(stride,), padding=[(padding, padding)],
        rhs_dilation=(dilation,), dimension_numbers=('NCH', 'OIH', 'NCH'),
        precision=lax.Precision.HIGHEST)
    if b is not None:
        y = y + b[None, :, None]
    return y


def _ref_convT(x, w, *, stride=1, dilation=1, padding=0):
    K = w.shape[2]
    w_conv = jnp.flip(w, axis=2).transpose(1, 0, 2)          # (Cout, Cin, K)
    pad = dilation * (K - 1) - padding
    return lax.conv_general_dilated(
        x, w_conv, window_strides=(1,), padding=[(pad, pad)],
        lhs_dilation=(stride,), rhs_dilation=(dilation,),
        dimension_numbers=('NCH', 'OIH', 'NCH'),
        precision=lax.Precision.HIGHEST)


def _ref_bn(x, bn):
    g, b, m, v = bn
    return ((x - m[None, :, None]) / jnp.sqrt(v[None, :, None] + BN_EPS)
            * g[None, :, None] + b[None, :, None])


def _ref_relu_pool(x):
    return lax.reduce_window(jnp.maximum(x, 0.0), -jnp.inf, lax.max,
                             (1, 1, 2), (1, 1, 2),
                             [(0, 0), (0, 0), (1, 1)])


def ref_forward(x_in, P):
    C, K, S = CFG['input_channels'], CFG['kernel_size'], CFG['stride']
    if x_in.shape[1] != C:
        x_in = jnp.transpose(x_in, (0, 2, 1))
    x = x_in.astype(jnp.float32)

    def block(x, w1, bn1, d1, p1, w2, bn2, p2, s2, rw, rb, rs):
        h = jnp.maximum(_ref_bn(_ref_conv(x, w1, dilation=d1, padding=p1), bn1), 0.0)
        h = _ref_bn(_ref_conv(h, w2, stride=s2, padding=p2), bn2)
        r = _ref_conv(x, rw, rb, stride=rs)
        return _ref_relu_pool(h + r)

    x = block(x, P['w1_1'], P['bn1_1'], 1, 0, P['w1_2'], P['bn1_2'], K // 2, S,
              P['res1_w'], P['res1_b'], S)
    x = block(x, P['w2_1'], P['bn2_1'], 3, 1, P['w2_2'], P['bn2_2'], 4, 1,
              P['res2_w'], P['res2_b'], 1)
    x = block(x, P['w3_1'], P['bn3_1'], 5, 2, P['w3_2'], P['bn3_2'], 4, 1,
              P['res3_w'], P['res3_b'], 1)
    x = block(x, P['w4_1'], P['bn4_1'], 5, 2, P['w4_2'], P['bn4_2'], 1, 1,
              P['res4_w'], P['res4_b'], 1)

    def dlayer(d, w, bn, *, stride=1, dilation=1, padding=0):
        return jnp.maximum(
            _ref_bn(_ref_convT(d, w, stride=stride, dilation=dilation,
                               padding=padding), bn), 0.0)

    d = x
    d = dlayer(d, P['d1_1'], P['dbn1_1'], padding=1)
    d = dlayer(d, P['d1_2'], P['dbn1_2'], dilation=5, padding=2)
    d = dlayer(d, P['d1_3'], P['dbn1_3'], stride=2)
    d = dlayer(d, P['d2_1'], P['dbn2_1'], padding=4)
    d = dlayer(d, P['d2_2'], P['dbn2_2'], dilation=5, padding=2)
    d = dlayer(d, P['d2_3'], P['dbn2_3'], stride=2)
    d = dlayer(d, P['d3_1'], P['dbn3_1'], padding=4)
    d = dlayer(d, P['d3_2'], P['dbn3_2'], dilation=3, padding=1)
    d = dlayer(d, P['d3_3'], P['dbn3_3'], stride=2)
    d = dlayer(d, P['d4_1'], P['dbn4_1'], stride=S, padding=K // 2)

    d = jnp.maximum(
        jnp.einsum('bcl,sl->bcs', d, P['lin_w'],
                   precision=lax.Precision.HIGHEST)
        + P['lin_b'][None, None, :], 0.0)

    x_flat = x.reshape(x.shape[0], -1)
    logits = jnp.dot(x_flat, P['log_w'].T,
                     precision=lax.Precision.HIGHEST) + P['log_b'][None, :]
    return logits, x, d


# --------------------------------------------------------------------------
if __name__ == "__main__":
    key = jax.random.PRNGKey(0)
    k_x, k_p = jax.random.split(key)
    x_in = jax.random.normal(
        k_x, (BATCH, CFG['input_channels'], CFG['seq_length']), jnp.float32)
    params = init_params(k_p, CFG)

    fwd = jax.jit(forward)
    logits, x_enc, d = fwd(x_in, params)
    jax.block_until_ready((logits, x_enc, d))

    assert logits.shape == (BATCH, CFG['num_classes'])
    assert x_enc.shape == (BATCH, CFG['final_out_channels'], CFG['features_len'])
    assert d.shape == (BATCH, CFG['input_channels'], CFG['seq_length'])
    assert all(bool(jnp.all(jnp.isfinite(t))) for t in (logits, x_enc, d))

    # numerics check against a plain-JAX/XLA transcription of the PyTorch module
    r_logits, r_enc, r_d = jax.jit(ref_forward)(x_in, params)
    for name, got, ref in (("logits", logits, r_logits),
                           ("features", x_enc, r_enc),
                           ("decoded", d, r_d)):
        err = float(jnp.max(jnp.abs(got - ref)))
        tol = 1e-3 + 5e-2 * float(jnp.max(jnp.abs(ref)))
        assert err <= tol, f"{name}: max|diff|={err:.3e} > tol={tol:.3e}"

    print("KERNEL_OK")
</pallas_src>

<mosaic_0001>
module attributes {stable_mosaic.version = 11 : i64} {
  func.func @kernel(%arg0: i32, %arg1: memref<1x16x4xf32, #tpu.memory_space<vmem>>, %arg2: memref<5376x128xf32, #tpu.memory_space<vmem>>, %arg3: memref<1x24x128xf32, #tpu.memory_space<vmem>>) attributes {dimension_semantics = [#tpu.dimension_semantics<parallel>], iteration_bounds = array<i64: 2>, scalar_prefetch = 0 : i64, scratch_operands = 0 : i64, tpu.core_type = #tpu.core_type<tc>, window_params = [{transform_indices = @transform_0, window_bounds = array<i64: 1, 16, 4>}, {pipeline_mode = #tpu.pipeline_mode<synchronous>, transform_indices = @transform_1, window_bounds = array<i64: 5376, 128>}, {transform_indices = @transform_2, window_bounds = array<i64: 1, 24, 128>}]} {
    %c0 = arith.constant 0 : index
    %c0_0 = arith.constant 0 : index
    %c0_1 = arith.constant 0 : index
    %0 = vector.load %arg1[%c0, %c0_0, %c0_1] : memref<1x16x4xf32, #tpu.memory_space<vmem>>, vector<1x16x4xf32>
    %1 = vector.shape_cast %0 : vector<1x16x4xf32> to vector<16x4xf32>
    %2 = vector.extract_strided_slice %1 {offsets = [0, 0], sizes = [15, 4], strides = [1, 1]} : vector<16x4xf32> to vector<15x4xf32>
    %3 = vector.extract_strided_slice %1 {offsets = [1, 0], sizes = [15, 4], strides = [1, 1]} : vector<16x4xf32> to vector<15x4xf32>
    %4 = tpu.concatenate %2, %3 in 1 : vector<15x4xf32>, vector<15x4xf32> -> vector<15x8xf32>
    %c0_2 = arith.constant 0 : index
    %c0_3 = arith.constant 0 : index
    %5 = vector.load %arg2[%c0_2, %c0_3] : memref<5376x128xf32, #tpu.memory_space<vmem>>, vector<8x32xf32>
    %cst = arith.constant dense<0.000000e+00> : vector<15x32xf32>
    %6 = tpu.matmul %4, %5, %cst {dimension_numbers = #tpu.dot_dimension_numbers<[1], [0], [0], [1], [0, 0, 1, 1], [], []>} : vector<15x8xf32>, vector<8x32xf32>, vector<15x32xf32> -> vector<15x32xf32>
    %c5352 = arith.constant 5352 : index
    %c0_4 = arith.constant 0 : index
    %7 = vector.load %arg2[%c5352, %c0_4] : memref<5376x128xf32, #tpu.memory_space<vmem>>, vector<1x32xf32>
    %8 = vector.broadcast %7 : vector<1x32xf32> to vector<15x32xf32>
    %9 = arith.addf %6, %8 : vector<15x32xf32>
    %cst_5 = arith.constant 0.000000e+00 : f32
    %10 = vector.broadcast %cst_5 : f32 to vector<15x32xf32>
    %11 = arith.maximumf %9, %10 : vector<15x32xf32>
    %cst_6 = arith.constant 0.000000e+00 : f32
    %12 = vector.broadcast %cst_6 : f32 to vector<4x32xf32>
    %13 = tpu.concatenate %12, %11, %12 in 0 : vector<4x32xf32>, vector<15x32xf32>, vector<4x32xf32> -> vector<23x32xf32>
    %14 = vector.extract_strided_slice %13 {offsets = [0, 0], sizes = [16, 32], strides = [1, 1]} : vector<23x32xf32> to vector<16x32xf32>
    %15 = vector.extract_strided_slice %13 {offsets = [1, 0], sizes = [16, 32], strides = [1, 1]} : vector<23x32xf32> to vector<16x32xf32>
    %16 = vector.extract_strided_slice %13 {offsets = [2, 0], sizes = [16, 32], strides = [1, 1]} : vector<23x32xf32> to vector<16x32xf32>
    %17 = vector.extract_strided_slice %13 {offsets = [3, 0], sizes = [16, 32], strides = [1, 1]} : vector<23x32xf32> to vector<16x32xf32>
    %18 = vector.extract_strided_slice %13 {offsets = [4, 0], sizes = [16, 32], strides = [1, 1]} : vector<23x32xf32> to vector<16x32xf32>
    %19 = vector.extract_strided_slice %13 {offsets = [5, 0], sizes = [16, 32], strides = [1, 1]} : vector<23x32xf32> to vector<16x32xf32>
    %20 = vector.extract_strided_slice %13 {offsets = [6, 0], sizes = [16, 32], strides = [1, 1]} : vector<23x32xf32> to vector<16x32xf32>
    %21 = vector.extract_strided_slice %13 {offsets = [7, 0], sizes = [16, 32], strides = [1, 1]} : vector<23x32xf32> to vector<16x32xf32>
    %22 = tpu.concatenate %14, %15, %16, %17, %18, %19, %20, %21 in 1 : vector<16x32xf32>, vector<16x32xf32>, vector<16x32xf32>, vector<16x32xf32>, vector<16x32xf32>, vector<16x32xf32>, vector<16x32xf32>, vector<16x32xf32> -> vector<16x256xf32>
    %c8 = arith.constant 8 : index
    %c0_7 = arith.constant 0 : index
    %23 = vector.load %arg2[%c8, %c0_7] : memref<5376x128xf32, #tpu.memory_space<vmem>>, vector<256x32xf32>
    %cst_8 = arith.constant dense<0.000000e+00> : vector<16x32xf32>
    %24 = tpu.matmul %22, %23, %cst_8 {dimension_numbers = #tpu.dot_dimension_numbers<[1], [0], [0], [1], [0, 0, 1, 1], [], []>} : vector<16x256xf32>, vector<256x32xf32>, vector<16x32xf32> -> vector<16x32xf32>
    %c5353 = arith.constant 5353 : index
    %c0_9 = arith.constant 0 : index
    %25 = vector.load %arg2[%c5353, %c0_9] : memref<5376x128xf32, #tpu.memory_space<vmem>>, vector<1x32xf32>
    %26 = vector.broadcast %25 : vector<1x32xf32> to vector<16x32xf32>
    %27 = arith.addf %24, %26 : vector<16x32xf32>
    %c264 = arith.constant 264 : index
    %c0_10 = arith.constant 0 : index
    %28 = vector.load %arg2[%c264, %c0_10] : memref<5376x128xf32, #tpu.memory_space<vmem>>, vector<4x32xf32>
    %cst_11 = arith.constant dense<0.000000e+00> : vector<16x32xf32>
    %29 = tpu.matmul %1, %28, %cst_11 {dimension_numbers = #tpu.dot_dimension_numbers<[1], [0], [0], [1], [0, 0, 1, 1], [], []>} : vector<16x4xf32>, vector<4x32xf32>, vector<16x32xf32> -> vector<16x32xf32>
    %c5354 = arith.constant 5354 : index
    %c0_12 = arith.constant 0 : index
    %30 = vector.load %arg2[%c5354, %c0_12] : memref<5376x128xf32, #tpu.memory_space<vmem>>, vector<1x32xf32>
    %31 = vector.broadcast %30 : vector<1x32xf32> to vector<16x32xf32>
    %32 = arith.addf %29, %31 : vector<16x32xf32>
    %33 = arith.addf %27, %32 : vector<16x32xf32>
    %cst_13 = arith.constant 0.000000e+00 : f32
    %34 = vector.broadcast %cst_13 : f32 to vector<16x32xf32>
    %35 = arith.maximumf %33, %34 : vector<16x32xf32>
    %cst_14 = arith.constant 0.000000e+00 : f32
    %36 = vector.broadcast %cst_14 : f32 to vector<1x32xf32>
    %cst_15 = arith.constant 0.000000e+00 : f32
    %37 = vector.broadcast %cst_15 : f32 to vector<1x32xf32>
    %38 = tpu.concatenate %36, %35, %37 in 0 : vector<1x32xf32>, vector<16x32xf32>, vector<1x32xf32> -> vector<18x32xf32>
    %39 = vector.extract_strided_slice %38 {offsets = [0, 0], sizes = [17, 32], strides = [1, 1]} : vector<18x32xf32> to vector<17x32xf32>
    %40 = vector.extract_strided_slice %38 {offsets = [1, 0], sizes = [17, 32], strides = [1, 1]} : vector<18x32xf32> to vector<17x32xf32>
    %41 = arith.maximumf %39, %40 : vector<17x32xf32>
    %c5280 = arith.constant 5280 : index
    %c0_16 = arith.constant 0 : index
    %42 = vector.load %arg2[%c5280, %c0_16] : memref<5376x128xf32, #tpu.memory_space<vmem>>, vector<9x17xf32>
    %cst_17 = arith.constant dense<0.000000e+00> : vector<9x32xf32>
    %43 = tpu.matmul %42, %41, %cst_17 {dimension_numbers = #tpu.dot_dimension_numbers<[1], [0], [0], [1], [0, 0, 1, 1], [], []>} : vector<9x17xf32>, vector<17x32xf32>, vector<9x32xf32> -> vector<9x32xf32>
    %cst_18 = arith.constant 0.000000e+00 : f32
    %44 = vector.broadcast %cst_18 : f32 to vector<1x32xf32>
    %45 = tpu.concatenate %44, %43, %44 in 0 : vector<1x32xf32>, vector<9x32xf32>, vector<1x32xf32> -> vector<11x32xf32>
    %46 = vector.extract_strided_slice %45 {offsets = [0, 0], sizes = [8, 32], strides = [1, 1]} : vector<11x32xf32> to vector<8x32xf32>
    %47 = vector.extract_strided_slice %45 {offsets = [3, 0], sizes = [8, 32], strides = [1, 1]} : vector<11x32xf32> to vector<8x32xf32>
    %48 = tpu.concatenate %46, %47 in 1 : vector<8x32xf32>, vector<8x32xf32> -> vector<8x64xf32>
    %c272 = arith.constant 272 : index
    %c0_19 = arith.constant 0 : index
    %49 = vector.load %arg2[%c272, %c0_19] : memref<5376x128xf32, #tpu.memory_space<vmem>>, vector<64x64xf32>
    %cst_20 = arith.constant dense<0.000000e+00> : vector<8x64xf32>
    %50 = tpu.matmul %48, %49, %cst_20 {dimension_numbers = #tpu.dot_dimension_numbers<[1], [0], [0], [1], [0, 0, 1, 1], [], []>} : vector<8x64xf32>, vector<64x64xf32>, vector<8x64xf32> -> vector<8x64xf32>
    %c5355 = arith.constant 5355 : index
    %c0_21 = arith.constant 0 : index
    %51 = vector.load %arg2[%c5355, %c0_21] : memref<5376x128xf32, #tpu.memory_space<vmem>>, vector<1x64xf32>
    %52 = vector.broadcast %51 : vector<1x64xf32> to vector<8x64xf32>
    %53 = arith.addf %50, %52 : vector<8x64xf32>
    %cst_22 = arith.constant 0.000000e+00 : f32
    %54 = vector.broadcast %cst_22 : f32 to vector<8x64xf32>
    %55 = arith.maximumf %53, %54 : vector<8x64xf32>
    %cst_23 = arith.constant 0.000000e+00 : f32
    %56 = vector.broadcast %cst_23 : f32 to vector<4x64xf32>
    %57 = tpu.concatenate %56, %55, %56 in 0 : vector<4x64xf32>, vector<8x64xf32>, vector<4x64xf32> -> vector<16x64xf32>
    %58 = vector.extract_strided_slice %57 {offsets = [0, 0], sizes = [9, 64], strides = [1, 1]} : vector<16x64xf32> to vector<9x64xf32>
    %59 = vector.extract_strided_slice %57 {offsets = [1, 0], sizes = [9, 64], strides = [1, 1]} : vector<16x64xf32> to vector<9x64xf32>
    %60 = vector.extract_strided_slice %57 {offsets = [2, 0], sizes = [9, 64], strides = [1, 1]} : vector<16x64xf32> to vector<9x64xf32>
    %61 = vector.extract_strided_slice %57 {offsets = [3, 0], sizes = [9, 64], strides = [1, 1]} : vector<16x64xf32> to vector<9x64xf32>
    %62 = vector.extract_strided_slice %57 {offsets = [4, 0], sizes = [9, 64], strides = [1, 1]} : vector<16x64xf32> to vector<9x64xf32>
    %63 = vector.extract_strided_slice %57 {offsets = [5, 0], sizes = [9, 64], strides = [1, 1]} : vector<16x64xf32> to vector<9x64xf32>
    %64 = vector.extract_strided_slice %57 {offsets = [6, 0], sizes = [9, 64], strides = [1, 1]} : vector<16x64xf32> to vector<9x64xf32>
    %65 = vector.extract_strided_slice %57 {offsets = [7, 0], sizes = [9, 64], strides = [1, 1]} : vector<16x64xf32> to vector<9x64xf32>
    %66 = tpu.concatenate %58, %59, %60, %61, %62, %63, %64, %65 in 1 : vector<9x64xf32>, vector<9x64xf32>, vector<9x64xf32>, vector<9x64xf32>, vector<9x64xf32>, vector<9x64xf32>, vector<9x64xf32>, vector<9x64xf32> -> vector<9x512xf32>
    %c336 = arith.constant 336 : index
    %c0_24 = arith.constant 0 : index
    %67 = vector.load %arg2[%c336, %c0_24] : memref<5376x128xf32, #tpu.memory_space<vmem>>, vector<512x64xf32>
    %cst_25 = arith.constant dense<0.000000e+00> : vector<9x64xf32>
    %68 = tpu.matmul %66, %67, %cst_25 {dimension_numbers = #tpu.dot_dimension_numbers<[1], [0], [0], [1], [0, 0, 1, 1], [], []>} : vector<9x512xf32>, vector<512x64xf32>, vector<9x64xf32> -> vector<9x64xf32>
    %c5356 = arith.constant 5356 : index
    %c0_26 = arith.constant 0 : index
    %69 = vector.load %arg2[%c5356, %c0_26] : memref<5376x128xf32, #tpu.memory_space<vmem>>, vector<1x64xf32>
    %70 = vector.broadcast %69 : vector<1x64xf32> to vector<9x64xf32>
    %71 = arith.addf %68, %70 : vector<9x64xf32>
    %c848 = arith.constant 848 : index
    %c0_27 = arith.constant 0 : index
    %72 = vector.load %arg2[%c848, %c0_27] : memref<5376x128xf32, #tpu.memory_space<vmem>>, vector<32x64xf32>
    %cst_28 = arith.constant dense<0.000000e+00> : vector<9x64xf32>
    %73 = tpu.matmul %43, %72, %cst_28 {dimension_numbers = #tpu.dot_dimension_numbers<[1], [0], [0], [1], [0, 0, 1, 1], [], []>} : vector<9x32xf32>, vector<32x64xf32>, vector<9x64xf32> -> vector<9x64xf32>
    %c5357 = arith.constant 5357 : index
    %c0_29 = arith.constant 0 : index
    %74 = vector.load %arg2[%c5357, %c0_29] : memref<5376x128xf32, #tpu.memory_space<vmem>>, vector<1x64xf32>
    %75 = vector.broadcast %74 : vector<1x64xf32> to vector<9x64xf32>
    %76 = arith.addf %73, %75 : vector<9x64xf32>
    %77 = arith.addf %71, %76 : vector<9x64xf32>
    %cst_30 = arith.constant 0.000000e+00 : f32
    %78 = vector.broadcast %cst_30 : f32 to vector<9x64xf32>
    %79 = arith.maximumf %77, %78 : vector<9x64xf32>
    %cst_31 = arith.constant 0.000000e+00 : f32
    %80 = vector.broadcast %cst_31 : f32 to vector<1x64xf32>
    %81 = tpu.concatenate %80, %79 in 0 : vector<1x64xf32>, vector<9x64xf32> -> vector<10x64xf32>
    %82 = vector.extract_strided_slice %81 {offsets = [0, 0], sizes = [9, 64], strides = [1, 1]} : vector<10x64xf32> to vector<9x64xf32>
    %83 = vector.extract_strided_slice %81 {offsets = [1, 0], sizes = [9, 64], strides = [1, 1]} : vector<10x64xf32> to vector<9x64xf32>
    %84 = arith.maximumf %82, %83 : vector<9x64xf32>
    %c5296 = arith.constant 5296 : index
    %c0_32 = arith.constant 0 : index
    %85 = vector.load %arg2[%c5296, %c0_32] : memref<5376x128xf32, #tpu.memory_space<vmem>>, vector<5x9xf32>
    %cst_33 = arith.constant dense<0.000000e+00> : vector<5x64xf32>
    %86 = tpu.matmul %85, %84, %cst_33 {dimension_numbers = #tpu.dot_dimension_numbers<[1], [0], [0], [1], [0, 0, 1, 1], [], []>} : vector<5x9xf32>, vector<9x64xf32>, vector<5x64xf32> -> vector<5x64xf32>
    %cst_34 = arith.constant 0.000000e+00 : f32
    %87 = vector.broadcast %cst_34 : f32 to vector<2x64xf32>
    %88 = tpu.concatenate %87, %86, %87 in 0 : vector<2x64xf32>, vector<5x64xf32>, vector<2x64xf32> -> vector<9x64xf32>
    %89 = vector.extract_strided_slice %88 {offsets = [0, 0], sizes = [4, 64], strides = [1, 1]} : vector<9x64xf32> to vector<4x64xf32>
    %90 = vector.extract_strided_slice %88 {offsets = [5, 0], sizes = [4, 64], strides = [1, 1]} : vector<9x64xf32> to vector<4x64xf32>
    %91 = tpu.concatenate %89, %90 in 1 : vector<4x64xf32>, vector<4x64xf32> -> vector<4x128xf32>
    %c880 = arith.constant 880 : index
    %c0_35 = arith.constant 0 : index
    %92 = vector.load %arg2[%c880, %c0_35] : memref<5376x128xf32, #tpu.memory_space<vmem>>, vector<128x128xf32>
    %cst_36 = arith.constant dense<0.000000e+00> : vector<4x128xf32>
    %93 = tpu.matmul %91, %92, %cst_36 {dimension_numbers = #tpu.dot_dimension_numbers<[1], [0], [0], [1], [0, 0, 1, 1], [], []>} : vector<4x128xf32>, vector<128x128xf32>, vector<4x128xf32> -> vector<4x128xf32>
    %c5358 = arith.constant 5358 : index
    %c0_37 = arith.constant 0 : index
    %94 = vector.load %arg2[%c5358, %c0_37] : memref<5376x128xf32, #tpu.memory_space<vmem>>, vector<1x128xf32>
    %95 = vector.broadcast %94 : vector<1x128xf32> to vector<4x128xf32>
    %96 = arith.addf %93, %95 : vector<4x128xf32>
    %cst_38 = arith.constant 0.000000e+00 : f32
    %97 = vector.broadcast %cst_38 : f32 to vector<4x128xf32>
    %98 = arith.maximumf %96, %97 : vector<4x128xf32>
    %cst_39 = arith.constant 0.000000e+00 : f32
    %99 = vector.broadcast %cst_39 : f32 to vector<4x128xf32>
    %100 = tpu.concatenate %99, %98, %99 in 0 : vector<4x128xf32>, vector<4x128xf32>, vector<4x128xf32> -> vector<12x128xf32>
    %101 = vector.extract_strided_slice %100 {offsets = [0, 0], sizes = [5, 128], strides = [1, 1]} : vector<12x128xf32> to vector<5x128xf32>
    %102 = vector.extract_strided_slice %100 {offsets = [1, 0], sizes = [5, 128], strides = [1, 1]} : vector<12x128xf32> to vector<5x128xf32>
    %103 = vector.extract_strided_slice %100 {offsets = [2, 0], sizes = [5, 128], strides = [1, 1]} : vector<12x128xf32> to vector<5x128xf32>
    %104 = vector.extract_strided_slice %100 {offsets = [3, 0], sizes = [5, 128], strides = [1, 1]} : vector<12x128xf32> to vector<5x128xf32>
    %105 = vector.extract_strided_slice %100 {offsets = [4, 0], sizes = [5, 128], strides = [1, 1]} : vector<12x128xf32> to vector<5x128xf32>
    %106 = vector.extract_strided_slice %100 {offsets = [5, 0], sizes = [5, 128], strides = [1, 1]} : vector<12x128xf32> to vector<5x128xf32>
    %107 = vector.extract_strided_slice %100 {offsets = [6, 0], sizes = [5, 128], strides = [1, 1]} : vector<12x128xf32> to vector<5x128xf32>
    %108 = vector.extract_strided_slice %100 {offsets = [7, 0], sizes = [5, 128], strides = [1, 1]} : vector<12x128xf32> to vector<5x128xf32>
    %109 = tpu.concatenate %101, %102, %103, %104, %105, %106, %107, %108 in 1 : vector<5x128xf32>, vector<5x128xf32>, vector<5x128xf32>, vector<5x128xf32>, vector<5x128xf32>, vector<5x128xf32>, vector<5x128xf32>, vector<5x128xf32> -> vector<5x1024xf32>
    %c1008 = arith.constant 1008 : index
    %c0_40 = arith.constant 0 : index
    %110 = vector.load %arg2[%c1008, %c0_40] : memref<5376x128xf32, #tpu.memory_space<vmem>>, vector<1024x128xf32>
    %cst_41 = arith.constant dense<0.000000e+00> : vector<5x128xf32>
    %111 = tpu.matmul %109, %110, %cst_41 {dimension_numbers = #tpu.dot_dimension_numbers<[1], [0], [0], [1], [0, 0, 1, 1], [], []>} : vector<5x1024xf32>, vector<1024x128xf32>, vector<5x128xf32> -> vector<5x128xf32>
    %c5359 = arith.constant 5359 : index
    %c0_42 = arith.constant 0 : index
    %112 = vector.load %arg2[%c5359, %c0_42] : memref<5376x128xf32, #tpu.memory_space<vmem>>, vector<1x128xf32>
    %113 = vector.broadcast %112 : vector<1x128xf32> to vector<5x128xf32>
    %114 = arith.addf %111, %113 : vector<5x128xf32>
    %c2032 = arith.constant 2032 : index
    %c0_43 = arith.constant 0 : index
    %115 = vector.load %arg2[%c2032, %c0_43] : memref<5376x128xf32, #tpu.memory_space<vmem>>, vector<64x128xf32>
    %cst_44 = arith.constant dense<0.000000e+00> : vector<5x128xf32>
    %116 = tpu.matmul %86, %115, %cst_44 {dimension_numbers = #tpu.dot_dimension_numbers<[1], [0], [0], [1], [0, 0, 1, 1], [], []>} : vector<5x64xf32>, vector<64x128xf32>, vector<5x128xf32> -> vector<5x128xf32>
    %c5360 = arith.constant 5360 : index
    %c0_45 = arith.constant 0 : index
    %117 = vector.load %arg2[%c5360, %c0_45] : memref<5376x128xf32, #tpu.memory_space<vmem>>, vector<1x128xf32>
    %118 = vector.broadcast %117 : vector<1x128xf32> to vector<5x128xf32>
    %119 = arith.addf %116, %118 : vector<5x128xf32>
    %120 = arith.addf %114, %119 : vector<5x128xf32>
    %cst_46 = arith.constant 0.000000e+00 : f32
    %121 = vector.broadcast %cst_46 : f32 to vector<5x128xf32>
    %122 = arith.maximumf %120, %121 : vector<5x128xf32>
    %cst_47 = arith.constant 0.000000e+00 : f32
    %123 = vector.broadcast %cst_47 : f32 to vector<1x128xf32>
    %124 = tpu.concatenate %123, %122 in 0 : vector<1x128xf32>, vector<5x128xf32> -> vector<6x128xf32>
    %125 = vector.extract_strided_slice %124 {offsets = [0, 0], sizes = [5, 128], strides = [1, 1]} : vector<6x128xf32> to vector<5x128xf32>
    %126 = vector.extract_strided_slice %124 {offsets = [1, 0], sizes = [5, 128], strides = [1, 1]} : vector<6x128xf32> to vector<5x128xf32>
    %127 = arith.maximumf %125, %126 : vector<5x128xf32>
    %c5304 = arith.constant 5304 : index
    %c0_48 = arith.constant 0 : index
    %128 = vector.load %arg2[%c5304, %c0_48] : memref<5376x128xf32, #tpu.memory_space<vmem>>, vector<3x5xf32>
    %cst_49 = arith.constant dense<0.000000e+00> : vector<3x128xf32>
    %129 = tpu.matmul %128, %127, %cst_49 {dimension_numbers = #tpu.dot_dimension_numbers<[1], [0], [0], [1], [0, 0, 1, 1], [], []>} : vector<3x5xf32>, vector<5x128xf32>, vector<3x128xf32> -> vector<3x128xf32>
    %cst_50 = arith.constant 0.000000e+00 : f32
    %130 = vector.broadcast %cst_50 : f32 to vector<2x128xf32>
    %131 = tpu.concatenate %130, %129, %130 in 0 : vector<2x128xf32>, vector<3x128xf32>, vector<2x128xf32> -> vector<7x128xf32>
    %132 = vector.extract_strided_slice %131 {offsets = [0, 0], sizes = [2, 128], strides = [1, 1]} : vector<7x128xf32> to vector<2x128xf32>
    %133 = vector.extract_strided_slice %131 {offsets = [5, 0], sizes = [2, 128], strides = [1, 1]} : vector<7x128xf32> to vector<2x128xf32>
    %134 = tpu.concatenate %132, %133 in 1 : vector<2x128xf32>, vector<2x128xf32> -> vector<2x256xf32>
    %c2096 = arith.constant 2096 : index
    %c0_51 = arith.constant 0 : index
    %135 = vector.load %arg2[%c2096, %c0_51] : memref<5376x128xf32, #tpu.memory_space<vmem>>, vector<256x16xf32>
    %cst_52 = arith.constant dense<0.000000e+00> : vector<2x16xf32>
    %136 = tpu.matmul %134, %135, %cst_52 {dimension_numbers = #tpu.dot_dimension_numbers<[1], [0], [0], [1], [0, 0, 1, 1], [], []>} : vector<2x256xf32>, vector<256x16xf32>, vector<2x16xf32> -> vector<2x16xf32>
    %c5361 = arith.constant 5361 : index
    %c0_53 = arith.constant 0 : index
    %137 = vector.load %arg2[%c5361, %c0_53] : memref<5376x128xf32, #tpu.memory_space<vmem>>, vector<1x16xf32>
    %138 = vector.broadcast %137 : vector<1x16xf32> to vector<2x16xf32>
    %139 = arith.addf %136, %138 : vector<2x16xf32>
    %cst_54 = arith.constant 0.000000e+00 : f32
    %140 = vector.broadcast %cst_54 : f32 to vector<2x16xf32>
    %141 = arith.maximumf %139, %140 : vector<2x16xf32>
    %cst_55 = arith.constant 0.000000e+00 : f32
    %142 = vector.broadcast %cst_55 : f32 to vector<1x16xf32>
    %143 = tpu.concatenate %142, %141, %142 in 0 : vector<1x16xf32>, vector<2x16xf32>, vector<1x16xf32> -> vector<4x16xf32>
    %144 = vector.extract_strided_slice %143 {offsets = [0, 0], sizes = [3, 16], strides = [1, 1]} : vector<4x16xf32> to vector<3x16xf32>
    %145 = vector.extract_strided_slice %143 {offsets = [1, 0], sizes = [3, 16], strides = [1, 1]} : vector<4x16xf32> to vector<3x16xf32>
    %146 = tpu.concatenate %144, %145 in 1 : vector<3x16xf32>, vector<3x16xf32> -> vector<3x32xf32>
    %c2352 = arith.constant 2352 : index
    %c0_56 = arith.constant 0 : index
    %147 = vector.load %arg2[%c2352, %c0_56] : memref<5376x128xf32, #tpu.memory_space<vmem>>, vector<32x16xf32>
    %cst_57 = arith.constant dense<0.000000e+00> : vector<3x16xf32>
    %148 = tpu.matmul %146, %147, %cst_57 {dimension_numbers = #tpu.dot_dimension_numbers<[1], [0], [0], [1], [0, 0, 1, 1], [], []>} : vector<3x32xf32>, vector<32x16xf32>, vector<3x16xf32> -> vector<3x16xf32>
    %c5362 = arith.constant 5362 : index
    %c0_58 = arith.constant 0 : index
    %149 = vector.load %arg2[%c5362, %c0_58] : memref<5376x128xf32, #tpu.memory_space<vmem>>, vector<1x16xf32>
    %150 = vector.broadcast %149 : vector<1x16xf32> to vector<3x16xf32>
    %151 = arith.addf %148, %150 : vector<3x16xf32>
    %c2384 = arith.constant 2384 : index
    %c0_59 = arith.constant 0 : index
    %152 = vector.load %arg2[%c2384, %c0_59] : memref<5376x128xf32, #tpu.memory_space<vmem>>, vector<128x16xf32>
    %cst_60 = arith.constant dense<0.000000e+00> : vector<3x16xf32>
    %153 = tpu.matmul %129, %152, %cst_60 {dimension_numbers = #tpu.dot_dimension_numbers<[1], [0], [0], [1], [0, 0, 1, 1], [], []>} : vector<3x128xf32>, vector<128x16xf32>, vector<3x16xf32> -> vector<3x16xf32>
    %c5363 = arith.constant 5363 : index
    %c0_61 = arith.constant 0 : index
    %154 = vector.load %arg2[%c5363, %c0_61] : memref<5376x128xf32, #tpu.memory_space<vmem>>, vector<1x16xf32>
    %155 = vector.broadcast %154 : vector<1x16xf32> to vector<3x16xf32>
    %156 = arith.addf %153, %155 : vector<3x16xf32>
    %157 = arith.addf %151, %156 : vector<3x16xf32>
    %cst_62 = arith.constant 0.000000e+00 : f32
    %158 = vector.broadcast %cst_62 : f32 to vector<3x16xf32>
    %159 = arith.maximumf %157, %158 : vector<3x16xf32>
    %cst_63 = arith.constant 0.000000e+00 : f32
    %160 = vector.broadcast %cst_63 : f32 to vector<1x16xf32>
    %161 = tpu.concatenate %160, %159 in 0 : vector<1x16xf32>, vector<3x16xf32> -> vector<4x16xf32>
    %162 = vector.extract_strided_slice %161 {offsets = [0, 0], sizes = [3, 16], strides = [1, 1]} : vector<4x16xf32> to vector<3x16xf32>
    %163 = vector.extract_strided_slice %161 {offsets = [1, 0], sizes = [3, 16], strides = [1, 1]} : vector<4x16xf32> to vector<3x16xf32>
    %164 = arith.maximumf %162, %163 : vector<3x16xf32>
    %c5312 = arith.constant 5312 : index
    %c0_64 = arith.constant 0 : index
    %165 = vector.load %arg2[%c5312, %c0_64] : memref<5376x128xf32, #tpu.memory_space<vmem>>, vector<2x3xf32>
    %cst_65 = arith.constant dense<0.000000e+00> : vector<2x16xf32>
    %166 = tpu.matmul %165, %164, %cst_65 {dimension_numbers = #tpu.dot_dimension_numbers<[1], [0], [0], [1], [0, 0, 1, 1], [], []>} : vector<2x3xf32>, vector<3x16xf32>, vector<2x16xf32> -> vector<2x16xf32>
    %167 = vector.extract_strided_slice %166 {offsets = [0, 0], sizes = [1, 16], strides = [1, 1]} : vector<2x16xf32> to vector<1x16xf32>
    %168 = vector.extract_strided_slice %166 {offsets = [1, 0], sizes = [1, 16], strides = [1, 1]} : vector<2x16xf32> to vector<1x16xf32>
    %169 = tpu.concatenate %167, %168 in 1 : vector<1x16xf32>, vector<1x16xf32> -> vector<1x32xf32>
    %c2512 = arith.constant 2512 : index
    %c0_66 = arith.constant 0 : index
    %170 = vector.load %arg2[%c2512, %c0_66] : memref<5376x128xf32, #tpu.memory_space<vmem>>, vector<32x128xf32>
    %cst_67 = arith.constant dense<0.000000e+00> : vector<1x128xf32>
    %171 = tpu.matmul %169, %170, %cst_67 {dimension_numbers = #tpu.dot_dimension_numbers<[1], [0], [0], [1], [0, 0, 1, 1], [], []>} : vector<1x32xf32>, vector<32x128xf32>, vector<1x128xf32> -> vector<1x128xf32>
    %c5364 = arith.constant 5364 : index
    %c0_68 = arith.constant 0 : index
    %172 = vector.load %arg2[%c5364, %c0_68] : memref<5376x128xf32, #tpu.memory_space<vmem>>, vector<1x128xf32>
    %173 = arith.addf %171, %172 : vector<1x128xf32>
    %cst_69 = arith.constant 0.000000e+00 : f32
    %174 = vector.broadcast %cst_69 : f32 to vector<1x128xf32>
    %175 = arith.maximumf %173, %174 : vector<1x128xf32>
    %cst_70 = arith.constant 0.000000e+00 : f32
    %176 = vector.broadcast %cst_70 : f32 to vector<3x128xf32>
    %177 = tpu.concatenate %176, %175, %176 in 0 : vector<3x128xf32>, vector<1x128xf32>, vector<3x128xf32> -> vector<7x128xf32>
    %178 = vector.extract_strided_slice %177 {offsets = [0, 0], sizes = [2, 128], strides = [1, 1]} : vector<7x128xf32> to vector<2x128xf32>
    %179 = vector.extract_strided_slice %177 {offsets = [5, 0], sizes = [2, 128], strides = [1, 1]} : vector<7x128xf32> to vector<2x128xf32>
    %180 = tpu.concatenate %178, %179 in 1 : vector<2x128xf32>, vector<2x128xf32> -> vector<2x256xf32>
    %c2544 = arith.constant 2544 : index
    %c0_71 = arith.constant 0 : index
    %181 = vector.load %arg2[%c2544, %c0_71] : memref<5376x128xf32, #tpu.memory_space<vmem>>, vector<256x128xf32>
    %cst_72 = arith.constant dense<0.000000e+00> : vector<2x128xf32>
    %182 = tpu.matmul %180, %181, %cst_72 {dimension_numbers = #tpu.dot_dimension_numbers<[1], [0], [0], [1], [0, 0, 1, 1], [], []>} : vector<2x256xf32>, vector<256x128xf32>, vector<2x128xf32> -> vector<2x128xf32>
    %c5365 = arith.constant 5365 : index
    %c0_73 = arith.constant 0 : index
    %183 = vector.load %arg2[%c5365, %c0_73] : memref<5376x128xf32, #tpu.memory_space<vmem>>, vector<1x128xf32>
    %184 = vector.broadcast %183 : vector<1x128xf32> to vector<2x128xf32>
    %185 = arith.addf %182, %184 : vector<2x128xf32>
    %cst_74 = arith.constant 0.000000e+00 : f32
    %186 = vector.broadcast %cst_74 : f32 to vector<2x128xf32>
    %187 = arith.maximumf %185, %186 : vector<2x128xf32>
    %c5320 = arith.constant 5320 : index
    %c0_75 = arith.constant 0 : index
    %188 = vector.load %arg2[%c5320, %c0_75] : memref<5376x128xf32, #tpu.memory_space<vmem>>, vector<3x2xf32>
    %cst_76 = arith.constant dense<0.000000e+00> : vector<3x128xf32>
    %189 = tpu.matmul %188, %187, %cst_76 {dimension_numbers = #tpu.dot_dimension_numbers<[1], [0], [0], [1], [0, 0, 1, 1], [], []>} : vector<3x2xf32>, vector<2x128xf32>, vector<3x128xf32> -> vector<3x128xf32>
    %cst_77 = arith.constant 0.000000e+00 : f32
    %190 = vector.broadcast %cst_77 : f32 to vector<1x128xf32>
    %191 = tpu.concatenate %190, %189, %190 in 0 : vector<1x128xf32>, vector<3x128xf32>, vector<1x128xf32> -> vector<5x128xf32>
    %192 = vector.extract_strided_slice %191 {offsets = [0, 0], sizes = [4, 128], strides = [1, 1]} : vector<5x128xf32> to vector<4x128xf32>
    %193 = vector.extract_strided_slice %191 {offsets = [1, 0], sizes = [4, 128], strides = [1, 1]} : vector<5x128xf32> to vector<4x128xf32>
    %194 = tpu.concatenate %192, %193 in 1 : vector<4x128xf32>, vector<4x128xf32> -> vector<4x256xf32>
    %c2800 = arith.constant 2800 : index
    %c0_78 = arith.constant 0 : index
    %195 = vector.load %arg2[%c2800, %c0_78] : memref<5376x128xf32, #tpu.memory_space<vmem>>, vector<256x128xf32>
    %cst_79 = arith.constant dense<0.000000e+00> : vector<4x128xf32>
    %196 = tpu.matmul %194, %195, %cst_79 {dimension_numbers = #tpu.dot_dimension_numbers<[1], [0], [0], [1], [0, 0, 1, 1], [], []>} : vector<4x256xf32>, vector<256x128xf32>, vector<4x128xf32> -> vector<4x128xf32>
    %c5366 = arith.constant 5366 : index
    %c0_80 = arith.constant 0 : index
    %197 = vector.load %arg2[%c5366, %c0_80] : memref<5376x128xf32, #tpu.memory_space<vmem>>, vector<1x128xf32>
    %198 = vector.broadcast %197 : vector<1x128xf32> to vector<4x128xf32>
    %199 = arith.addf %196, %198 : vector<4x128xf32>
    %cst_81 = arith.constant 0.000000e+00 : f32
    %200 = vector.broadcast %cst_81 : f32 to vector<4x128xf32>
    %201 = arith.maximumf %199, %200 : vector<4x128xf32>
    %cst_82 = arith.constant 0.000000e+00 : f32
    %202 = vector.broadcast %cst_82 : f32 to vector<3x128xf32>
    %203 = tpu.concatenate %202, %201, %202 in 0 : vector<3x128xf32>, vector<4x128xf32>, vector<3x128xf32> -> vector<10x128xf32>
    %204 = vector.extract_strided_slice %203 {offsets = [0, 0], sizes = [3, 128], strides = [1, 1]} : vector<10x128xf32> to vector<3x128xf32>
    %205 = vector.extract_strided_slice %203 {offsets = [1, 0], sizes = [3, 128], strides = [1, 1]} : vector<10x128xf32> to vector<3x128xf32>
    %206 = vector.extract_strided_slice %203 {offsets = [2, 0], sizes = [3, 128], strides = [1, 1]} : vector<10x128xf32> to vector<3x128xf32>
    %207 = vector.extract_strided_slice %203 {offsets = [3, 0], sizes = [3, 128], strides = [1, 1]} : vector<10x128xf32> to vector<3x128xf32>
    %208 = vector.extract_strided_slice %203 {offsets = [4, 0], sizes = [3, 128], strides = [1, 1]} : vector<10x128xf32> to vector<3x128xf32>
    %209 = vector.extract_strided_slice %203 {offsets = [5, 0], sizes = [3, 128], strides = [1, 1]} : vector<10x128xf32> to vector<3x128xf32>
    %210 = vector.extract_strided_slice %203 {offsets = [6, 0], sizes = [3, 128], strides = [1, 1]} : vector<10x128xf32> to vector<3x128xf32>
    %211 = vector.extract_strided_slice %203 {offsets = [7, 0], sizes = [3, 128], strides = [1, 1]} : vector<10x128xf32> to vector<3x128xf32>
    %212 = tpu.concatenate %204, %205, %206, %207, %208, %209, %210, %211 in 1 : vector<3x128xf32>, vector<3x128xf32>, vector<3x128xf32>, vector<3x128xf32>, vector<3x128xf32>, vector<3x128xf32>, vector<3x128xf32>, vector<3x128xf32> -> vector<3x1024xf32>
    %c3056 = arith.constant 3056 : index
    %c0_83 = arith.constant 0 : index
    %213 = vector.load %arg2[%c3056, %c0_83] : memref<5376x128xf32, #tpu.memory_space<vmem>>, vector<1024x64xf32>
    %cst_84 = arith.constant dense<0.000000e+00> : vector<3x64xf32>
    %214 = tpu.matmul %212, %213, %cst_84 {dimension_numbers = #tpu.dot_dimension_numbers<[1], [0], [0], [1], [0, 0, 1, 1], [], []>} : vector<3x1024xf32>, vector<1024x64xf32>, vector<3x64xf32> -> vector<3x64xf32>
    %c5367 = arith.constant 5367 : index
    %c0_85 = arith.constant 0 : index
    %215 = vector.load %arg2[%c5367, %c0_85] : memref<5376x128xf32, #tpu.memory_space<vmem>>, vector<1x64xf32>
    %216 = vector.broadcast %215 : vector<1x64xf32> to vector<3x64xf32>
    %217 = arith.addf %214, %216 : vector<3x64xf32>
    %cst_86 = arith.constant 0.000000e+00 : f32
    %218 = vector.broadcast %cst_86 : f32 to vector<3x64xf32>
    %219 = arith.maximumf %217, %218 : vector<3x64xf32>
    %cst_87 = arith.constant 0.000000e+00 : f32
    %220 = vector.broadcast %cst_87 : f32 to vector<3x64xf32>
    %221 = tpu.concatenate %220, %219, %220 in 0 : vector<3x64xf32>, vector<3x64xf32>, vector<3x64xf32> -> vector<9x64xf32>
    %222 = vector.extract_strided_slice %221 {offsets = [0, 0], sizes = [4, 64], strides = [1, 1]} : vector<9x64xf32> to vector<4x64xf32>
    %223 = vector.extract_strided_slice %221 {offsets = [5, 0], sizes = [4, 64], strides = [1, 1]} : vector<9x64xf32> to vector<4x64xf32>
    %224 = tpu.concatenate %222, %223 in 1 : vector<4x64xf32>, vector<4x64xf32> -> vector<4x128xf32>
    %c4080 = arith.constant 4080 : index
    %c0_88 = arith.constant 0 : index
    %225 = vector.load %arg2[%c4080, %c0_88] : memref<5376x128xf32, #tpu.memory_space<vmem>>, vector<128x64xf32>
    %cst_89 = arith.constant dense<0.000000e+00> : vector<4x64xf32>
    %226 = tpu.matmul %224, %225, %cst_89 {dimension_numbers = #tpu.dot_dimension_numbers<[1], [0], [0], [1], [0, 0, 1, 1], [], []>} : vector<4x128xf32>, vector<128x64xf32>, vector<4x64xf32> -> vector<4x64xf32>
    %c5368 = arith.constant 5368 : index
    %c0_90 = arith.constant 0 : index
    %227 = vector.load %arg2[%c5368, %c0_90] : memref<5376x128xf32, #tpu.memory_space<vmem>>, vector<1x64xf32>
    %228 = vector.broadcast %227 : vector<1x64xf32> to vector<4x64xf32>
    %229 = arith.addf %226, %228 : vector<4x64xf32>
    %cst_91 = arith.constant 0.000000e+00 : f32
    %230 = vector.broadcast %cst_91 : f32 to vector<4x64xf32>
    %231 = arith.maximumf %229, %230 : vector<4x64xf32>
    %c5328 = arith.constant 5328 : index
    %c0_92 = arith.constant 0 : index
    %232 = vector.load %arg2[%c5328, %c0_92] : memref<5376x128xf32, #tpu.memory_space<vmem>>, vector<7x4xf32>
    %cst_93 = arith.constant dense<0.000000e+00> : vector<7x64xf32>
    %233 = tpu.matmul %232, %231, %cst_93 {dimension_numbers = #tpu.dot_dimension_numbers<[1], [0], [0], [1], [0, 0, 1, 1], [], []>} : vector<7x4xf32>, vector<4x64xf32>, vector<7x64xf32> -> vector<7x64xf32>
    %cst_94 = arith.constant 0.000000e+00 : f32
    %234 = vector.broadcast %cst_94 : f32 to vector<1x64xf32>
    %235 = tpu.concatenate %234, %233, %234 in 0 : vector<1x64xf32>, vector<7x64xf32>, vector<1x64xf32> -> vector<9x64xf32>
    %236 = vector.extract_strided_slice %235 {offsets = [0, 0], sizes = [8, 64], strides = [1, 1]} : vector<9x64xf32> to vector<8x64xf32>
    %237 = vector.extract_strided_slice %235 {offsets = [1, 0], sizes = [8, 64], strides = [1, 1]} : vector<9x64xf32> to vector<8x64xf32>
    %238 = tpu.concatenate %236, %237 in 1 : vector<8x64xf32>, vector<8x64xf32> -> vector<8x128xf32>
    %c4208 = arith.constant 4208 : index
    %c0_95 = arith.constant 0 : index
    %239 = vector.load %arg2[%c4208, %c0_95] : memref<5376x128xf32, #tpu.memory_space<vmem>>, vector<128x64xf32>
    %cst_96 = arith.constant dense<0.000000e+00> : vector<8x64xf32>
    %240 = tpu.matmul %238, %239, %cst_96 {dimension_numbers = #tpu.dot_dimension_numbers<[1], [0], [0], [1], [0, 0, 1, 1], [], []>} : vector<8x128xf32>, vector<128x64xf32>, vector<8x64xf32> -> vector<8x64xf32>
    %c5369 = arith.constant 5369 : index
    %c0_97 = arith.constant 0 : index
    %241 = vector.load %arg2[%c5369, %c0_97] : memref<5376x128xf32, #tpu.memory_space<vmem>>, vector<1x64xf32>
    %242 = vector.broadcast %241 : vector<1x64xf32> to vector<8x64xf32>
    %243 = arith.addf %240, %242 : vector<8x64xf32>
    %cst_98 = arith.constant 0.000000e+00 : f32
    %244 = vector.broadcast %cst_98 : f32 to vector<8x64xf32>
    %245 = arith.maximumf %243, %244 : vector<8x64xf32>
    %cst_99 = arith.constant 0.000000e+00 : f32
    %246 = vector.broadcast %cst_99 : f32 to vector<3x64xf32>
    %247 = tpu.concatenate %246, %245, %246 in 0 : vector<3x64xf32>, vector<8x64xf32>, vector<3x64xf32> -> vector<14x64xf32>
    %248 = vector.extract_strided_slice %247 {offsets = [0, 0], sizes = [7, 64], strides = [1, 1]} : vector<14x64xf32> to vector<7x64xf32>
    %249 = vector.extract_strided_slice %247 {offsets = [1, 0], sizes = [7, 64], strides = [1, 1]} : vector<14x64xf32> to vector<7x64xf32>
    %250 = vector.extract_strided_slice %247 {offsets = [2, 0], sizes = [7, 64], strides = [1, 1]} : vector<14x64xf32> to vector<7x64xf32>
    %251 = vector.extract_strided_slice %247 {offsets = [3, 0], sizes = [7, 64], strides = [1, 1]} : vector<14x64xf32> to vector<7x64xf32>
    %252 = vector.extract_strided_slice %247 {offsets = [4, 0], sizes = [7, 64], strides = [1, 1]} : vector<14x64xf32> to vector<7x64xf32>
    %253 = vector.extract_strided_slice %247 {offsets = [5, 0], sizes = [7, 64], strides = [1, 1]} : vector<14x64xf32> to vector<7x64xf32>
    %254 = vector.extract_strided_slice %247 {offsets = [6, 0], sizes = [7, 64], strides = [1, 1]} : vector<14x64xf32> to vector<7x64xf32>
    %255 = vector.extract_strided_slice %247 {offsets = [7, 0], sizes = [7, 64], strides = [1, 1]} : vector<14x64xf32> to vector<7x64xf32>
    %256 = tpu.concatenate %248, %249, %250, %251, %252, %253, %254, %255 in 1 : vector<7x64xf32>, vector<7x64xf32>, vector<7x64xf32>, vector<7x64xf32>, vector<7x64xf32>, vector<7x64xf32>, vector<7x64xf32>, vector<7x64xf32> -> vector<7x512xf32>
    %c4336 = arith.constant 4336 : index
    %c0_100 = arith.constant 0 : index
    %257 = vector.load %arg2[%c4336, %c0_100] : memref<5376x128xf32, #tpu.memory_space<vmem>>, vector<512x32xf32>
    %cst_101 = arith.constant dense<0.000000e+00> : vector<7x32xf32>
    %258 = tpu.matmul %256, %257, %cst_101 {dimension_numbers = #tpu.dot_dimension_numbers<[1], [0], [0], [1], [0, 0, 1, 1], [], []>} : vector<7x512xf32>, vector<512x32xf32>, vector<7x32xf32> -> vector<7x32xf32>
    %c5370 = arith.constant 5370 : index
    %c0_102 = arith.constant 0 : index
    %259 = vector.load %arg2[%c5370, %c0_102] : memref<5376x128xf32, #tpu.memory_space<vmem>>, vector<1x32xf32>
    %260 = vector.broadcast %259 : vector<1x32xf32> to vector<7x32xf32>
    %261 = arith.addf %258, %260 : vector<7x32xf32>
    %cst_103 = arith.constant 0.000000e+00 : f32
    %262 = vector.broadcast %cst_103 : f32 to vector<7x32xf32>
    %263 = arith.maximumf %261, %262 : vector<7x32xf32>
    %cst_104 = arith.constant 0.000000e+00 : f32
    %264 = vector.broadcast %cst_104 : f32 to vector<2x32xf32>
    %265 = tpu.concatenate %264, %263, %264 in 0 : vector<2x32xf32>, vector<7x32xf32>, vector<2x32xf32> -> vector<11x32xf32>
    %266 = vector.extract_strided_slice %265 {offsets = [0, 0], sizes = [8, 32], strides = [1, 1]} : vector<11x32xf32> to vector<8x32xf32>
    %267 = vector.extract_strided_slice %265 {offsets = [3, 0], sizes = [8, 32], strides = [1, 1]} : vector<11x32xf32> to vector<8x32xf32>
    %268 = tpu.concatenate %266, %267 in 1 : vector<8x32xf32>, vector<8x32xf32> -> vector<8x64xf32>
    %c4848 = arith.constant 4848 : index
    %c0_105 = arith.constant 0 : index
    %269 = vector.load %arg2[%c4848, %c0_105] : memref<5376x128xf32, #tpu.memory_space<vmem>>, vector<64x32xf32>
    %cst_106 = arith.constant dense<0.000000e+00> : vector<8x32xf32>
    %270 = tpu.matmul %268, %269, %cst_106 {dimension_numbers = #tpu.dot_dimension_numbers<[1], [0], [0], [1], [0, 0, 1, 1], [], []>} : vector<8x64xf32>, vector<64x32xf32>, vector<8x32xf32> -> vector<8x32xf32>
    %c5371 = arith.constant 5371 : index
    %c0_107 = arith.constant 0 : index
    %271 = vector.load %arg2[%c5371, %c0_107] : memref<5376x128xf32, #tpu.memory_space<vmem>>, vector<1x32xf32>
    %272 = vector.broadcast %271 : vector<1x32xf32> to vector<8x32xf32>
    %273 = arith.addf %270, %272 : vector<8x32xf32>
    %cst_108 = arith.constant 0.000000e+00 : f32
    %274 = vector.broadcast %cst_108 : f32 to vector<8x32xf32>
    %275 = arith.maximumf %273, %274 : vector<8x32xf32>
    %c5336 = arith.constant 5336 : index
    %c0_109 = arith.constant 0 : index
    %276 = vector.load %arg2[%c5336, %c0_109] : memref<5376x128xf32, #tpu.memory_space<vmem>>, vector<15x8xf32>
    %cst_110 = arith.constant dense<0.000000e+00> : vector<15x32xf32>
    %277 = tpu.matmul %276, %275, %cst_110 {dimension_numbers = #tpu.dot_dimension_numbers<[1], [0], [0], [1], [0, 0, 1, 1], [], []>} : vector<15x8xf32>, vector<8x32xf32>, vector<15x32xf32> -> vector<15x32xf32>
    %cst_111 = arith.constant 0.000000e+00 : f32
    %278 = vector.broadcast %cst_111 : f32 to vector<1x32xf32>
    %279 = tpu.concatenate %278, %277, %278 in 0 : vector<1x32xf32>, vector<15x32xf32>, vector<1x32xf32> -> vector<17x32xf32>
    %280 = vector.extract_strided_slice %279 {offsets = [0, 0], sizes = [16, 32], strides = [1, 1]} : vector<17x32xf32> to vector<16x32xf32>
    %281 = vector.extract_strided_slice %279 {offsets = [1, 0], sizes = [16, 32], strides = [1, 1]} : vector<17x32xf32> to vector<16x32xf32>
    %282 = tpu.concatenate %280, %281 in 1 : vector<16x32xf32>, vector<16x32xf32> -> vector<16x64xf32>
    %c4912 = arith.constant 4912 : index
    %c0_112 = arith.constant 0 : index
    %283 = vector.load %arg2[%c4912, %c0_112] : memref<5376x128xf32, #tpu.memory_space<vmem>>, vector<64x32xf32>
    %cst_113 = arith.constant dense<0.000000e+00> : vector<16x32xf32>
    %284 = tpu.matmul %282, %283, %cst_113 {dimension_numbers = #tpu.dot_dimension_numbers<[1], [0], [0], [1], [0, 0, 1, 1], [], []>} : vector<16x64xf32>, vector<64x32xf32>, vector<16x32xf32> -> vector<16x32xf32>
    %c5372 = arith.constant 5372 : index
    %c0_114 = arith.constant 0 : index
    %285 = vector.load %arg2[%c5372, %c0_114] : memref<5376x128xf32, #tpu.memory_space<vmem>>, vector<1x32xf32>
    %286 = vector.broadcast %285 : vector<1x32xf32> to vector<16x32xf32>
    %287 = arith.addf %284, %286 : vector<16x32xf32>
    %cst_115 = arith.constant 0.000000e+00 : f32
    %288 = vector.broadcast %cst_115 : f32 to vector<16x32xf32>
    %289 = arith.maximumf %287, %288 : vector<16x32xf32>
    %cst_116 = arith.constant 0.000000e+00 : f32
    %290 = vector.broadcast %cst_116 : f32 to vector<3x32xf32>
    %291 = tpu.concatenate %290, %289, %290 in 0 : vector<3x32xf32>, vector<16x32xf32>, vector<3x32xf32> -> vector<22x32xf32>
    %292 = vector.extract_strided_slice %291 {offsets = [0, 0], sizes = [15, 32], strides = [1, 1]} : vector<22x32xf32> to vector<15x32xf32>
    %293 = vector.extract_strided_slice %291 {offsets = [1, 0], sizes = [15, 32], strides = [1, 1]} : vector<22x32xf32> to vector<15x32xf32>
    %294 = vector.extract_strided_slice %291 {offsets = [2, 0], sizes = [15, 32], strides = [1, 1]} : vector<22x32xf32> to vector<15x32xf32>
    %295 = vector.extract_strided_slice %291 {offsets = [3, 0], sizes = [15, 32], strides = [1, 1]} : vector<22x32xf32> to vector<15x32xf32>
    %296 = vector.extract_strided_slice %291 {offsets = [4, 0], sizes = [15, 32], strides = [1, 1]} : vector<22x32xf32> to vector<15x32xf32>
    %297 = vector.extract_strided_slice %291 {offsets = [5, 0], sizes = [15, 32], strides = [1, 1]} : vector<22x32xf32> to vector<15x32xf32>
    %298 = vector.extract_strided_slice %291 {offsets = [6, 0], sizes = [15, 32], strides = [1, 1]} : vector<22x32xf32> to vector<15x32xf32>
    %299 = vector.extract_strided_slice %291 {offsets = [7, 0], sizes = [15, 32], strides = [1, 1]} : vector<22x32xf32> to vector<15x32xf32>
    %300 = tpu.concatenate %292, %293, %294, %295, %296, %297, %298, %299 in 1 : vector<15x32xf32>, vector<15x32xf32>, vector<15x32xf32>, vector<15x32xf32>, vector<15x32xf32>, vector<15x32xf32>, vector<15x32xf32>, vector<15x32xf32> -> vector<15x256xf32>
    %c4976 = arith.constant 4976 : index
    %c0_117 = arith.constant 0 : index
    %301 = vector.load %arg2[%c4976, %c0_117] : memref<5376x128xf32, #tpu.memory_space<vmem>>, vector<256x4xf32>
    %cst_118 = arith.constant dense<0.000000e+00> : vector<15x4xf32>
    %302 = tpu.matmul %300, %301, %cst_118 {dimension_numbers = #tpu.dot_dimension_numbers<[1], [0], [0], [1], [0, 0, 1, 1], [], []>} : vector<15x256xf32>, vector<256x4xf32>, vector<15x4xf32> -> vector<15x4xf32>
    %c5373 = arith.constant 5373 : index
    %c0_119 = arith.constant 0 : index
    %303 = vector.load %arg2[%c5373, %c0_119] : memref<5376x128xf32, #tpu.memory_space<vmem>>, vector<1x4xf32>
    %304 = vector.broadcast %303 : vector<1x4xf32> to vector<15x4xf32>
    %305 = arith.addf %302, %304 : vector<15x4xf32>
    %cst_120 = arith.constant 0.000000e+00 : f32
    %306 = vector.broadcast %cst_120 : f32 to vector<15x4xf32>
    %307 = arith.maximumf %305, %306 : vector<15x4xf32>
    %cst_121 = arith.constant 1.000000e+00 : f32
    %308 = vector.broadcast %cst_121 : f32 to vector<1x4xf32>
    %309 = tpu.concatenate %307, %308 in 0 : vector<15x4xf32>, vector<1x4xf32> -> vector<16x4xf32>
    %c5232 = arith.constant 5232 : index
    %c0_122 = arith.constant 0 : index
    %310 = vector.load %arg2[%c5232, %c0_122] : memref<5376x128xf32, #tpu.memory_space<vmem>>, vector<16x16xf32>
    %cst_123 = arith.constant dense<0.000000e+00> : vector<16x4xf32>
    %311 = tpu.matmul %310, %309, %cst_123 {dimension_numbers = #tpu.dot_dimension_numbers<[1], [0], [0], [1], [0, 0, 1, 1], [], []>} : vector<16x16xf32>, vector<16x4xf32>, vector<16x4xf32> -> vector<16x4xf32>
    %cst_124 = arith.constant 0.000000e+00 : f32
    %312 = vector.broadcast %cst_124 : f32 to vector<16x4xf32>
    %313 = arith.maximumf %311, %312 : vector<16x4xf32>
    %314 = vector.extract_strided_slice %166 {offsets = [0, 0], sizes = [1, 16], strides = [1, 1]} : vector<2x16xf32> to vector<1x16xf32>
    %315 = vector.extract_strided_slice %166 {offsets = [1, 0], sizes = [1, 16], strides = [1, 1]} : vector<2x16xf32> to vector<1x16xf32>
    %316 = tpu.concatenate %314, %315 in 1 : vector<1x16xf32>, vector<1x16xf32> -> vector<1x32xf32>
    %c5248 = arith.constant 5248 : index
    %c0_125 = arith.constant 0 : index
    %317 = vector.load %arg2[%c5248, %c0_125] : memref<5376x128xf32, #tpu.memory_space<vmem>>, vector<32x5xf32>
    %cst_126 = arith.constant dense<0.000000e+00> : vector<1x5xf32>
    %318 = tpu.matmul %316, %317, %cst_126 {dimension_numbers = #tpu.dot_dimension_numbers<[1], [0], [0], [1], [0, 0, 1, 1], [], []>} : vector<1x32xf32>, vector<32x5xf32>, vector<1x5xf32> -> vector<1x5xf32>
    %c5374 = arith.constant 5374 : index
    %c0_127 = arith.constant 0 : index
    %319 = vector.load %arg2[%c5374, %c0_127] : memref<5376x128xf32, #tpu.memory_space<vmem>>, vector<1x5xf32>
    %320 = arith.addf %318, %319 : vector<1x5xf32>
    %cst_128 = arith.constant 0.000000e+00 : f32
    %321 = vector.broadcast %cst_128 : f32 to vector<1x123xf32>
    %322 = tpu.concatenate %320, %321 in 1 : vector<1x5xf32>, vector<1x123xf32> -> vector<1x128xf32>
    %cst_129 = arith.constant 0.000000e+00 : f32
    %323 = vector.broadcast %cst_129 : f32 to vector<2x112xf32>
    %324 = tpu.concatenate %166, %323 in 1 : vector<2x16xf32>, vector<2x112xf32> -> vector<2x128xf32>
    %cst_130 = arith.constant 0.000000e+00 : f32
    %325 = vector.broadcast %cst_130 : f32 to vector<16x124xf32>
    %326 = tpu.concatenate %313, %325 in 1 : vector<16x4xf32>, vector<16x124xf32> -> vector<16x128xf32>
    %cst_131 = arith.constant 0.000000e+00 : f32
    %327 = vector.broadcast %cst_131 : f32 to vector<5x128xf32>
    %328 = tpu.concatenate %322, %324, %326, %327 in 0 : vector<1x128xf32>, vector<2x128xf32>, vector<16x128xf32>, vector<5x128xf32> -> vector<24x128xf32>
    %c0_132 = arith.constant 0 : index
    %c0_133 = arith.constant 0 : index
    %c0_134 = arith.constant 0 : index
    %329 = vector.load %arg3[%c0_132, %c0_133, %c0_134] : memref<1x24x128xf32, #tpu.memory_space<vmem>>, vector<1x24x128xf32>
    %330 = vector.shape_cast %329 : vector<1x24x128xf32> to vector<24x128xf32>
    %331 = vector.shape_cast %328 : vector<24x128xf32> to vector<1x24x128xf32>
    tpu.vector_store %arg3[%c0_132, %c0_133, %c0_134], %331 {strides = array<i32>} : memref<1x24x128xf32, #tpu.memory_space<vmem>>, vector<1x24x128xf32>,
    return
  }
  func.func @transform_0(%arg0: i32) -> (i32, i32, i32) {
    %c0_i32 = arith.constant 0 : i32
    %c0_i32_0 = arith.constant 0 : i32
    %c0_i32_1 = arith.constant 0 : i32
    return %arg0, %c0_i32, %c0_i32_0 : i32, i32, i32
  }
  func.func @transform_1(%arg0: i32) -> (i32, i32) {
    %c0_i32 = arith.constant 0 : i32
    %c0_i32_0 = arith.constant 0 : i32
    %c0_i32_1 = arith.constant 0 : i32
    return %c0_i32, %c0_i32_0 : i32, i32
  }
  func.func @transform_2(%arg0: i32) -> (i32, i32, i32) {
    %c0_i32 = arith.constant 0 : i32
    %c0_i32_0 = arith.constant 0 : i32
    %c0_i32_1 = arith.constant 0 : i32
    return %arg0, %c0_i32, %c0_i32_0 : i32, i32, i32
  }
}

</mosaic_0001>

<bundles_post_ra>
// kernel: forward.1
= control target key start
LH: loop header
LB: loop body
LE: loop exit
PB: predicated region body
PF: predicated region fallthrough
CT: control target
= control target key end

     0   :  { %s2968_s9 = smov 0   ;;  %s5438_s0 = inlined_call_operand.vmem [shape: f32[2,16,4], index: 0, kind: input, shape index: {}]   ;;  %s5439_s1 = inlined_call_operand.vmem [shape: f32[5376,128], index: 1, kind: input, shape index: {}]   ;;  %s5440_s2 = inlined_call_operand.vmem [shape: f32[2,24,128], index: 2, kind: output, shape index: {}]  }
   0x1 LB: > { %s2789_s10 = sadd.s32 4294967295, %s2945_s9   ;;  %p2793_p0 = scmp.ge.s32.totalorder %s2945_s9, 1  ;;  %s2945_s9 = sphi %s2968_s9, %s12_s9  }
   0x2   : > { %p112_p1 = scmp.lt.s32.totalorder %s2945_s9, 3 }
   0x4   : > { %p113_p2 = pnand %p2793_p0, %p112_p1 }
   0x5   : > { %p134_p3 = scmp.lt.s32.totalorder (!%p113_p2), %s2789_s10, 1  ;;  %s2947_s15 = smov (!%p113_p2), 4  }
   0x6   : > { %116 = sbr.rel (%p113_p2) target bundleno = 5237 (0x1475), region = 28  ;;  %s2948_s20 = smov (!%p113_p2), 96  }
   0x7   : > { %s2949_s21 = smov (!%p113_p2), 64   ;;  %s2950_s22 = smov (!%p113_p2), 32  }
   0x8   : > { %s2952_s18 = smov (!%p113_p2), 16  }
   0xb   : > { %s5442_s10 = smov (!%p134_p3, %s2789_s10), 1  ;;  %vm148_vm0 = vcmask 1046528   ;;  %v161_v5 = vld [vmem:[%s5439_s1] sm:$0xff]  ;;  %vm158_vm1 = vcmask 31744   ;;  %vm164_vm2 = vcmask 64512   ;;  %vm198_vm3 = vcmask 1043456  }
   0xc   : > { %s2837_s11 = sshll.u32 %s5442_s10, 4  ;;  %186 = vmatpush.msra.mxu0 %v161_v5  ;;  %v2918_v10 = vld [vmem:[%s5439_s1 + $0x14e8] ss:$0 sm:$0xff]  ;;  %vm206_vm4 = vcmask 1042432   ;;  %vm233_vm5 = vcmask 1044480   ;;  %vm275_vm6 = vcmask 1040384   ;;  %vm2810_vm14 = vmneg %vm198_vm3 }
   0xd   : > { %s138_s14 = scalar_lea.vmem %s5438_s0, %s2837_s11  ;;  %vm221_vm7 = vcmask 1045504   ;;  %vm263_vm8 = vcmask 1041408   ;;  %v317_v57 = vld [vmem:[%s5439_s1 + $0x80] sm:$0xff]  ;;  %v316_v59 = vld [vmem:[%s5439_s1 + $0x78] sm:$0xff]  ;;  %v315_v61 = vld [vmem:[%s5439_s1 + $0x70] sm:$0xff]  ;;  %vm287_vm9 = vcmask 261120  }
   0xe   : > { %v2982_v0 = vld [vmem:[%s138_s14] sm:$0xff]  ;;  %v2984_v1 = vld [vmem:[%s138_s14 + $0x8] sm:$0xff]  ;;  %336 = vmatpush.msra.mxu1 %v317_v57  ;;  %v332_v60 = vld [vmem:[%s5439_s1 + $0xf8] sm:$0xff]  ;;  %vm290_vm10 = vcmask 523264   ;;  %vm293_vm11 = vcmask 785408   ;;  %vm444_vm12 = vcmask 138240  }
   0xf   : > { %v149_v2 = vrot.slane %v2982_v0, 1  ;;  %v150_v3 = vrot.slane %v2984_v1, 1  ;;  %v333_v58 = vld [vmem:[%s5439_s1 + $0x100] sm:$0xff]  ;;  %v331_v62 = vld [vmem:[%s5439_s1 + $0xf0] sm:$0xff]  ;;  %v314_v63 = vld [vmem:[%s5439_s1 + $0x68] sm:$0xff]  ;;  %vm807_vm13 = vcmask 72704  }
  0x10   : > { %359 = vmatpush.msra.mxu2 %v333_v58  ;;  %337 = vmatpush.msra.mxu1 %v316_v59  ;;  %v312_v5 = vld [vmem:[%s5439_s1 + $0x58] sm:$0xff]  ;;  %vm1246_vm15 = vcmask 39936   ;;  %s2838_s12 = smul.u32 24, %s5442_s10 }
  0x11   : > { %v151_v4 = vsel %vm148_vm0, %v149_v2, %v150_v3  ;;  %v330_v2 = vld [vmem:[%s5439_s1 + $0xe8] sm:$0xff] }
  0x12   : > { %152 = vrot.lane.b32.xlu0 %v151_v4, %s2947_s15  ;;  %360 = vmatpush.msra.mxu2 %v332_v60  ;;  %v329_v4 = vld [vmem:[%s5439_s1 + $0xe0] sm:$0xff] }
  0x13   : > { %338 = vmatpush.msra.mxu1 %v315_v61 }
  0x14   : > { %361 = vmatpush.msra.mxu2 %v331_v62 }
  0x15   : > { %339 = vmatpush.msra.mxu1 %v314_v63  ;;  %v2920_v63 = vld [vmem:[%s5439_s1 + $0x14ea] ss:$0 sm:$0xff] }
  0x16   : > { %362 = vmatpush.msra.mxu2 %v330_v2 }
  0x18   : > { %363 = vmatpush.msra.mxu2 %v329_v4 }
  0x1a   : > { %154 = vrot.lane.b32.xlu0 %v150_v3, %s2947_s15  ;;  %v313_v3 = vld [vmem:[%s5439_s1 + $0x60] sm:$0xff]  ;;  %s143_s15 = scalar_lea.vmem %s5440_s2, %s2838_s12 }
  0x1b   : > { %340 = vmatpush.msra.mxu1 %v313_v3 }
  0x1d   : > { %341 = vmatpush.msra.mxu1 %v312_v5 }
  0x84   : > { %v153_v6 = vpop.permute.xlu0 %152 }
  0x85   : > { %v159_v7 = vsel %vm158_vm1, %v2982_v0, %v153_v6  ;;  %v328_v6 = vld [vmem:[%s5439_s1 + $0xd8] sm:$0xff] }
  0x86   : > { %2797 = vmatmul.msk.f32.vlgmr.msra.gmra.mxu0 %vm164_vm2, %v159_v7  ;;  %364 = vmatpush.msra.mxu2 %v328_v6  ;;  %v311_v7 = vld [vmem:[%s5439_s1 + $0x50] sm:$0xff] }
  0x87   : > { %342 = vmatpush.msra.mxu1 %v311_v7 }
  0x8c   : > { %v155_v8 = vpop.permute.xlu0 %154 }
  0x8d   : > { %v160_v9 = vsel %vm158_vm1, %v2984_v1, %v155_v8  ;;  %v327_v8 = vld [vmem:[%s5439_s1 + $0xd0] sm:$0xff] }
  0x8e   : > { %2798 = vmatmul.msk.f32.gmra.mxu0 %vm164_vm2, %v160_v9  ;;  %v310_v9 = vld [vmem:[%s5439_s1 + $0x48] sm:$0xff]  ;;  %365 = vmatpush.msra.mxu2 %v327_v8 }
  0x8f   : > { %343 = vmatpush.msra.mxu1 %v310_v9 }
 0x103   : > { %v188_v11 = vpop.f32.mrf.mxu0 }
 0x104   : > { %v189_v12 = vadd.f32 %v2918_v10, %v188_v11  ;;  %v309_v11 = vld [vmem:[%s5439_s1 + $0x40] sm:$0xff] }
 0x105   : > { %344 = vmatpush.msra.mxu1 %v309_v11 }
 0x106   : > { %v194_v13 = vmax.f32 %v189_v12, 0.0  ;;  %v325_v12 = vld [vmem:[%s5439_s1 + $0xc0] sm:$0xff] }
 0x108   : > { %v199_v14 = vrot.slane %v194_v13, 4  ;;  %v308_v13 = vld [vmem:[%s5439_s1 + $0x38] sm:$0xff] }
 0x109   : > { %345 = vmatpush.msra.mxu1 %v308_v13 }
 0x10a   : > { %v3002_v17 = vsel %vm198_vm3, 0.0, %v199_v14 }
 0x10b   : > { %v191_v15 = vpop.f32.mrf.mxu0  ;;  %v234_v20 = vrot.slane %v3002_v17, 3  ;;  %v276_v21 = vrot.slane %v3002_v17, 7  ;;  %v210_v24 = vrot.slane %v3002_v17, 1  ;;  %v252_v25 = vrot.slane %v3002_v17, 5 }
 0x10c   : > { %v192_v16 = vadd.f32 %v2918_v10, %v191_v15  ;;  %v222_v45 = vrot.slane %v3002_v17, 2  ;;  %v264_v46 = vrot.slane %v3002_v17, 6  ;;  %v326_v10 = vld [vmem:[%s5439_s1 + $0xc8] sm:$0xff]  ;;  %v307_v15 = vld [vmem:[%s5439_s1 + $0x30] sm:$0xff] }
 0x10d   : > { %366 = vmatpush.msra.mxu2 %v326_v10  ;;  %346 = vmatpush.msra.mxu1 %v307_v15 }
 0x10e   : > { %v195_v18 = vmax.f32 %v192_v16, 0.0  ;;  %v323_v16 = vld [vmem:[%s5439_s1 + $0xb0] sm:$0xff] }
 0x10f   : > { %367 = vmatpush.msra.mxu2 %v325_v12 }
 0x110   : > { %v200_v19 = vrot.slane %v195_v18, 4  ;;  %v306_v18 = vld [vmem:[%s5439_s1 + $0x28] sm:$0xff] }
 0x111   : > { %347 = vmatpush.msra.mxu1 %v306_v18 }
 0x112   : > { %v3007_v22 = vsel %vm198_vm3, %v199_v14, %v200_v19  ;;  %v3010_v23 = vsel %vm206_vm4, %v200_v19, 0.0  ;;  %v324_v14 = vld [vmem:[%s5439_s1 + $0xb8] sm:$0xff]  ;;  %v322_v19 = vld [vmem:[%s5439_s1 + $0xa8] sm:$0xff] }
 0x113   : > { %v235_v26 = vrot.slane %v3007_v22, 3  ;;  %v277_v27 = vrot.slane %v3007_v22, 7  ;;  %v223_v28 = vrot.slane %v3007_v22, 2  ;;  %v225_v29 = vrot.slane %v3010_v23, 2  ;;  %368 = vmatpush.msra.mxu2 %v324_v14 }
 0x114   : > { %v265_v30 = vrot.slane %v3007_v22, 6  ;;  %v267_v31 = vrot.slane %v3010_v23, 6  ;;  %v211_v32 = vrot.slane %v3007_v22, 1  ;;  %v253_v33 = vrot.slane %v3007_v22, 5 }
 0x115   : > { %v236_v34 = vsel %vm233_vm5, %v234_v20, %v235_v26  ;;  %v278_v35 = vsel %vm275_vm6, %v276_v21, %v277_v27  ;;  %v226_v36 = vsel %vm221_vm7, %v223_v28, %v225_v29  ;;  %v213_v43 = vrot.slane %v3010_v23, 1  ;;  %369 = vmatpush.msra.mxu2 %v323_v16  ;;  %v305_v20 = vld [vmem:[%s5439_s1 + $0x20] sm:$0xff]  ;;  %v318_v29 = vld [vmem:[%s5439_s1 + $0x88] sm:$0xff] }
 0x116   : > { %v2863_v37 = vpack.i.bf16 %v236_v34, %v278_v35  ;;  %v268_v38 = vsel %vm263_vm8, %v265_v30, %v267_v31  ;;  %v212_v39 = vsel %vm148_vm0, %v210_v24, %v211_v32  ;;  %v254_v40 = vsel %vm206_vm4, %v252_v25, %v253_v33  ;;  %v321_v21 = vld [vmem:[%s5439_s1 + $0xa0] sm:$0xff]  ;;  %v304_v24 = vld [vmem:[%s5439_s1 + $0x18] sm:$0xff]  ;;  %348 = vmatpush.msra.mxu1 %v305_v20 }
 0x117   : > { %v2873_v41 = vpack.i.bf16 %v226_v36, %v268_v38  ;;  %v2853_v42 = vpack.i.bf16 %v212_v39, %v254_v40  ;;  %v255_v44 = vrot.slane %v3010_v23, 5  ;;  %v214_v47 = vsel %vm148_vm0, %v211_v32, %v213_v43  ;;  %370 = vmatpush.msra.mxu2 %v322_v19  ;;  %v320_v25 = vld [vmem:[%s5439_s1 + $0x98] sm:$0xff] }
 0x118   : > { %2864 = vrot.lane.b32.xlu2 %v2863_v37, %s2948_s20  ;;  %v224_v49 = vsel %vm221_vm7, %v222_v45, %v223_v28  ;;  %v266_v50 = vsel %vm263_vm8, %v264_v46, %v265_v30  ;;  %v237_v53 = vrot.slane %v3010_v23, 3  ;;  %v279_v54 = vrot.slane %v3010_v23, 7  ;;  %349 = vmatpush.msra.mxu1 %v304_v24  ;;  %v302_v28 = vld [vmem:[%s5439_s1 + $0x8] sm:$0xff] }
 0x119   : > { %2874 = vrot.lane.b32.xlu0 %v2873_v41, %s2949_s21  ;;  %2854 = vrot.lane.b32.xlu1 %v2853_v42, %s2950_s22  ;;  %v256_v48 = vsel %vm206_vm4, %v253_v33, %v255_v44  ;;  %v2858_v52 = vpack.i.bf16 %v224_v49, %v266_v50  ;;  %v382_v30 = vld [vmem:[%s5439_s1 + $0x108] sm:$0xf]  ;;  %v246_v33 = vrot.slane %v3007_v22, 4  ;;  %v245_v36 = vrot.slane %v3002_v17, 4 }
 0x11a   : > { %v2868_v51 = vpack.i.bf16 %v214_v47, %v256_v48  ;;  %v238_v55 = vsel %vm233_vm5, %v235_v26, %v237_v53  ;;  %v280_v56 = vsel %vm275_vm6, %v277_v27, %v279_v54  ;;  %371 = vmatpush.msra.mxu2 %v321_v21  ;;  %v303_v26 = vld [vmem:[%s5439_s1 + $0x10] sm:$0xff]  ;;  %2799 = vmatpush.msk.msra.mxu3 %vm198_vm3, %v382_v30 }
 0x11b   : > { %v319_v27 = vld [vmem:[%s5439_s1 + $0x90] sm:$0xff]  ;;  %350 = vmatpush.msra.mxu1 %v303_v26  ;;  %2800 = vmatmul.msk.f32.vlgmr.msra.gmra.mxu3 %vm158_vm1, %v2982_v0  ;;  %v247_v38 = vsel %vm198_vm3, %v245_v36, %v246_v33  ;;  %v500_v36 = vld [vmem:[%s5439_s1 + $0x138] sm:$0xff] }
 0x11c   : > { %372 = vmatpush.msra.mxu2 %v320_v25 }
 0x11d   : > { %351 = vmatpush.msra.mxu1 %v302_v28 }
 0x11e   : > { %373 = vmatpush.msra.mxu2 %v319_v27 }
 0x120   : > { %2869 = vrot.lane.b32.xlu2 %v2868_v51, %s2950_s22  ;;  %374 = vmatpush.msra.mxu2 %v318_v29  ;;  %v248_v51 = vrot.slane %v3010_v23, 4 }
 0x121   : > { %2859 = vrot.lane.b32.xlu1 %v2858_v52, %s2949_s21 }
 0x123   : > { %2801 = vmatmul.msk.f32.gmra.mxu3 %vm158_vm1, %v2984_v1 }
 0x128   : > { %241 = vrot.lane.b32.xlu2 %v238_v55, %s2948_s20 }
 0x129   : > { %283 = vrot.lane.b32.xlu1 %v280_v56, %s2948_s20  ;;  %v249_v56 = vsel %vm198_vm3, %v246_v33, %v248_v51  ;;  %v443_v33 = vld [vmem:[%s5439_s1 + $0x14a8] sm:$0x1] }
 0x172   : > { %v2865_v31 = vpop.permute.xlu2 %2864 }
 0x173   : > { %v2867_v0 = vunpack.i.h.bf16 %v2865_v31  ;;  %v2866_v42 = vunpack.i.l.bf16 %v2865_v31 }
 0x17a   : > { %v2870_v39 = vpop.permute.xlu2 %2869 }
 0x17b   : > { %v2872_v47 = vunpack.i.h.bf16 %v2870_v39  ;;  %v2871_v52 = vunpack.i.l.bf16 %v2870_v39  ;;  %v497_v39 = vld [vmem:[%s5439_s1 + $0x120] sm:$0xff] }
 0x17d   : > { %v297_v57 = vsel %vm287_vm9, %v249_v56, %v2871_v52  ;;  %v658_v52 = vld [vmem:[%s5439_s1 + $0x348] sm:$0xff] }
 0x17e   : > { %730 = vmatpush.msrb.mxu2 %v658_v52  ;;  %v626_v56 = vld [vmem:[%s5439_s1 + $0x248] sm:$0xff] }
 0x17f   : > { %v602_v52 = vld [vmem:[%s5439_s1 + $0x188] sm:$0xff] }
 0x182   : > { %v242_v58 = vpop.permute.xlu2 %241 }
 0x18b   : > { %v2855_v32 = vpop.permute.xlu1 %2854  ;;  %v2875_v43 = vpop.permute.xlu0 %2874 }
 0x18c   : > { %v2857_v34 = vunpack.i.h.bf16 %v2855_v32  ;;  %v2856_v35 = vunpack.i.l.bf16 %v2855_v32  ;;  %v2877_v50 = vunpack.i.h.bf16 %v2875_v43  ;;  %v2876_v53 = vunpack.i.l.bf16 %v2875_v43  ;;  %v442_v32 = vld [vmem:[%s5439_s1 + $0x14a0] sm:$0xff] }
 0x18e   : > { %v288_v1 = vsel %vm287_vm9, %v3002_v17, %v2857_v34  ;;  %v296_v44 = vsel %vm287_vm9, %v247_v38, %v2856_v35  ;;  %v289_v17 = vsel %vm287_vm9, %v3007_v22, %v2872_v47  ;;  %v299_v59 = vsel %vm290_vm10, %v297_v57, %v2876_v53  ;;  %v2919_v22 = vld [vmem:[%s5439_s1 + $0x14e9] ss:$0 sm:$0xff]  ;;  %v501_v35 = vld [vmem:[%s5439_s1 + $0x140] sm:$0xff] }
 0x18f   : > { %v292_v55 = vsel %vm290_vm10, %v289_v17, %v2877_v50  ;;  %v502_v34 = vld [vmem:[%s5439_s1 + $0x148] sm:$0xff]  ;;  %v657_v53 = vld [vmem:[%s5439_s1 + $0x340] sm:$0xff]  ;;  %v656_v17 = vld [vmem:[%s5439_s1 + $0x338] sm:$0xff] }
 0x190   : > { %v295_v60 = vsel %vm293_vm11, %v292_v55, %v242_v58  ;;  %516 = vmatpush.msrb.mxu3 %v502_v34  ;;  %v498_v38 = vld [vmem:[%s5439_s1 + $0x128] sm:$0xff]  ;;  %731 = vmatpush.msrb.mxu2 %v657_v53  ;;  %v609_v58 = vld [vmem:[%s5439_s1 + $0x1c0] sm:$0xff]  ;;  %v640_v34 = vld [vmem:[%s5439_s1 + $0x2b8] sm:$0xff] }
 0x191   : > { %v610_v55 = vld [vmem:[%s5439_s1 + $0x1c8] sm:$0xff] }
 0x192   : > { %517 = vmatpush.msrb.mxu3 %v501_v35  ;;  %v642_v57 = vld [vmem:[%s5439_s1 + $0x2c8] sm:$0xff]  ;;  %732 = vmatpush.msrb.mxu2 %v656_v17  ;;  %v644_v35 = vld [vmem:[%s5439_s1 + $0x2d8] sm:$0xff] }
 0x193   : > { %v2860_v37 = vpop.permute.xlu1 %2859  ;;  %707 = vmatpush.msrb.mxu1 %v642_v57  ;;  %v618_v53 = vld [vmem:[%s5439_s1 + $0x208] sm:$0xff]  ;;  %v600_v57 = vld [vmem:[%s5439_s1 + $0x178] sm:$0xff] }
 0x194   : > { %v2862_v40 = vunpack.i.h.bf16 %v2860_v37  ;;  %v2861_v41 = vunpack.i.l.bf16 %v2860_v37  ;;  %v499_v37 = vld [vmem:[%s5439_s1 + $0x130] sm:$0xff]  ;;  %518 = vmatpush.msrb.mxu3 %v500_v36  ;;  %v634_v17 = vld [vmem:[%s5439_s1 + $0x288] sm:$0xff] }
 0x195   : > { %v607_v36 = vld [vmem:[%s5439_s1 + $0x1b0] sm:$0xff] }
 0x196   : > { %v291_v45 = vsel %vm290_vm10, %v288_v1, %v2862_v40  ;;  %v298_v46 = vsel %vm290_vm10, %v296_v44, %v2861_v41  ;;  %519 = vmatpush.msrb.mxu3 %v499_v37  ;;  %v496_v40 = vld [vmem:[%s5439_s1 + $0x118] sm:$0xff]  ;;  %v623_v37 = vld [vmem:[%s5439_s1 + $0x230] sm:$0xff] }
 0x197   : > { %v294_v48 = vsel %vm293_vm11, %v291_v45, %v2867_v0  ;;  %v300_v49 = vsel %vm293_vm11, %v298_v46, %v2866_v42 }
 0x198   : > { %352 = vmatmul.f32.vlgmr.msra.gmra.mxu1 %v294_v48  ;;  %375 = vmatmul.f32.vlgmr.msra.gmra.mxu2 %v300_v49  ;;  %v495_v49 = vld [vmem:[%s5439_s1 + $0x110] sm:$0xff] }
 0x199   : > { %520 = vmatpush.msrb.mxu3 %v498_v38  ;;  %v639_v38 = vld [vmem:[%s5439_s1 + $0x2b0] sm:$0xff] }
 0x19b   : > { %v284_v54 = vpop.permute.xlu1 %283  ;;  %521 = vmatpush.msrb.mxu3 %v497_v39  ;;  %v643_v39 = vld [vmem:[%s5439_s1 + $0x2d0] sm:$0xff] }
 0x19c   : > { %v301_v61 = vsel %vm293_vm11, %v299_v59, %v284_v54  ;;  %v655_v54 = vld [vmem:[%s5439_s1 + $0x330] sm:$0xff]  ;;  %v625_v59 = vld [vmem:[%s5439_s1 + $0x240] sm:$0xff] }
 0x19d   : > { %522 = vmatpush.msrb.mxu3 %v496_v40  ;;  %733 = vmatpush.msrb.mxu2 %v655_v54  ;;  %v606_v40 = vld [vmem:[%s5439_s1 + $0x1a8] sm:$0xff]  ;;  %v601_v54 = vld [vmem:[%s5439_s1 + $0x180] sm:$0xff] }
 0x19e   : > { %v409_v62 = vpop.f32.mrf.mxu3 }
 0x19f   : > { %v410_v4 = vadd.f32 %v2920_v63, %v409_v62  ;;  %523 = vmatpush.msrb.mxu3 %v495_v49  ;;  %v653_v62 = vld [vmem:[%s5439_s1 + $0x320] sm:$0xff]  ;;  %v603_v49 = vld [vmem:[%s5439_s1 + $0x190] sm:$0xff] }
 0x1a0   : > { %355 = vmatmul.f32.gmra.mxu1 %v295_v60  ;;  %378 = vmatmul.f32.gmra.mxu2 %v301_v61  ;;  %v654_v60 = vld [vmem:[%s5439_s1 + $0x328] sm:$0xff]  ;;  %v641_v61 = vld [vmem:[%s5439_s1 + $0x2c0] sm:$0xff] }
 0x1a1   : > { %684 = vmatpush.msra.mxu3 %v626_v56  ;;  %708 = vmatpush.msrb.mxu1 %v641_v61  ;;  %v633_v56 = vld [vmem:[%s5439_s1 + $0x280] sm:$0xff]  ;;  %v615_v61 = vld [vmem:[%s5439_s1 + $0x1f0] sm:$0xff] }
 0x1a2   : > { %734 = vmatpush.msrb.mxu2 %v654_v60  ;;  %v599_v60 = vld [vmem:[%s5439_s1 + $0x170] sm:$0xff] }
 0x1a3   : > { %685 = vmatpush.msra.mxu3 %v625_v59  ;;  %709 = vmatpush.msrb.mxu1 %v640_v34  ;;  %v632_v59 = vld [vmem:[%s5439_s1 + $0x278] sm:$0xff] }
 0x1a4   : > { %735 = vmatpush.msrb.mxu2 %v653_v62  ;;  %v598_v62 = vld [vmem:[%s5439_s1 + $0x168] sm:$0xff] }
 0x1a5   : > { %710 = vmatpush.msrb.mxu1 %v639_v38 }
 0x1a6   : > { %v412_v8 = vpop.f32.mrf.mxu3 }
 0x1a7   : > { %v413_v10 = vadd.f32 %v2920_v63, %v412_v8  ;;  %v652_v63 = vld [vmem:[%s5439_s1 + $0x318] sm:$0xff] }
 0x1a8   : > { %736 = vmatpush.msrb.mxu2 %v652_v63  ;;  %v630_v63 = vld [vmem:[%s5439_s1 + $0x268] sm:$0xff] }
 0x215   : > { %v353_v23 = vpop.f32.mrf.mxu1 }
 0x216   : > { %v354_v2 = vadd.f32 %v2919_v22, %v353_v23  ;;  %v2921_v23 = vld [vmem:[%s5439_s1 + $0x14eb] ss:$0 sm:$0xff] }
 0x21b   : > { %v376_v3 = vpop.f32.mrf.mxu2 }
 0x21c   : > { %v377_v5 = vadd.f32 %v376_v3, %v354_v2  ;;  %v651_v3 = vld [vmem:[%s5439_s1 + $0x310] sm:$0xff] }
 0x21d   : > { %v356_v7 = vpop.f32.mrf.mxu1  ;;  %737 = vmatpush.msrb.mxu2 %v651_v3  ;;  %v613_v3 = vld [vmem:[%s5439_s1 + $0x1e0] sm:$0xff] }
 0x21e   : > { %v415_v6 = vadd.f32 %v410_v4, %v377_v5  ;;  %v357_v9 = vadd.f32 %v2919_v22, %v356_v7  ;;  %v650_v5 = vld [vmem:[%s5439_s1 + $0x308] sm:$0xff]  ;;  %v649_v7 = vld [vmem:[%s5439_s1 + $0x300] sm:$0xff] }
 0x21f   : > { %738 = vmatpush.msrb.mxu2 %v650_v5  ;;  %v596_v5 = vld [vmem:[%s5439_s1 + $0x158] sm:$0xff] }
 0x220   : > { %v417_v11 = vmax.f32 %v415_v6, 0.0 }
 0x221   : > { %739 = vmatpush.msrb.mxu2 %v649_v7  ;;  %v628_v7 = vld [vmem:[%s5439_s1 + $0x258] sm:$0xff] }
 0x222   : > { %v421_v15 = vrot.slane %v417_v11, 7 }
 0x223   : > { %v379_v12 = vpop.f32.mrf.mxu2 }
 0x224   : > { %v380_v13 = vadd.f32 %v379_v12, %v357_v9  ;;  %v427_v19 = vsel %vm275_vm6, 0.0, %v421_v15 }
 0x225   : > { %v431_v26 = vrot.slane %v427_v19, 1 }
 0x226   : > { %v416_v14 = vadd.f32 %v413_v10, %v380_v13 }
 0x228   : > { %v418_v16 = vmax.f32 %v416_v14, 0.0  ;;  %v648_v14 = vld [vmem:[%s5439_s1 + $0x2f8] sm:$0xff] }
 0x229   : > { %740 = vmatpush.msrb.mxu2 %v648_v14 }
 0x22a   : > { %v422_v18 = vrot.slane %v418_v16, 7 }
 0x22c   : > { %v428_v20 = vsel %vm275_vm6, %v422_v18, 0.0  ;;  %v423_v21 = vsel %vm275_vm6, %v421_v15, %v422_v18 }
 0x22d   : > { %v434_v24 = vrot.slane %v428_v20, 1  ;;  %v432_v25 = vrot.slane %v423_v21, 1 }
 0x22f   : > { %v441_v27 = vmax.f32 %v428_v20, %v434_v24  ;;  %v435_v28 = vsel %vm148_vm0, %v432_v25, %v434_v24  ;;  %v433_v30 = vsel %vm148_vm0, %v431_v26, %v432_v25 }
 0x230   : > { %v440_v29 = vmax.f32 %v423_v21, %v435_v28  ;;  %v439_v31 = vmax.f32 %v427_v19, %v433_v30  ;;  %v647_v21 = vld [vmem:[%s5439_s1 + $0x2f0] sm:$0xff]  ;;  %v646_v30 = vld [vmem:[%s5439_s1 + $0x2e8] sm:$0xff] }
 0x231   : > { %2802 = vmatpush.msk.msrb.mxu0 %vm275_vm6, %v441_v27  ;;  %741 = vmatpush.msrb.mxu2 %v647_v21  ;;  %v755_v21 = vld [vmem:[%s5439_s1 + $0x360] sm:$0xff] }
 0x233   : > { %468 = vmatpush.msrb.mxu0 %v440_v29  ;;  %742 = vmatpush.msrb.mxu2 %v646_v30 }
 0x235   : > { %469 = vmatpush.msrb.mxu0 %v439_v31  ;;  %v645_v31 = vld [vmem:[%s5439_s1 + $0x2e0] sm:$0xff] }
 0x236   : > { %2803 = vmatmul.msk.f32.vlgmr.msrb.gmra.mxu0 %vm444_vm12, %v442_v32  ;;  %743 = vmatpush.msrb.mxu2 %v645_v31  ;;  %v608_v32 = vld [vmem:[%s5439_s1 + $0x1b8] sm:$0xff] }
 0x237   : > { %661 = vmatpush.msra.mxu0 %v610_v55  ;;  %v617_v55 = vld [vmem:[%s5439_s1 + $0x200] sm:$0xff] }
 0x238   : > { %744 = vmatpush.msrb.mxu2 %v644_v35 }
 0x239   : > { %662 = vmatpush.msra.mxu0 %v609_v58  ;;  %v616_v58 = vld [vmem:[%s5439_s1 + $0x1f8] sm:$0xff] }
 0x23a   : > { %745 = vmatpush.msrb.mxu2 %v643_v39 }
 0x23b   : > { %663 = vmatpush.msra.mxu0 %v608_v32 }
 0x23d   : > { %664 = vmatpush.msra.mxu0 %v607_v36 }
 0x23e   : > { %2804 = vmatmul.msk.f32.gmra.mxu0 %vm444_vm12, %v443_v33  ;;  %v624_v33 = vld [vmem:[%s5439_s1 + $0x238] sm:$0xff]  ;;  %vm1366_vm12 = vcmask 130048  }
 0x23f   : > { %686 = vmatpush.msra.mxu3 %v624_v33  ;;  %665 = vmatpush.msra.mxu0 %v606_v40 }
 0x241   : > { %687 = vmatpush.msra.mxu3 %v623_v37 }
 0x2b3   : > { %v3209_v41 = vpop.f32.mrf.mxu0 }
 0x2b4   : > { %v479_v0 = vrot.slane %v3209_v41, 7 }
 0x2b6   : > { %v484_v1 = vsel %vm275_vm6, 0.0, %v479_v0 }
 0x2b7   : > { %v488_v46 = vrot.slane %v484_v1, 3 }
 0x2bb   : > { %v3212_v42 = vpop.f32.mrf.mxu0 }
 0x2bc   : > { %v480_v43 = vrot.slane %v3212_v42, 7 }
 0x2be   : > { %v481_v44 = vsel %vm275_vm6, %v479_v0, %v480_v43  ;;  %v622_v0 = vld [vmem:[%s5439_s1 + $0x228] sm:$0xff] }
 0x2bf   : > { %v485_v45 = vsel %vm263_vm8, %v481_v44, 0.0  ;;  %v638_v43 = vld [vmem:[%s5439_s1 + $0x2a8] sm:$0xff]  ;;  %v621_v44 = vld [vmem:[%s5439_s1 + $0x220] sm:$0xff]  ;;  %688 = vmatpush.msra.mxu3 %v622_v0 }
 0x2c0   : > { %v489_v47 = vrot.slane %v485_v45, 3  ;;  %v637_v45 = vld [vmem:[%s5439_s1 + $0x2a0] sm:$0xff]  ;;  %711 = vmatpush.msrb.mxu1 %v638_v43 }
 0x2c1   : > { %689 = vmatpush.msra.mxu3 %v621_v44 }
 0x2c2   : > { %v490_v48 = vsel %vm233_vm5, %v488_v46, %v489_v47  ;;  %v604_v46 = vld [vmem:[%s5439_s1 + $0x198] sm:$0xff]  ;;  %712 = vmatpush.msrb.mxu1 %v637_v45 }
 0x2c3   : > { %491 = vrot.lane.b32.xlu0 %v490_v48, %s2950_s22  ;;  %v620_v47 = vld [vmem:[%s5439_s1 + $0x218] sm:$0xff] }
 0x2c4   : > { %v636_v48 = vld [vmem:[%s5439_s1 + $0x298] sm:$0xff]  ;;  %690 = vmatpush.msra.mxu3 %v620_v47 }
 0x2c5   : > { %713 = vmatpush.msrb.mxu1 %v636_v48  ;;  %v2922_v48 = vld [vmem:[%s5439_s1 + $0x14ec] ss:$0 sm:$0xff] }
 0x335   : > { %v492_v50 = vpop.permute.xlu0 %491 }
 0x336   : > { %v494_v51 = vsel %vm287_vm9, %v484_v1, %v492_v50  ;;  %v605_v1 = vld [vmem:[%s5439_s1 + $0x1a0] sm:$0xff]  ;;  %v619_v50 = vld [vmem:[%s5439_s1 + $0x210] sm:$0xff] }
 0x337   : > { %2805 = vmatmul.msk.f32.vlgmr.msrb.gmra.mxu3 %vm290_vm10, %v494_v51  ;;  %666 = vmatpush.msra.mxu0 %v605_v1  ;;  %v635_v51 = vld [vmem:[%s5439_s1 + $0x290] sm:$0xff] }
 0x338   : > { %691 = vmatpush.msra.mxu3 %v619_v50  ;;  %714 = vmatpush.msrb.mxu1 %v635_v51 }
 0x339   : > { %667 = vmatpush.msra.mxu0 %v604_v46 }
 0x33a   : > { %692 = vmatpush.msra.mxu3 %v618_v53  ;;  %715 = vmatpush.msrb.mxu1 %v634_v17  ;;  %v2923_v17 = vld [vmem:[%s5439_s1 + $0x14ed] ss:$0 sm:$0xff] }
 0x33b   : > { %668 = vmatpush.msra.mxu0 %v603_v49 }
 0x33c   : > { %693 = vmatpush.msra.mxu3 %v617_v55  ;;  %716 = vmatpush.msrb.mxu1 %v633_v56 }
 0x33d   : > { %669 = vmatpush.msra.mxu0 %v602_v52 }
 0x33e   : > { %694 = vmatpush.msra.mxu3 %v616_v58  ;;  %717 = vmatpush.msrb.mxu1 %v632_v59 }
 0x33f   : > { %670 = vmatpush.msra.mxu0 %v601_v54 }
 0x340   : > { %695 = vmatpush.msra.mxu3 %v615_v61 }
 0x341   : > { %671 = vmatpush.msra.mxu0 %v600_v57 }
 0x343   : > { %672 = vmatpush.msra.mxu0 %v599_v60 }
 0x345   : > { %673 = vmatpush.msra.mxu0 %v598_v62 }
 0x3ba   : > { %v525_v22 = vpop.f32.mrf.mxu3 }
 0x3bb   : > { %v526_v2 = vadd.f32 %v2921_v23, %v525_v22  ;;  %v631_v23 = vld [vmem:[%s5439_s1 + $0x270] sm:$0xff]  ;;  %v614_v22 = vld [vmem:[%s5439_s1 + $0x1e8] sm:$0xff] }
 0x3bc   : > { %718 = vmatpush.msrb.mxu1 %v631_v23  ;;  %696 = vmatpush.msra.mxu3 %v614_v22 }
 0x3bd   : > { %v528_v4 = vmax.f32 %v526_v2, 0.0  ;;  %v597_v2 = vld [vmem:[%s5439_s1 + $0x160] sm:$0xff] }
 0x3be   : > { %719 = vmatpush.msrb.mxu1 %v630_v63  ;;  %674 = vmatpush.msra.mxu0 %v597_v2 }
 0x3bf   : > { %v530_v6 = vrot.slane %v528_v4, 4  ;;  %v629_v4 = vld [vmem:[%s5439_s1 + $0x260] sm:$0xff]  ;;  %697 = vmatpush.msra.mxu3 %v613_v3 }
 0x3c0   : > { %720 = vmatpush.msrb.mxu1 %v629_v4  ;;  %675 = vmatpush.msra.mxu0 %v596_v5 }
 0x3c1   : > { %v3277_v8 = vsel %vm198_vm3, 0.0, %v530_v6  ;;  %v3280_v9 = vsel %vm198_vm3, %v530_v6, 0.0  ;;  %v612_v6 = vld [vmem:[%s5439_s1 + $0x1d8] sm:$0xff] }
 0x3c2   : > { %v537_v10 = vrot.slane %v3280_v9, 1  ;;  %v578_v11 = vrot.slane %v3277_v8, 7  ;;  %v579_v12 = vrot.slane %v3280_v9, 7  ;;  %v551_v13 = vrot.slane %v3280_v9, 3  ;;  %698 = vmatpush.msra.mxu3 %v612_v6  ;;  %721 = vmatpush.msrb.mxu1 %v628_v7 }
 0x3c3   : > { %v564_v15 = vrot.slane %v3277_v8, 5  ;;  %v565_v16 = vrot.slane %v3280_v9, 5  ;;  %v536_v18 = vrot.slane %v3277_v8, 1  ;;  %v550_v19 = vrot.slane %v3277_v8, 3 }
 0x3c4   : > { %v580_v20 = vsel %vm275_vm6, %v578_v11, %v579_v12  ;;  %v611_v11 = vld [vmem:[%s5439_s1 + $0x1d0] sm:$0xff]  ;;  %v574_v14 = vrot.slane %v3280_v9, 6 }
 0x3c5   : > { %v2883_v24 = vpack.i.bf16 %v580_v20, %v537_v10  ;;  %v566_v25 = vsel %vm206_vm4, %v564_v15, %v565_v16  ;;  %v538_v26 = vsel %vm148_vm0, %v536_v18, %v537_v10  ;;  %v552_v27 = vsel %vm233_vm5, %v550_v19, %v551_v13  ;;  %v595_v10 = vld [vmem:[%s5439_s1 + $0x150] sm:$0xff]  ;;  %699 = vmatpush.msra.mxu3 %v611_v11  ;;  %v756_v20 = vld [vmem:[%s5439_s1 + $0x368] sm:$0xff] }
 0x3c6   : > { %v2888_v28 = vpack.i.bf16 %v566_v25, %v551_v13  ;;  %v2878_v29 = vpack.i.bf16 %v552_v27, %v538_v26  ;;  %676 = vmatpush.msra.mxu0 %v595_v10  ;;  %v573_v13 = vrot.slane %v3277_v8, 6  ;;  %v753_v25 = vld [vmem:[%s5439_s1 + $0x350] sm:$0xff]  ;;  %v545_v26 = vrot.slane %v3277_v8, 2 }
 0x3c7   : > { %2884 = vrot.lane.b32.xlu2 %v2883_v24, %s2949_s21  ;;  %v754_v24 = vld [vmem:[%s5439_s1 + $0x358] sm:$0xff]  ;;  %v546_v27 = vrot.slane %v3280_v9, 2 }
 0x3c8   : > { %2889 = vrot.lane.b32.xlu0 %v2888_v28, %s2949_s21  ;;  %2879 = vrot.lane.b32.xlu1 %v2878_v29, %s2949_s21  ;;  %v575_v18 = vsel %vm263_vm8, %v573_v13, %v574_v14  ;;  %v559_v28 = vrot.slane %v3277_v8, 4  ;;  %v560_v29 = vrot.slane %v3280_v9, 4 }
 0x3c9   : > { %775 = vmatpush.msrb.mxu0 %v756_v20  ;;  %v547_v35 = vsel %vm221_vm7, %v545_v26, %v546_v27  ;;  %v861_v20 = vld [vmem:[%s5439_s1 + $0x3d8] sm:$0xff] }
 0x3ca   : > { %v561_v36 = vsel %vm198_vm3, %v559_v28, %v560_v29  ;;  %v857_v26 = vld [vmem:[%s5439_s1 + $0x3b8] sm:$0xff]  ;;  %v855_v28 = vld [vmem:[%s5439_s1 + $0x3a8] sm:$0xff] }
 0x3cb   : > { %776 = vmatpush.msrb.mxu0 %v755_v21  ;;  %v860_v21 = vld [vmem:[%s5439_s1 + $0x3d0] sm:$0xff] }
 0x3cd   : > { %777 = vmatpush.msrb.mxu0 %v754_v24  ;;  %v859_v24 = vld [vmem:[%s5439_s1 + $0x3c8] sm:$0xff] }
 0x3cf   : > { %569 = vrot.lane.b32.xlu2 %v565_v16, %s2949_s21  ;;  %778 = vmatpush.msrb.mxu0 %v753_v25  ;;  %v858_v25 = vld [vmem:[%s5439_s1 + $0x3c0] sm:$0xff] }
 0x3d0   : > { %583 = vrot.lane.b32.xlu1 %v579_v12, %s2949_s21  ;;  %v627_v12 = vld [vmem:[%s5439_s1 + $0x250] sm:$0xff] }
 0x3d1   : > { %722 = vmatpush.msrb.mxu1 %v627_v12 }
 0x421   : > { %v2885_v15 = vpop.permute.xlu2 %2884 }
 0x422   : > { %v2887_v16 = vunpack.i.h.bf16 %v2885_v15  ;;  %v2886_v40 = vunpack.i.l.bf16 %v2885_v15 }
 0x424   : > { %v593_v19 = vsel %vm290_vm10, %v575_v18, %v2887_v16  ;;  %v588_v45 = vsel %vm290_vm10, %v3280_v9, %v2886_v40  ;;  %v806_v16 = vld [vmem:[%s5439_s1 + $0x14b0] sm:$0x1f]  ;;  %v863_v18 = vld [vmem:[%s5439_s1 + $0x3e8] sm:$0xff] }
 0x425   : > { %746 = vmatmul.f32.vlgmr.msrb.gmra.mxu2 %v593_v19  ;;  %v862_v19 = vld [vmem:[%s5439_s1 + $0x3e0] sm:$0xff]  ;;  %866 = vmatpush.msra.mxu1 %v863_v18 }
 0x426   : > { %v967_v18 = vld [vmem:[%s5439_s1 + $0x5a0] sm:$0xff] }
 0x427   : > { %867 = vmatpush.msra.mxu1 %v862_v19  ;;  %v917_v19 = vld [vmem:[%s5439_s1 + $0x410] sm:$0xff] }
 0x429   : > { %v570_v1 = vpop.permute.xlu2 %569  ;;  %868 = vmatpush.msra.mxu1 %v861_v20  ;;  %v934_v20 = vld [vmem:[%s5439_s1 + $0x498] sm:$0xff] }
 0x42b   : > { %869 = vmatpush.msra.mxu1 %v860_v21  ;;  %v950_v21 = vld [vmem:[%s5439_s1 + $0x518] sm:$0xff] }
 0x42d   : > { %870 = vmatpush.msra.mxu1 %v859_v24  ;;  %v966_v24 = vld [vmem:[%s5439_s1 + $0x598] sm:$0xff] }
 0x42f   : > { %871 = vmatpush.msra.mxu1 %v858_v25  ;;  %v916_v25 = vld [vmem:[%s5439_s1 + $0x408] sm:$0xff] }
 0x431   : > { %872 = vmatpush.msra.mxu1 %v857_v26  ;;  %v933_v26 = vld [vmem:[%s5439_s1 + $0x490] sm:$0xff] }
 0x43a   : > { %v2890_v30 = vpop.permute.xlu0 %2889  ;;  %v2880_v31 = vpop.permute.xlu1 %2879 }
 0x43b   : > { %v2892_v32 = vunpack.i.h.bf16 %v2890_v30  ;;  %v2882_v33 = vunpack.i.h.bf16 %v2880_v31  ;;  %v2881_v34 = vunpack.i.l.bf16 %v2880_v31  ;;  %v2891_v0 = vunpack.i.l.bf16 %v2890_v30  ;;  %v853_v30 = vld [vmem:[%s5439_s1 + $0x398] sm:$0xff]  ;;  %v852_v31 = vld [vmem:[%s5439_s1 + $0x390] sm:$0xff] }
 0x43d   : > { %v587_v37 = vsel %vm290_vm10, %v3277_v8, %v2881_v34  ;;  %v589_v38 = vsel %vm290_vm10, %v547_v35, %v2882_v33  ;;  %v591_v39 = vsel %vm290_vm10, %v561_v36, %v2892_v32  ;;  %v590_v46 = vsel %vm290_vm10, %v546_v27, %v2891_v0  ;;  %v856_v27 = vld [vmem:[%s5439_s1 + $0x3b0] sm:$0xff]  ;;  %v851_v32 = vld [vmem:[%s5439_s1 + $0x388] sm:$0xff]  ;;  %v850_v34 = vld [vmem:[%s5439_s1 + $0x380] sm:$0xff] }
 0x43e   : > { %677 = vmatmul.f32.vlgmr.msra.gmra.mxu0 %v587_v37  ;;  %700 = vmatmul.f32.vlgmr.msra.gmra.mxu3 %v589_v38  ;;  %v592_v8 = vsel %vm290_vm10, %v560_v29, %v570_v1  ;;  %v854_v29 = vld [vmem:[%s5439_s1 + $0x3a0] sm:$0xff]  ;;  %v849_v36 = vld [vmem:[%s5439_s1 + $0x378] sm:$0xff]  ;;  %v2951_v38 = vmov 0.0   ;;  %v848_v1 = vld [vmem:[%s5439_s1 + $0x370] sm:$0xff] }
 0x43f   : > { %723 = vmatmul.f32.vlgmr.msrb.gmra.mxu1 %v591_v39  ;;  %v3541_v39 = vrot.slane %v2951_v38, 5 }
 0x440   : > { %873 = vmatpush.msra.mxu1 %v856_v27  ;;  %v949_v27 = vld [vmem:[%s5439_s1 + $0x510] sm:$0xff] }
 0x442   : > { %v584_v43 = vpop.permute.xlu1 %583  ;;  %874 = vmatpush.msra.mxu1 %v855_v28  ;;  %v965_v28 = vld [vmem:[%s5439_s1 + $0x590] sm:$0xff] }
 0x443   : > { %v594_v44 = vsel %vm290_vm10, %v574_v14, %v584_v43 }
 0x444   : > { %749 = vmatmul.f32.gmra.mxu2 %v594_v44  ;;  %875 = vmatpush.msra.mxu1 %v854_v29  ;;  %v928_v44 = vld [vmem:[%s5439_s1 + $0x468] sm:$0xff]  ;;  %v915_v29 = vld [vmem:[%s5439_s1 + $0x400] sm:$0xff] }
 0x445   : > { %1043 = vmatpush.msra.mxu2 %v928_v44 }
 0x446   : > { %680 = vmatmul.f32.gmra.mxu0 %v588_v45  ;;  %703 = vmatmul.f32.gmra.mxu3 %v590_v46  ;;  %v927_v45 = vld [vmem:[%s5439_s1 + $0x460] sm:$0xff]  ;;  %v926_v46 = vld [vmem:[%s5439_s1 + $0x458] sm:$0xff] }
 0x447   : > { %726 = vmatmul.f32.gmra.mxu1 %v592_v8  ;;  %v944_v8 = vld [vmem:[%s5439_s1 + $0x4e8] sm:$0xff]  ;;  %1044 = vmatpush.msra.mxu2 %v927_v45  ;;  %v946_v45 = vld [vmem:[%s5439_s1 + $0x4f8] sm:$0xff] }
 0x448   : > { %876 = vmatpush.msra.mxu1 %v853_v30  ;;  %1063 = vmatpush.msra.mxu0 %v944_v8  ;;  %v932_v30 = vld [vmem:[%s5439_s1 + $0x488] sm:$0xff] }
 0x449   : > { %1045 = vmatpush.msra.mxu2 %v926_v46  ;;  %v962_v46 = vld [vmem:[%s5439_s1 + $0x578] sm:$0xff] }
 0x44a   : > { %877 = vmatpush.msra.mxu1 %v852_v31  ;;  %v948_v31 = vld [vmem:[%s5439_s1 + $0x508] sm:$0xff] }
 0x44c   : > { %878 = vmatpush.msra.mxu1 %v851_v32  ;;  %v964_v32 = vld [vmem:[%s5439_s1 + $0x588] sm:$0xff] }
 0x44e   : > { %2806 = vmatmul.msk.f32.vlgmr.msrb.gmra.mxu0 %vm287_vm9, %v3209_v41  ;;  %879 = vmatpush.msra.mxu1 %v850_v34  ;;  %v914_v34 = vld [vmem:[%s5439_s1 + $0x3f8] sm:$0xff] }
 0x450   : > { %880 = vmatpush.msra.mxu1 %v849_v36  ;;  %v947_v36 = vld [vmem:[%s5439_s1 + $0x500] sm:$0xff] }
 0x452   : > { %881 = vmatpush.msra.mxu1 %v848_v1  ;;  %v992_v1 = vld [vmem:[%s5439_s1 + $0x668] sm:$0xff] }
 0x456   : > { %2807 = vmatmul.msk.f32.gmra.mxu0 %vm287_vm9, %v3212_v42 }
 0x4a8   : > { %v747_v55 = vpop.f32.mrf.mxu2 }
 0x4bb   : > { %v678_v47 = vpop.f32.mrf.mxu0 }
 0x4bc   : > { %v679_v9 = vadd.f32 %v2922_v48, %v678_v47  ;;  %v724_v52 = vpop.f32.mrf.mxu1  ;;  %v960_v47 = vld [vmem:[%s5439_s1 + $0x568] sm:$0xff] }
 0x4c1   : > { %v701_v49 = vpop.f32.mrf.mxu3 }
 0x4c2   : > { %v702_v51 = vadd.f32 %v701_v49, %v679_v9  ;;  %v943_v49 = vld [vmem:[%s5439_s1 + $0x4e0] sm:$0xff] }
 0x4c3   : > { %v681_v50 = vpop.f32.mrf.mxu0  ;;  %v959_v9 = vld [vmem:[%s5439_s1 + $0x560] sm:$0xff]  ;;  %1064 = vmatpush.msra.mxu0 %v943_v49  ;;  %v945_v49 = vld [vmem:[%s5439_s1 + $0x4f0] sm:$0xff] }
 0x4c4   : > { %v725_v53 = vadd.f32 %v724_v52, %v702_v51  ;;  %v682_v41 = vadd.f32 %v2922_v48, %v681_v50  ;;  %v727_v60 = vpop.f32.mrf.mxu1  ;;  %v976_v48 = vld [vmem:[%s5439_s1 + $0x5e8] sm:$0xff]  ;;  %v925_v50 = vld [vmem:[%s5439_s1 + $0x450] sm:$0xff]  ;;  %v975_v51 = vld [vmem:[%s5439_s1 + $0x5e0] sm:$0xff] }
 0x4c5   : > { %1103 = vmatpush.msrb.mxu1 %v976_v48  ;;  %v942_v52 = vld [vmem:[%s5439_s1 + $0x4d8] sm:$0xff]  ;;  %1046 = vmatpush.msra.mxu2 %v925_v50  ;;  %v929_v48 = vld [vmem:[%s5439_s1 + $0x470] sm:$0xff]  ;;  %v1008_v50 = vld [vmem:[%s5439_s1 + $0x6e8] sm:$0xff] }
 0x4c6   : > { %v748_v57 = vadd.f32 %v747_v55, %v725_v53  ;;  %v958_v53 = vld [vmem:[%s5439_s1 + $0x558] sm:$0xff]  ;;  %1065 = vmatpush.msra.mxu0 %v942_v52  ;;  %v957_v55 = vld [vmem:[%s5439_s1 + $0x550] sm:$0xff]  ;;  %v1040_v52 = vld [vmem:[%s5439_s1 + $0x7e8] sm:$0xff] }
 0x4c7   : > { %v750_v62 = vpop.f32.mrf.mxu2  ;;  %1104 = vmatpush.msrb.mxu1 %v975_v51  ;;  %v1024_v51 = vld [vmem:[%s5439_s1 + $0x768] sm:$0xff] }
 0x4c9   : > { %v704_v54 = vpop.f32.mrf.mxu3 }
 0x4ca   : > { %v705_v42 = vadd.f32 %v704_v54, %v682_v41  ;;  %v924_v54 = vld [vmem:[%s5439_s1 + $0x448] sm:$0xff]  ;;  %v941_v41 = vld [vmem:[%s5439_s1 + $0x4d0] sm:$0xff] }
 0x4cb   : > { %v780_v56 = vpop.f32.mrf.mxu0  ;;  %1047 = vmatpush.msra.mxu2 %v924_v54  ;;  %1066 = vmatpush.msra.mxu0 %v941_v41  ;;  %v1023_v54 = vld [vmem:[%s5439_s1 + $0x760] sm:$0xff] }
 0x4cc   : > { %v781_v58 = vadd.f32 %v2923_v17, %v780_v56  ;;  %v728_v61 = vadd.f32 %v727_v60, %v705_v42  ;;  %v973_v56 = vld [vmem:[%s5439_s1 + $0x5d0] sm:$0xff]  ;;  %v923_v42 = vld [vmem:[%s5439_s1 + $0x440] sm:$0xff]  ;;  %v922_v60 = vld [vmem:[%s5439_s1 + $0x438] sm:$0xff] }
 0x4cd   : > { %1048 = vmatpush.msra.mxu2 %v923_v42  ;;  %v1039_v41 = vld [vmem:[%s5439_s1 + $0x7e0] sm:$0xff]  ;;  %v1022_v42 = vld [vmem:[%s5439_s1 + $0x758] sm:$0xff] }
 0x4ce   : > { %v786_v59 = vadd.f32 %v781_v58, %v748_v57  ;;  %v751_v63 = vadd.f32 %v750_v62, %v728_v61  ;;  %v940_v57 = vld [vmem:[%s5439_s1 + $0x4c8] sm:$0xff]  ;;  %v939_v61 = vld [vmem:[%s5439_s1 + $0x4c0] sm:$0xff] }
 0x4cf   : > { %v956_v58 = vld [vmem:[%s5439_s1 + $0x548] sm:$0xff]  ;;  %1067 = vmatpush.msra.mxu0 %v940_v57  ;;  %v971_v62 = vld [vmem:[%s5439_s1 + $0x5c0] sm:$0xff]  ;;  %1049 = vmatpush.msra.mxu2 %v922_v60  ;;  %v1038_v57 = vld [vmem:[%s5439_s1 + $0x7d8] sm:$0xff] }
 0x4d0   : > { %v788_v23 = vmax.f32 %v786_v59, 0.0  ;;  %v972_v59 = vld [vmem:[%s5439_s1 + $0x5c8] sm:$0xff]  ;;  %v1021_v60 = vld [vmem:[%s5439_s1 + $0x750] sm:$0xff] }
 0x4d1   : > { %1068 = vmatpush.msra.mxu0 %v939_v61  ;;  %v1037_v61 = vld [vmem:[%s5439_s1 + $0x7d0] sm:$0xff] }
 0x4d2   : > { %v792_v3 = vrot.slane %v788_v23, 7  ;;  %v955_v23 = vld [vmem:[%s5439_s1 + $0x540] sm:$0xff] }
 0x4d3   : > { %v783_v22 = vpop.f32.mrf.mxu0 }
 0x4d4   : > { %v784_v2 = vadd.f32 %v2923_v17, %v783_v22  ;;  %v797_v7 = vsel %vm275_vm6, 0.0, %v792_v3  ;;  %v974_v17 = vld [vmem:[%s5439_s1 + $0x5d8] sm:$0xff]  ;;  %v921_v22 = vld [vmem:[%s5439_s1 + $0x430] sm:$0xff] }
 0x4d5   : > { %v799_v12 = vrot.slane %v797_v7, 1  ;;  %1105 = vmatpush.msrb.mxu1 %v974_v17  ;;  %1050 = vmatpush.msra.mxu2 %v921_v22  ;;  %v1007_v17 = vld [vmem:[%s5439_s1 + $0x6e0] sm:$0xff]  ;;  %v1020_v22 = vld [vmem:[%s5439_s1 + $0x748] sm:$0xff] }
 0x4d6   : > { %v787_v4 = vadd.f32 %v784_v2, %v751_v63  ;;  %v938_v63 = vld [vmem:[%s5439_s1 + $0x4b8] sm:$0xff] }
 0x4d7   : > { %1106 = vmatpush.msrb.mxu1 %v973_v56  ;;  %v954_v2 = vld [vmem:[%s5439_s1 + $0x538] sm:$0xff]  ;;  %1069 = vmatpush.msra.mxu0 %v938_v63  ;;  %v1036_v63 = vld [vmem:[%s5439_s1 + $0x7c8] sm:$0xff] }
 0x4d8   : > { %v789_v5 = vmax.f32 %v787_v4, 0.0  ;;  %v920_v4 = vld [vmem:[%s5439_s1 + $0x428] sm:$0xff]  ;;  %v1006_v56 = vld [vmem:[%s5439_s1 + $0x6d8] sm:$0xff] }
 0x4d9   : > { %1107 = vmatpush.msrb.mxu1 %v972_v59  ;;  %1051 = vmatpush.msra.mxu2 %v920_v4  ;;  %v1005_v59 = vld [vmem:[%s5439_s1 + $0x6d0] sm:$0xff]  ;;  %v1019_v4 = vld [vmem:[%s5439_s1 + $0x740] sm:$0xff] }
 0x4da   : > { %v793_v6 = vrot.slane %v789_v5, 7  ;;  %v937_v5 = vld [vmem:[%s5439_s1 + $0x4b0] sm:$0xff] }
 0x4db   : > { %1108 = vmatpush.msrb.mxu1 %v971_v62  ;;  %1070 = vmatpush.msra.mxu0 %v937_v5  ;;  %v1004_v62 = vld [vmem:[%s5439_s1 + $0x6c8] sm:$0xff]  ;;  %v1035_v5 = vld [vmem:[%s5439_s1 + $0x7c0] sm:$0xff] }
 0x4dc   : > { %v794_v10 = vsel %vm275_vm6, %v792_v3, %v793_v6  ;;  %v970_v3 = vld [vmem:[%s5439_s1 + $0x5b8] sm:$0xff]  ;;  %v953_v6 = vld [vmem:[%s5439_s1 + $0x530] sm:$0xff] }
 0x4dd   : > { %v800_v11 = vrot.slane %v794_v10, 1  ;;  %1109 = vmatpush.msrb.mxu1 %v970_v3  ;;  %v1003_v3 = vld [vmem:[%s5439_s1 + $0x6c0] sm:$0xff] }
 0x4df   : > { %v805_v13 = vmax.f32 %v794_v10, %v800_v11  ;;  %v801_v14 = vsel %vm148_vm0, %v799_v12, %v800_v11  ;;  %v919_v10 = vld [vmem:[%s5439_s1 + $0x420] sm:$0xff]  ;;  %v936_v11 = vld [vmem:[%s5439_s1 + $0x4a8] sm:$0xff] }
 0x4e0   : > { %v804_v15 = vmax.f32 %v797_v7, %v801_v14  ;;  %v969_v7 = vld [vmem:[%s5439_s1 + $0x5b0] sm:$0xff]  ;;  %v952_v12 = vld [vmem:[%s5439_s1 + $0x528] sm:$0xff]  ;;  %v918_v14 = vld [vmem:[%s5439_s1 + $0x418] sm:$0xff]  ;;  %1052 = vmatpush.msra.mxu2 %v919_v10  ;;  %1071 = vmatpush.msra.mxu0 %v936_v11 }
 0x4e1   : > { %2808 = vmatpush.msk.msrb.mxu3 %vm275_vm6, %v805_v13  ;;  %v968_v13 = vld [vmem:[%s5439_s1 + $0x5a8] sm:$0xff]  ;;  %1110 = vmatpush.msrb.mxu1 %v969_v7  ;;  %v1002_v7 = vld [vmem:[%s5439_s1 + $0x6b8] sm:$0xff] }
 0x4e2   : > { %1053 = vmatpush.msra.mxu2 %v918_v14  ;;  %v1018_v10 = vld [vmem:[%s5439_s1 + $0x738] sm:$0xff]  ;;  %v981_v14 = vld [vmem:[%s5439_s1 + $0x610] sm:$0xff] }
 0x4e3   : > { %829 = vmatpush.msrb.mxu3 %v804_v15  ;;  %v935_v15 = vld [vmem:[%s5439_s1 + $0x4a0] sm:$0xff]  ;;  %1111 = vmatpush.msrb.mxu1 %v968_v13  ;;  %v1034_v11 = vld [vmem:[%s5439_s1 + $0x7b8] sm:$0xff] }
 0x4e4   : > { %2809 = vmatmul.msk.f32.vlgmr.msrb.gmra.mxu3 %vm807_vm13, %v806_v16  ;;  %v951_v16 = vld [vmem:[%s5439_s1 + $0x520] sm:$0xff]  ;;  %1072 = vmatpush.msra.mxu0 %v935_v15  ;;  %v982_v13 = vld [vmem:[%s5439_s1 + $0x618] sm:$0xff]  ;;  %v980_v15 = vld [vmem:[%s5439_s1 + $0x608] sm:$0xff]  ;;  %vm1446_vm13 = vcmask 23552  }
 0x4e5   : > { %1083 = vmatpush.msra.mxu3 %v960_v47  ;;  %1112 = vmatpush.msrb.mxu1 %v967_v18  ;;  %v991_v47 = vld [vmem:[%s5439_s1 + $0x660] sm:$0xff]  ;;  %v1017_v18 = vld [vmem:[%s5439_s1 + $0x730] sm:$0xff] }
 0x4e6   : > { %1054 = vmatpush.msra.mxu2 %v917_v19  ;;  %1073 = vmatpush.msra.mxu0 %v934_v20  ;;  %v1033_v19 = vld [vmem:[%s5439_s1 + $0x7b0] sm:$0xff]  ;;  %v979_v20 = vld [vmem:[%s5439_s1 + $0x600] sm:$0xff] }
 0x4e7   : > { %1084 = vmatpush.msra.mxu3 %v959_v9  ;;  %1113 = vmatpush.msrb.mxu1 %v966_v24  ;;  %v990_v9 = vld [vmem:[%s5439_s1 + $0x658] sm:$0xff]  ;;  %v1016_v24 = vld [vmem:[%s5439_s1 + $0x728] sm:$0xff] }
 0x4e8   : > { %1055 = vmatpush.msra.mxu2 %v916_v25  ;;  %1074 = vmatpush.msra.mxu0 %v933_v26  ;;  %v1032_v25 = vld [vmem:[%s5439_s1 + $0x7a8] sm:$0xff]  ;;  %v978_v26 = vld [vmem:[%s5439_s1 + $0x5f8] sm:$0xff] }
 0x4e9   : > { %1085 = vmatpush.msra.mxu3 %v958_v53  ;;  %1114 = vmatpush.msrb.mxu1 %v965_v28  ;;  %v989_v53 = vld [vmem:[%s5439_s1 + $0x650] sm:$0xff]  ;;  %v1015_v28 = vld [vmem:[%s5439_s1 + $0x720] sm:$0xff] }
 0x4ea   : > { %1056 = vmatpush.msra.mxu2 %v915_v29  ;;  %1075 = vmatpush.msra.mxu0 %v932_v30  ;;  %v1031_v29 = vld [vmem:[%s5439_s1 + $0x7a0] sm:$0xff]  ;;  %v977_v30 = vld [vmem:[%s5439_s1 + $0x5f0] sm:$0xff] }
 0x4eb   : > { %1086 = vmatpush.msra.mxu3 %v957_v55  ;;  %1115 = vmatpush.msrb.mxu1 %v964_v32  ;;  %v988_v55 = vld [vmem:[%s5439_s1 + $0x648] sm:$0xff]  ;;  %v1014_v32 = vld [vmem:[%s5439_s1 + $0x718] sm:$0xff] }
 0x4ec   : > { %1057 = vmatpush.msra.mxu2 %v914_v34  ;;  %v1030_v34 = vld [vmem:[%s5439_s1 + $0x798] sm:$0xff] }
 0x4ed   : > { %1087 = vmatpush.msra.mxu3 %v956_v58  ;;  %v987_v58 = vld [vmem:[%s5439_s1 + $0x640] sm:$0xff] }
 0x4ef   : > { %1088 = vmatpush.msra.mxu3 %v955_v23  ;;  %v986_v23 = vld [vmem:[%s5439_s1 + $0x638] sm:$0xff] }
 0x4f1   : > { %1089 = vmatpush.msra.mxu3 %v954_v2  ;;  %v985_v2 = vld [vmem:[%s5439_s1 + $0x630] sm:$0xff] }
 0x4f3   : > { %1090 = vmatpush.msra.mxu3 %v953_v6  ;;  %v984_v6 = vld [vmem:[%s5439_s1 + $0x628] sm:$0xff] }
 0x4f5   : > { %1091 = vmatpush.msra.mxu3 %v952_v12  ;;  %v983_v12 = vld [vmem:[%s5439_s1 + $0x620] sm:$0xff] }
 0x4f7   : > { %1092 = vmatpush.msra.mxu3 %v951_v16  ;;  %v1001_v16 = vld [vmem:[%s5439_s1 + $0x6b0] sm:$0xff] }
 0x4f9   : > { %1093 = vmatpush.msra.mxu3 %v950_v21  ;;  %v1000_v21 = vld [vmem:[%s5439_s1 + $0x6a8] sm:$0xff] }
 0x4fb   : > { %1094 = vmatpush.msra.mxu3 %v949_v27  ;;  %v999_v27 = vld [vmem:[%s5439_s1 + $0x6a0] sm:$0xff] }
 0x4fd   : > { %1095 = vmatpush.msra.mxu3 %v948_v31  ;;  %v998_v31 = vld [vmem:[%s5439_s1 + $0x698] sm:$0xff] }
 0x4ff   : > { %1096 = vmatpush.msra.mxu3 %v947_v36  ;;  %v1013_v36 = vld [vmem:[%s5439_s1 + $0x710] sm:$0xff] }
 0x501   : > { %1097 = vmatpush.msra.mxu3 %v946_v45  ;;  %v1011_v45 = vld [vmem:[%s5439_s1 + $0x700] sm:$0xff] }
 0x503   : > { %1098 = vmatpush.msra.mxu3 %v945_v49  ;;  %v993_v49 = vld [vmem:[%s5439_s1 + $0x670] sm:$0xff] }
 0x505   : > { %1163 = vmatpush.msrb.mxu3 %v1024_v51 }
 0x507   : > { %1164 = vmatpush.msrb.mxu3 %v1023_v54  ;;  %v1210_v54 = vld [vmem:[%s5439_s1 + $0x828] sm:$0xff] }
 0x509   : > { %1165 = vmatpush.msrb.mxu3 %v1022_v42 }
 0x50b   : > { %1166 = vmatpush.msrb.mxu3 %v1021_v60  ;;  %v899_v60 = vrot.slane %v2951_v38, 4 }
 0x50d   : > { %1167 = vmatpush.msrb.mxu3 %v1020_v22  ;;  %v3958_v22 = vrot.slane %v2951_v38, 6 }
 0x50f   : > { %1168 = vmatpush.msrb.mxu3 %v1019_v4 }
 0x511   : > { %1169 = vmatpush.msrb.mxu3 %v1018_v10 }
 0x513   : > { %1170 = vmatpush.msrb.mxu3 %v1017_v18 }
 0x515   : > { %1171 = vmatpush.msrb.mxu3 %v1016_v24  ;;  %v1293_v24 = vld [vmem:[%s5439_s1 + $0x890] sm:$0xff] }
 0x517   : > { %1172 = vmatpush.msrb.mxu3 %v1015_v28 }
 0x519   : > { %1173 = vmatpush.msrb.mxu3 %v1014_v32  ;;  %v1290_v32 = vld [vmem:[%s5439_s1 + $0x878] sm:$0xff] }
 0x51b   : > { %1174 = vmatpush.msrb.mxu3 %v1013_v36 }
 0x567   : > { %v3530_v33 = vpop.f32.mrf.mxu3 }
 0x568   : > { %v835_v35 = vrot.slane %v3530_v33, 6 }
 0x56a   : > { %v837_v37 = vsel %vm263_vm8, 0.0, %v835_v35  ;;  %v931_v35 = vld [vmem:[%s5439_s1 + $0x480] sm:$0xff] }
 0x56b   : > { %v3544_v40 = vsel %vm148_vm0, %v837_v37, 0.0  ;;  %v963_v37 = vld [vmem:[%s5439_s1 + $0x580] sm:$0xff]  ;;  %1076 = vmatpush.msra.mxu0 %v931_v35  ;;  %v997_v35 = vld [vmem:[%s5439_s1 + $0x690] sm:$0xff] }
 0x56c   : > { %v841_v0 = vrot.slane %v3544_v40, 5  ;;  %1116 = vmatpush.msrb.mxu1 %v963_v37  ;;  %v1029_v37 = vld [vmem:[%s5439_s1 + $0x790] sm:$0xff] }
 0x56e   : > { %v843_v43 = vsel %vm206_vm4, %v841_v0, %v3541_v39  ;;  %v913_v0 = vld [vmem:[%s5439_s1 + $0x3f0] sm:$0xff]  ;;  %1117 = vmatpush.msrb.mxu1 %v962_v46  ;;  %v1027_v46 = vld [vmem:[%s5439_s1 + $0x780] sm:$0xff] }
 0x56f   : > { %844 = vrot.lane.b32.xlu0 %v843_v43, %s2949_s21  ;;  %v930_v43 = vld [vmem:[%s5439_s1 + $0x478] sm:$0xff]  ;;  %1058 = vmatpush.msra.mxu2 %v913_v0  ;;  %v996_v0 = vld [vmem:[%s5439_s1 + $0x688] sm:$0xff] }
 0x570   : > { %1077 = vmatpush.msra.mxu0 %v930_v43  ;;  %v1012_v43 = vld [vmem:[%s5439_s1 + $0x708] sm:$0xff] }
 0x571   : > { %1123 = vmatpush.msrb.mxu2 %v992_v1  ;;  %v1028_v1 = vld [vmem:[%s5439_s1 + $0x788] sm:$0xff]  ;;  %1175 = vmatpush.msrb.mxu3 %v1012_v43  ;;  %v2926_v43 = vld [vmem:[%s5439_s1 + $0x14f0] ss:$0 sm:$0xff] }
 0x572   : > { %1078 = vmatpush.msra.mxu0 %v929_v48  ;;  %v1026_v48 = vld [vmem:[%s5439_s1 + $0x778] sm:$0xff] }
 0x573   : > { %1124 = vmatpush.msrb.mxu2 %v991_v47  ;;  %v1010_v47 = vld [vmem:[%s5439_s1 + $0x6f8] sm:$0xff]  ;;  %1176 = vmatpush.msrb.mxu3 %v1011_v45 }
 0x574   : > { %1143 = vmatpush.msrb.mxu0 %v1008_v50  ;;  %v2924_v50 = vld [vmem:[%s5439_s1 + $0x14ee] ss:$0 sm:$0xff] }
 0x575   : > { %1125 = vmatpush.msrb.mxu2 %v990_v9  ;;  %v1025_v9 = vld [vmem:[%s5439_s1 + $0x770] sm:$0xff]  ;;  %1177 = vmatpush.msrb.mxu3 %v1010_v47 }
 0x576   : > { %1144 = vmatpush.msrb.mxu0 %v1007_v17 }
 0x577   : > { %1126 = vmatpush.msrb.mxu2 %v989_v53 }
 0x578   : > { %1145 = vmatpush.msrb.mxu0 %v1006_v56 }
 0x579   : > { %1127 = vmatpush.msrb.mxu2 %v988_v55 }
 0x57a   : > { %1146 = vmatpush.msrb.mxu0 %v1005_v59 }
 0x57b   : > { %1128 = vmatpush.msrb.mxu2 %v987_v58  ;;  %v1208_v58 = vld [vmem:[%s5439_s1 + $0x818] sm:$0xff] }
 0x57c   : > { %1147 = vmatpush.msrb.mxu0 %v1004_v62 }
 0x57d   : > { %1129 = vmatpush.msrb.mxu2 %v986_v23 }
 0x57e   : > { %1148 = vmatpush.msrb.mxu0 %v1003_v3  ;;  %v3964_v3 = vrot.slane %v2951_v38, 7 }
 0x57f   : > { %1130 = vmatpush.msrb.mxu2 %v985_v2 }
 0x580   : > { %1149 = vmatpush.msrb.mxu0 %v1002_v7 }
 0x581   : > { %1131 = vmatpush.msrb.mxu2 %v984_v6 }
 0x582   : > { %1150 = vmatpush.msrb.mxu0 %v1001_v16  ;;  %v1295_v16 = vld [vmem:[%s5439_s1 + $0x8a0] sm:$0xff] }
 0x583   : > { %1132 = vmatpush.msrb.mxu2 %v983_v12  ;;  %v1203_v12 = vld [vmem:[%s5439_s1 + $0x7f0] sm:$0xff] }
 0x584   : > { %1151 = vmatpush.msrb.mxu0 %v1000_v21 }
 0x585   : > { %1133 = vmatpush.msrb.mxu2 %v982_v13  ;;  %v2925_v13 = vld [vmem:[%s5439_s1 + $0x14ef] ss:$0 sm:$0xff] }
 0x586   : > { %1152 = vmatpush.msrb.mxu0 %v999_v27  ;;  %v1292_v27 = vld [vmem:[%s5439_s1 + $0x888] sm:$0xff] }
 0x587   : > { %1134 = vmatpush.msrb.mxu2 %v981_v14 }
 0x588   : > { %1153 = vmatpush.msrb.mxu0 %v998_v31 }
 0x589   : > { %1135 = vmatpush.msrb.mxu2 %v980_v15  ;;  %v1296_v15 = vld [vmem:[%s5439_s1 + $0x8a8] sm:$0xff] }
 0x58a   : > { %1154 = vmatpush.msrb.mxu0 %v997_v35 }
 0x58b   : > { %1136 = vmatpush.msrb.mxu2 %v979_v20 }
 0x58c   : > { %1155 = vmatpush.msrb.mxu0 %v996_v0 }
 0x58d   : > { %1137 = vmatpush.msrb.mxu2 %v978_v26 }
 0x58f   : > { %1138 = vmatpush.msrb.mxu2 %v977_v30 }
 0x5e1   : > { %v845_v44 = vpop.permute.xlu0 %844 }
 0x5e2   : > { %v847_v8 = vsel %vm290_vm10, %v3544_v40, %v845_v44  ;;  %v961_v40 = vld [vmem:[%s5439_s1 + $0x570] sm:$0xff]  ;;  %v995_v44 = vld [vmem:[%s5439_s1 + $0x680] sm:$0xff] }
 0x5e3   : > { %882 = vmatmul.f32.vlgmr.msra.gmra.mxu1 %v847_v8  ;;  %v994_v8 = vld [vmem:[%s5439_s1 + $0x678] sm:$0xff]  ;;  %1156 = vmatpush.msrb.mxu0 %v995_v44  ;;  %v1287_v44 = vld [vmem:[%s5439_s1 + $0x860] sm:$0xff] }
 0x5e4   : > { %1118 = vmatpush.msrb.mxu1 %v961_v40  ;;  %v1009_v40 = vld [vmem:[%s5439_s1 + $0x6f0] sm:$0xff] }
 0x5e5   : > { %1157 = vmatpush.msrb.mxu0 %v994_v8  ;;  %1178 = vmatpush.msrb.mxu3 %v1009_v40  ;;  %v1285_v40 = vld [vmem:[%s5439_s1 + $0x850] sm:$0xff] }
 0x5e6   : > { %1183 = vmatpush.msra.mxu1 %v1040_v52 }
 0x5e7   : > { %1158 = vmatpush.msrb.mxu0 %v993_v49 }
 0x5e8   : > { %1184 = vmatpush.msra.mxu1 %v1039_v41 }
 0x5ea   : > { %1185 = vmatpush.msra.mxu1 %v1038_v57  ;;  %v1209_v57 = vld [vmem:[%s5439_s1 + $0x820] sm:$0xff] }
 0x5ec   : > { %1186 = vmatpush.msra.mxu1 %v1037_v61  ;;  %v1207_v61 = vld [vmem:[%s5439_s1 + $0x810] sm:$0xff] }
 0x5ee   : > { %1187 = vmatpush.msra.mxu1 %v1036_v63  ;;  %v1206_v63 = vld [vmem:[%s5439_s1 + $0x808] sm:$0xff] }
 0x5f0   : > { %1188 = vmatpush.msra.mxu1 %v1035_v5  ;;  %v1205_v5 = vld [vmem:[%s5439_s1 + $0x800] sm:$0xff] }
 0x5f2   : > { %1189 = vmatpush.msra.mxu1 %v1034_v11  ;;  %v1204_v11 = vld [vmem:[%s5439_s1 + $0x7f8] sm:$0xff] }
 0x5f4   : > { %1190 = vmatpush.msra.mxu1 %v1033_v19 }
 0x5f6   : > { %1191 = vmatpush.msra.mxu1 %v1032_v25 }
 0x5f8   : > { %1192 = vmatpush.msra.mxu1 %v1031_v29  ;;  %v1291_v29 = vld [vmem:[%s5439_s1 + $0x880] sm:$0xff] }
 0x5fa   : > { %1193 = vmatpush.msra.mxu1 %v1030_v34 }
 0x5fc   : > { %1194 = vmatpush.msra.mxu1 %v1029_v37  ;;  %v1289_v37 = vld [vmem:[%s5439_s1 + $0x870] sm:$0xff] }
 0x5fe   : > { %1195 = vmatpush.msra.mxu1 %v1028_v1  ;;  %v1288_v1 = vld [vmem:[%s5439_s1 + $0x868] sm:$0xff] }
 0x600   : > { %1196 = vmatpush.msra.mxu1 %v1027_v46 }
 0x602   : > { %1197 = vmatpush.msra.mxu1 %v1026_v48  ;;  %v1286_v48 = vld [vmem:[%s5439_s1 + $0x858] sm:$0xff] }
 0x604   : > { %1198 = vmatpush.msra.mxu1 %v1025_v9 }
 0x660   : > { %v883_v51 = vpop.f32.mrf.mxu1 }
 0x661   : > { %v884_v52 = vadd.f32 %v2924_v50, %v883_v51  ;;  %v1284_v50 = vld [vmem:[%s5439_s1 + $0x848] sm:$0xff] }
 0x663   : > { %v886_v53 = vmax.f32 %v884_v52, 0.0  ;;  %v1283_v52 = vld [vmem:[%s5439_s1 + $0x840] sm:$0xff] }
 0x665   : > { %v888_v17 = vrot.slane %v886_v53, 4 }
 0x667   : > { %v890_v41 = vsel %vm198_vm3, 0.0, %v888_v17  ;;  %2811 = vmatmul.msk.f32.vlgmr.msra.gmra.mxu2 %vm2810_vm14, %v888_v17  ;;  %vm1592_vm14 = vcmask 15360  }
 0x668   : > { %1223 = vmatpush.msra.mxu2 %v1210_v54  ;;  %v892_v55 = vrot.slane %v890_v41, 1  ;;  %v894_v56 = vrot.slane %v890_v41, 2  ;;  %v896_v42 = vrot.slane %v890_v41, 3  ;;  %v898_v59 = vrot.slane %v890_v41, 4 }
 0x669   : > { %v902_v23 = vrot.slane %v890_v41, 5  ;;  %v905_v62 = vrot.slane %v890_v41, 6  ;;  %v909_v2 = vrot.slane %v890_v41, 7  ;;  %v1245_v41 = vld [vmem:[%s5439_s1 + $0x14b8] sm:$0x7] }
 0x66a   : > { %1079 = vmatmul.f32.vlgmr.msra.gmra.mxu0 %v892_v55  ;;  %1099 = vmatmul.f32.vlgmr.msra.gmra.mxu3 %v894_v56  ;;  %v900_v4 = vsel %vm198_vm3, %v898_v59, %v899_v60  ;;  %v1312_v55 = vld [vmem:[%s5439_s1 + $0x928] sm:$0xff]  ;;  %v1311_v56 = vld [vmem:[%s5439_s1 + $0x920] sm:$0xff]  ;;  %v1306_v60 = vld [vmem:[%s5439_s1 + $0x8f8] sm:$0xff] }
 0x66b   : > { %1119 = vmatmul.f32.vlgmr.msrb.gmra.mxu1 %v896_v42  ;;  %1224 = vmatpush.msra.mxu2 %v1209_v57  ;;  %v903_v6 = vsel %vm206_vm4, %v902_v23, %v3541_v39  ;;  %v907_v7 = vsel %vm263_vm8, %v905_v62, %v3958_v22  ;;  %v911_v10 = vsel %vm275_vm6, %v909_v2, %v3964_v3  ;;  %v1310_v42 = vld [vmem:[%s5439_s1 + $0x918] sm:$0xff]  ;;  %v1309_v57 = vld [vmem:[%s5439_s1 + $0x910] sm:$0xff]  ;;  %v1307_v59 = vld [vmem:[%s5439_s1 + $0x900] sm:$0xff] }
 0x66c   : > { %1315 = vmatpush.msra.mxu3 %v1296_v15  ;;  %v1304_v23 = vld [vmem:[%s5439_s1 + $0x8e8] sm:$0xff]  ;;  %v1303_v62 = vld [vmem:[%s5439_s1 + $0x8e0] sm:$0xff]  ;;  %v1301_v2 = vld [vmem:[%s5439_s1 + $0x8d0] sm:$0xff] }
 0x66d   : > { %1225 = vmatpush.msra.mxu2 %v1208_v58  ;;  %v1308_v58 = vld [vmem:[%s5439_s1 + $0x908] sm:$0xff] }
 0x66e   : > { %1316 = vmatpush.msra.mxu3 %v1295_v16 }
 0x66f   : > { %1226 = vmatpush.msra.mxu2 %v1207_v61  ;;  %v1305_v61 = vld [vmem:[%s5439_s1 + $0x8f0] sm:$0xff] }
 0x670   : > { %1139 = vmatmul.f32.vlgmr.msrb.gmra.mxu2 %v900_v4  ;;  %v1300_v4 = vld [vmem:[%s5439_s1 + $0x8c8] sm:$0xff] }
 0x671   : > { %1227 = vmatpush.msra.mxu2 %v1206_v63  ;;  %v1302_v63 = vld [vmem:[%s5439_s1 + $0x8d8] sm:$0xff] }
 0x672   : > { %1159 = vmatmul.f32.vlgmr.msrb.gmra.mxu0 %v903_v6  ;;  %1179 = vmatmul.f32.vlgmr.msrb.gmra.mxu3 %v907_v7  ;;  %v1299_v6 = vld [vmem:[%s5439_s1 + $0x8c0] sm:$0xff]  ;;  %v1281_v7 = vld [vmem:[%s5439_s1 + $0x830] sm:$0xff] }
 0x673   : > { %1199 = vmatmul.f32.vlgmr.msra.gmra.mxu1 %v911_v10  ;;  %1228 = vmatpush.msra.mxu2 %v1205_v5  ;;  %v1282_v5 = vld [vmem:[%s5439_s1 + $0x838] sm:$0xff] }
 0x674   : > { %v1298_v10 = vld [vmem:[%s5439_s1 + $0x8b8] sm:$0xff] }
 0x675   : > { %1229 = vmatpush.msra.mxu2 %v1204_v11  ;;  %v1297_v11 = vld [vmem:[%s5439_s1 + $0x8b0] sm:$0xff] }
 0x677   : > { %1230 = vmatpush.msra.mxu2 %v1203_v12 }
 0x678   : > { %2812 = vmatmul.msk.f32.vlgmr.msra.gmra.mxu2 %vm290_vm10, %v3530_v33  ;;  %v1294_v33 = vld [vmem:[%s5439_s1 + $0x898] sm:$0xff] }
 0x679   : > { %1317 = vmatpush.msra.mxu3 %v1294_v33  ;;  %v1369_v33 = vld [vmem:[%s5439_s1 + $0x938] sm:$0xff] }
 0x67b   : > { %1318 = vmatpush.msra.mxu3 %v1293_v24  ;;  %v1411_v24 = vld [vmem:[%s5439_s1 + $0x9c0] sm:$0xff] }
 0x67d   : > { %1319 = vmatpush.msra.mxu3 %v1292_v27  ;;  %v1408_v27 = vld [vmem:[%s5439_s1 + $0x9a8] sm:$0xff] }
 0x67f   : > { %1320 = vmatpush.msra.mxu3 %v1291_v29  ;;  %v2927_v29 = vld [vmem:[%s5439_s1 + $0x14f1] ss:$0 sm:$0xff] }
 0x681   : > { %1321 = vmatpush.msra.mxu3 %v1290_v32  ;;  %v1405_v32 = vld [vmem:[%s5439_s1 + $0x990] sm:$0xff] }
 0x683   : > { %1322 = vmatpush.msra.mxu3 %v1289_v37 }
 0x685   : > { %1323 = vmatpush.msra.mxu3 %v1288_v1  ;;  %v1402_v1 = vld [vmem:[%s5439_s1 + $0x978] sm:$0xff] }
 0x687   : > { %1324 = vmatpush.msra.mxu3 %v1287_v44 }
 0x689   : > { %1325 = vmatpush.msra.mxu3 %v1286_v48  ;;  %v1400_v48 = vld [vmem:[%s5439_s1 + $0x968] sm:$0xff] }
 0x68b   : > { %1326 = vmatpush.msra.mxu3 %v1285_v40  ;;  %v1398_v40 = vld [vmem:[%s5439_s1 + $0x958] sm:$0xff] }
 0x68d   : > { %1327 = vmatpush.msra.mxu3 %v1284_v50 }
 0x68f   : > { %1328 = vmatpush.msra.mxu3 %v1283_v52 }
 0x691   : > { %1329 = vmatpush.msra.mxu3 %v1282_v5  ;;  %v1479_v5 = vld [vmem:[%s5439_s1 + $0x9d0] sm:$0xff] }
 0x693   : > { %1330 = vmatpush.msra.mxu3 %v1281_v7  ;;  %v1530_v7 = vld [vmem:[%s5439_s1 + $0xa60] sm:$0xff] }
 0x6e7   : > { %v1080_v18 = vpop.f32.mrf.mxu0 }
 0x6e8   : > { %v1120_v26 = vpop.f32.mrf.mxu1 }
 0x6ea   : > { %v1060_v14 = vpop.f32.mrf.mxu2 }
 0x6eb   : > { %v1061_v19 = vadd.f32 %v2925_v13, %v1060_v14 }
 0x6ed   : > { %v1081_v20 = vadd.f32 %v1080_v18, %v1061_v19  ;;  %v1100_v21 = vpop.f32.mrf.mxu3  ;;  %v1371_v18 = vld [vmem:[%s5439_s1 + $0x948] sm:$0xff]  ;;  %v1370_v19 = vld [vmem:[%s5439_s1 + $0x940] sm:$0xff] }
 0x6ee   : > { %1389 = vmatpush.msrb.mxu2 %v1371_v18  ;;  %v1543_v18 = vld [vmem:[%s5439_s1 + $0xac8] sm:$0xff] }
 0x6ef   : > { %v1101_v25 = vadd.f32 %v1100_v21, %v1081_v20  ;;  %v1160_v34 = vpop.f32.mrf.mxu0  ;;  %v1368_v20 = vld [vmem:[%s5439_s1 + $0x930] sm:$0xff]  ;;  %v1412_v21 = vld [vmem:[%s5439_s1 + $0x9c8] sm:$0xff] }
 0x6f0   : > { %v1200_v45 = vpop.f32.mrf.mxu1  ;;  %1390 = vmatpush.msrb.mxu2 %v1370_v19  ;;  %v1526_v19 = vld [vmem:[%s5439_s1 + $0xa40] sm:$0xff] }
 0x6f1   : > { %v1121_v28 = vadd.f32 %v1120_v26, %v1101_v25  ;;  %v1410_v25 = vld [vmem:[%s5439_s1 + $0x9b8] sm:$0xff]  ;;  %v1409_v26 = vld [vmem:[%s5439_s1 + $0x9b0] sm:$0xff] }
 0x6f2   : > { %1391 = vmatpush.msrb.mxu2 %v1369_v33  ;;  %v1542_v33 = vld [vmem:[%s5439_s1 + $0xac0] sm:$0xff] }
 0x6f3   : > { %v1140_v30 = vpop.f32.mrf.mxu2 }
 0x6f4   : > { %v1141_v31 = vadd.f32 %v1140_v30, %v1121_v28  ;;  %1392 = vmatpush.msrb.mxu2 %v1368_v20  ;;  %v1407_v28 = vld [vmem:[%s5439_s1 + $0x9a0] sm:$0xff]  ;;  %v1406_v30 = vld [vmem:[%s5439_s1 + $0x998] sm:$0xff] }
 0x6f5   : > { %v1180_v35 = vpop.f32.mrf.mxu3  ;;  %v1525_v20 = vld [vmem:[%s5439_s1 + $0xa38] sm:$0xff] }
 0x6f6   : > { %v1161_v36 = vadd.f32 %v1160_v34, %v1141_v31  ;;  %1415 = vmatpush.msra.mxu2 %v1412_v21  ;;  %v1541_v21 = vld [vmem:[%s5439_s1 + $0xab8] sm:$0xff] }
 0x6f8   : > { %v1181_v0 = vadd.f32 %v1180_v35, %v1161_v36  ;;  %1416 = vmatpush.msra.mxu2 %v1411_v24  ;;  %v1404_v36 = vld [vmem:[%s5439_s1 + $0x988] sm:$0xff]  ;;  %v1524_v24 = vld [vmem:[%s5439_s1 + $0xa30] sm:$0xff] }
 0x6fa   : > { %v1201_v8 = vadd.f32 %v1200_v45, %v1181_v0  ;;  %1417 = vmatpush.msra.mxu2 %v1410_v25  ;;  %v1403_v0 = vld [vmem:[%s5439_s1 + $0x980] sm:$0xff]  ;;  %v1540_v25 = vld [vmem:[%s5439_s1 + $0xab0] sm:$0xff] }
 0x6fb   : > { %v1232_v46 = vpop.f32.mrf.mxu2 }
 0x6fc   : > { %v1233_v47 = vadd.f32 %v2926_v43, %v1232_v46  ;;  %1418 = vmatpush.msra.mxu2 %v1409_v26  ;;  %v1523_v26 = vld [vmem:[%s5439_s1 + $0xa28] sm:$0xff] }
 0x6fe   : > { %v1235_v49 = vadd.f32 %v1233_v47, %v1201_v8  ;;  %1419 = vmatpush.msra.mxu2 %v1408_v27  ;;  %v1401_v47 = vld [vmem:[%s5439_s1 + $0x970] sm:$0xff]  ;;  %v1539_v27 = vld [vmem:[%s5439_s1 + $0xaa8] sm:$0xff] }
 0x700   : > { %v1236_v9 = vmax.f32 %v1235_v49, 0.0  ;;  %1420 = vmatpush.msra.mxu2 %v1407_v28  ;;  %v1399_v49 = vld [vmem:[%s5439_s1 + $0x960] sm:$0xff] }
 0x701   : > { %v1522_v28 = vld [vmem:[%s5439_s1 + $0xa20] sm:$0xff] }
 0x702   : > { %v1238_v51 = vrot.slane %v1236_v9, 7  ;;  %1421 = vmatpush.msra.mxu2 %v1406_v30  ;;  %v1397_v9 = vld [vmem:[%s5439_s1 + $0x950] sm:$0xff]  ;;  %v1521_v30 = vld [vmem:[%s5439_s1 + $0xa18] sm:$0xff] }
 0x704   : > { %v1240_v53 = vsel %vm275_vm6, 0.0, %v1238_v51  ;;  %1422 = vmatpush.msra.mxu2 %v1405_v32 }
 0x705   : > { %v1242_v17 = vrot.slane %v1240_v53, 1 }
 0x706   : > { %1423 = vmatpush.msra.mxu2 %v1404_v36  ;;  %v1519_v36 = vld [vmem:[%s5439_s1 + $0xa08] sm:$0xff] }
 0x707   : > { %v1244_v54 = vmax.f32 %v1240_v53, %v1242_v17  ;;  %v2928_v53 = vld [vmem:[%s5439_s1 + $0x14f2] ss:$0 sm:$0xff]  ;;  %v2929_v17 = vld [vmem:[%s5439_s1 + $0x14f3] ss:$0 sm:$0xff] }
 0x708   : > { %1424 = vmatpush.msra.mxu2 %v1403_v0  ;;  %v1518_v0 = vld [vmem:[%s5439_s1 + $0xa00] sm:$0xff] }
 0x709   : > { %2813 = vmatpush.msk.msra.mxu0 %vm233_vm5, %v1244_v54 }
 0x70a   : > { %2814 = vmatmul.msk.f32.vlgmr.msra.gmra.mxu0 %vm1246_vm15, %v1245_v41  ;;  %1425 = vmatpush.msra.mxu2 %v1402_v1  ;;  %v1517_v1 = vld [vmem:[%s5439_s1 + $0x9f8] sm:$0xff] }
 0x70b   : > { %1335 = vmatpush.msrb.mxu0 %v1312_v55 }
 0x70c   : > { %1426 = vmatpush.msra.mxu2 %v1401_v47  ;;  %v1483_v47 = vld [vmem:[%s5439_s1 + $0x14f4] sm:$0x1] }
 0x70d   : > { %1336 = vmatpush.msrb.mxu0 %v1311_v56 }
 0x70e   : > { %1427 = vmatpush.msra.mxu2 %v1400_v48 }
 0x70f   : > { %1337 = vmatpush.msrb.mxu0 %v1310_v42 }
 0x710   : > { %1428 = vmatpush.msra.mxu2 %v1399_v49 }
 0x711   : > { %1338 = vmatpush.msrb.mxu0 %v1309_v57 }
 0x712   : > { %1429 = vmatpush.msra.mxu2 %v1398_v40 }
 0x713   : > { %1339 = vmatpush.msrb.mxu0 %v1308_v58 }
 0x714   : > { %1430 = vmatpush.msra.mxu2 %v1397_v9 }
 0x715   : > { %1340 = vmatpush.msrb.mxu0 %v1307_v59 }
 0x717   : > { %1341 = vmatpush.msrb.mxu0 %v1306_v60 }
 0x719   : > { %1342 = vmatpush.msrb.mxu0 %v1305_v61  ;;  %v1445_v61 = vld [vmem:[%s5439_s1 + $0x14c0] sm:$0x3] }
 0x71b   : > { %1343 = vmatpush.msrb.mxu0 %v1304_v23  ;;  %v1482_v23 = vld [vmem:[%s5439_s1 + $0x9e8] sm:$0xff] }
 0x71c   : > { %1499 = vmatpush.msrb.mxu3 %v1482_v23  ;;  %v1648_v23 = vld [vmem:[%s5439_s1 + $0xb98] sm:$0xff] }
 0x71d   : > { %1344 = vmatpush.msrb.mxu0 %v1303_v62  ;;  %v1481_v62 = vld [vmem:[%s5439_s1 + $0x9e0] sm:$0xff] }
 0x71e   : > { %1500 = vmatpush.msrb.mxu3 %v1481_v62 }
 0x71f   : > { %1345 = vmatpush.msrb.mxu0 %v1302_v63  ;;  %v1480_v63 = vld [vmem:[%s5439_s1 + $0x9d8] sm:$0xff] }
 0x720   : > { %1501 = vmatpush.msrb.mxu3 %v1480_v63  ;;  %v1647_v63 = vld [vmem:[%s5439_s1 + $0xb90] sm:$0xff] }
 0x721   : > { %1346 = vmatpush.msrb.mxu0 %v1301_v2 }
 0x722   : > { %1502 = vmatpush.msrb.mxu3 %v1479_v5 }
 0x723   : > { %1347 = vmatpush.msrb.mxu0 %v1300_v4 }
 0x725   : > { %1348 = vmatpush.msrb.mxu0 %v1299_v6  ;;  %v1531_v6 = vld [vmem:[%s5439_s1 + $0xa68] sm:$0xff] }
 0x726   : > { %1550 = vmatpush.msrb.mxu1 %v1531_v6 }
 0x727   : > { %1349 = vmatpush.msrb.mxu0 %v1298_v10  ;;  %v1547_v10 = vld [vmem:[%s5439_s1 + $0xae8] sm:$0xff] }
 0x728   : > { %1551 = vmatpush.msrb.mxu1 %v1530_v7  ;;  %v1591_v7 = vld [vmem:[%s5439_s1 + $0x14c8] sm:$0x7] }
 0x729   : > { %1350 = vmatpush.msrb.mxu0 %v1297_v11  ;;  %v1546_v11 = vld [vmem:[%s5439_s1 + $0xae0] sm:$0xff] }
 0x72b   : > { %1570 = vmatpush.msra.mxu0 %v1547_v10  ;;  %v1642_v10 = vld [vmem:[%s5439_s1 + $0xb68] sm:$0xff] }
 0x72d   : > { %1571 = vmatpush.msra.mxu0 %v1546_v11  ;;  %v1641_v11 = vld [vmem:[%s5439_s1 + $0xb60] sm:$0xff] }
 0x787   : > { %v4092_v12 = vpop.f32.mrf.mxu0 }
 0x788   : > { %v1274_v13 = vrot.slane %v4092_v12, 6 }
 0x78a   : > { %v1276_v14 = vsel %vm263_vm8, 0.0, %v1274_v13  ;;  %v1545_v13 = vld [vmem:[%s5439_s1 + $0xad8] sm:$0xff] }
 0x78b   : > { %v1277_v15 = vsel %vm233_vm5, %v1276_v14, 0.0  ;;  %2815 = vmatmul.msk.f32.vlgmr.msra.gmra.mxu3 %vm233_vm5, %v1276_v14  ;;  %v1528_v14 = vld [vmem:[%s5439_s1 + $0xa50] sm:$0xff]  ;;  %1572 = vmatpush.msra.mxu0 %v1545_v13 }
 0x78c   : > { %v1279_v16 = vrot.slane %v1277_v15, 5  ;;  %v1544_v15 = vld [vmem:[%s5439_s1 + $0xad0] sm:$0xff] }
 0x78d   : > { %1573 = vmatpush.msra.mxu0 %v1544_v15  ;;  %v1639_v13 = vld [vmem:[%s5439_s1 + $0xb50] sm:$0xff]  ;;  %v1637_v15 = vld [vmem:[%s5439_s1 + $0xb40] sm:$0xff] }
 0x78e   : > { %1351 = vmatmul.f32.vlgmr.msrb.gmra.mxu0 %v1279_v16  ;;  %v1527_v16 = vld [vmem:[%s5439_s1 + $0xa48] sm:$0xff] }
 0x78f   : > { %1574 = vmatpush.msra.mxu0 %v1543_v18  ;;  %v1635_v18 = vld [vmem:[%s5439_s1 + $0xb30] sm:$0xff] }
 0x791   : > { %1575 = vmatpush.msra.mxu0 %v1542_v33  ;;  %v1633_v33 = vld [vmem:[%s5439_s1 + $0xb20] sm:$0xff] }
 0x793   : > { %1576 = vmatpush.msra.mxu0 %v1541_v21  ;;  %v1631_v21 = vld [vmem:[%s5439_s1 + $0xb10] sm:$0xff] }
 0x795   : > { %1577 = vmatpush.msra.mxu0 %v1540_v25  ;;  %v1629_v25 = vld [vmem:[%s5439_s1 + $0xb00] sm:$0xff] }
 0x797   : > { %1578 = vmatpush.msra.mxu0 %v1539_v27  ;;  %v1628_v27 = vld [vmem:[%s5439_s1 + $0xaf8] sm:$0xff] }
 0x80b   : > { %v1352_v35 = vpop.f32.mrf.mxu0 }
 0x80e   : > { %v1332_v31 = vpop.f32.mrf.mxu3 }
 0x80f   : > { %v1333_v34 = vadd.f32 %v2927_v29, %v1332_v31  ;;  %v1538_v29 = vld [vmem:[%s5439_s1 + $0xaa0] sm:$0xff]  ;;  %v1520_v31 = vld [vmem:[%s5439_s1 + $0xa10] sm:$0xff] }
 0x810   : > { %1579 = vmatpush.msra.mxu0 %v1538_v29  ;;  %v1627_v29 = vld [vmem:[%s5439_s1 + $0xaf0] sm:$0xff] }
 0x811   : > { %v1353_v37 = vadd.f32 %v1352_v35, %v1333_v34  ;;  %v1537_v35 = vld [vmem:[%s5439_s1 + $0xa98] sm:$0xff] }
 0x812   : > { %1580 = vmatpush.msra.mxu0 %v1537_v35  ;;  %v1738_v35 = vld [vmem:[%s5439_s1 + $0xc60] sm:$0xff] }
 0x813   : > { %v1355_v43 = vmax.f32 %v1353_v37, 0.0  ;;  %v1536_v37 = vld [vmem:[%s5439_s1 + $0xa90] sm:$0xff] }
 0x814   : > { %1581 = vmatpush.msra.mxu0 %v1536_v37  ;;  %v1771_v37 = vld [vmem:[%s5439_s1 + $0xd68] sm:$0xff] }
 0x815   : > { %v1357_v44 = vrot.slane %v1355_v43, 7  ;;  %v1535_v43 = vld [vmem:[%s5439_s1 + $0xa88] sm:$0xff] }
 0x816   : > { %1582 = vmatpush.msra.mxu0 %v1535_v43  ;;  %v1737_v43 = vld [vmem:[%s5439_s1 + $0xc58] sm:$0xff] }
 0x817   : > { %v1359_v45 = vsel %vm275_vm6, 0.0, %v1357_v44  ;;  %v1534_v44 = vld [vmem:[%s5439_s1 + $0xa80] sm:$0xff] }
 0x818   : > { %v1360_v46 = vsel %vm206_vm4, %v1359_v45, 0.0  ;;  %1583 = vmatpush.msra.mxu0 %v1534_v44  ;;  %v1516_v45 = vld [vmem:[%s5439_s1 + $0x9f0] sm:$0xff]  ;;  %v1770_v44 = vld [vmem:[%s5439_s1 + $0xd60] sm:$0xff] }
 0x819   : > { %v1362_v8 = vrot.slane %v1360_v46, 1 }
 0x81b   : > { %1363 = vrot.lane.b32.xlu1 %v1362_v8, %s2952_s18  ;;  %v1532_v8 = vld [vmem:[%s5439_s1 + $0xa70] sm:$0xff] }
 0x88d   : > { %v1364_v50 = vpop.permute.xlu1 %1363 }
 0x88e   : > { %v1367_v51 = vsel %vm1366_vm12, %v1360_v46, %v1364_v50  ;;  %v1533_v46 = vld [vmem:[%s5439_s1 + $0xa78] sm:$0xff] }
 0x88f   : > { %2816 = vmatmul.msk.f32.vlgmr.msrb.gmra.mxu2 %vm287_vm9, %v1367_v51  ;;  %1584 = vmatpush.msra.mxu0 %v1533_v46  ;;  %v1753_v46 = vld [vmem:[%s5439_s1 + $0xcd8] sm:$0xff] }
 0x891   : > { %1585 = vmatpush.msra.mxu0 %v1532_v8  ;;  %v1769_v8 = vld [vmem:[%s5439_s1 + $0xd58] sm:$0xff] }
 0x897   : > { %1431 = vmatmul.f32.vlgmr.msra.gmra.mxu2 %v4092_v12  ;;  %v1529_v12 = vld [vmem:[%s5439_s1 + $0xa58] sm:$0xff] }
 0x898   : > { %1552 = vmatpush.msrb.mxu1 %v1529_v12  ;;  %v1640_v12 = vld [vmem:[%s5439_s1 + $0xb58] sm:$0xff] }
 0x89a   : > { %1553 = vmatpush.msrb.mxu1 %v1528_v14  ;;  %v1638_v14 = vld [vmem:[%s5439_s1 + $0xb48] sm:$0xff] }
 0x89c   : > { %1554 = vmatpush.msrb.mxu1 %v1527_v16  ;;  %v1636_v16 = vld [vmem:[%s5439_s1 + $0xb38] sm:$0xff] }
 0x89e   : > { %1555 = vmatpush.msrb.mxu1 %v1526_v19  ;;  %v1634_v19 = vld [vmem:[%s5439_s1 + $0xb28] sm:$0xff] }
 0x8a0   : > { %1556 = vmatpush.msrb.mxu1 %v1525_v20  ;;  %v1632_v20 = vld [vmem:[%s5439_s1 + $0xb18] sm:$0xff] }
 0x8a2   : > { %1557 = vmatpush.msrb.mxu1 %v1524_v24  ;;  %v1630_v24 = vld [vmem:[%s5439_s1 + $0xb08] sm:$0xff] }
 0x8a4   : > { %1558 = vmatpush.msrb.mxu1 %v1523_v26  ;;  %v1646_v26 = vld [vmem:[%s5439_s1 + $0xb88] sm:$0xff] }
 0x8a6   : > { %1559 = vmatpush.msrb.mxu1 %v1522_v28  ;;  %v1645_v28 = vld [vmem:[%s5439_s1 + $0xb80] sm:$0xff] }
 0x8a8   : > { %1560 = vmatpush.msrb.mxu1 %v1521_v30  ;;  %v1644_v30 = vld [vmem:[%s5439_s1 + $0xb78] sm:$0xff] }
 0x8aa   : > { %1561 = vmatpush.msrb.mxu1 %v1520_v31  ;;  %v1643_v31 = vld [vmem:[%s5439_s1 + $0xb70] sm:$0xff] }
 0x8ac   : > { %1562 = vmatpush.msrb.mxu1 %v1519_v36  ;;  %v1755_v36 = vld [vmem:[%s5439_s1 + $0xce8] sm:$0xff] }
 0x8ad   : > { %1874 = vmatpush.msrb.mxu0 %v1755_v36 }
 0x8ae   : > { %1563 = vmatpush.msrb.mxu1 %v1518_v0  ;;  %v1787_v0 = vld [vmem:[%s5439_s1 + $0xde8] sm:$0xff] }
 0x8b0   : > { %1564 = vmatpush.msrb.mxu1 %v1517_v1  ;;  %v1754_v1 = vld [vmem:[%s5439_s1 + $0xce0] sm:$0xff] }
 0x8b1   : > { %1875 = vmatpush.msrb.mxu0 %v1754_v1  ;;  %v1803_v1 = vld [vmem:[%s5439_s1 + $0xe68] sm:$0xff] }
 0x8b2   : > { %1565 = vmatpush.msrb.mxu1 %v1516_v45  ;;  %v1786_v45 = vld [vmem:[%s5439_s1 + $0xde0] sm:$0xff] }
 0x8b3   : > { %1876 = vmatpush.msrb.mxu0 %v1753_v46  ;;  %v1740_v46 = vld [vmem:[%s5439_s1 + $0xc70] sm:$0xff] }
 0x912   : > { %v1394_v52 = vpop.f32.mrf.mxu2 }
 0x913   : > { %v1395_v41 = vadd.f32 %v2928_v53, %v1394_v52  ;;  %v1658_v53 = vld [vmem:[%s5439_s1 + $0xbe8] sm:$0xff] }
 0x91a   : > { %v1432_v54 = vpop.f32.mrf.mxu2 }
 0x91b   : > { %v1433_v55 = vadd.f32 %v2929_v17, %v1432_v54  ;;  %v1657_v17 = vld [vmem:[%s5439_s1 + $0xbe0] sm:$0xff]  ;;  %v1656_v54 = vld [vmem:[%s5439_s1 + $0xbd8] sm:$0xff] }
 0x91d   : > { %v1435_v56 = vadd.f32 %v1433_v55, %v1395_v41  ;;  %v1655_v41 = vld [vmem:[%s5439_s1 + $0xbd0] sm:$0xff]  ;;  %v1654_v55 = vld [vmem:[%s5439_s1 + $0xbc8] sm:$0xff] }
 0x91f   : > { %v1436_v42 = vmax.f32 %v1435_v56, 0.0  ;;  %v1653_v56 = vld [vmem:[%s5439_s1 + $0xbc0] sm:$0xff] }
 0x921   : > { %v1438_v57 = vrot.slane %v1436_v42, 7  ;;  %v1652_v42 = vld [vmem:[%s5439_s1 + $0xbb8] sm:$0xff] }
 0x923   : > { %v1440_v58 = vsel %vm275_vm6, 0.0, %v1438_v57  ;;  %v1651_v57 = vld [vmem:[%s5439_s1 + $0xbb0] sm:$0xff] }
 0x924   : > { %v1442_v59 = vrot.slane %v1440_v58, 1 }
 0x926   : > { %v1444_v60 = vmax.f32 %v1440_v58, %v1442_v59  ;;  %v1650_v58 = vld [vmem:[%s5439_s1 + $0xba8] sm:$0xff]  ;;  %v2930_v59 = vld [vmem:[%s5439_s1 + $0x14f5] ss:$0 sm:$0xff] }
 0x928   : > { %2817 = vmatpush.msk.msrb.mxu2 %vm206_vm4, %v1444_v60  ;;  %v1649_v60 = vld [vmem:[%s5439_s1 + $0xba0] sm:$0xff] }
 0x929   : > { %2818 = vmatmul.msk.f32.vlgmr.msrb.gmra.mxu2 %vm1446_vm13, %v1445_v61 }
 0x92a   : > { %1681 = vmatpush.msra.mxu2 %v1658_v53  ;;  %v1734_v53 = vld [vmem:[%s5439_s1 + $0xc40] sm:$0xff] }
 0x92c   : > { %1682 = vmatpush.msra.mxu2 %v1657_v17  ;;  %v1783_v17 = vld [vmem:[%s5439_s1 + $0xdc8] sm:$0xff] }
 0x92e   : > { %1683 = vmatpush.msra.mxu2 %v1656_v54  ;;  %v1750_v54 = vld [vmem:[%s5439_s1 + $0xcc0] sm:$0xff] }
 0x930   : > { %1684 = vmatpush.msra.mxu2 %v1655_v41  ;;  %v1766_v41 = vld [vmem:[%s5439_s1 + $0xd40] sm:$0xff] }
 0x932   : > { %1685 = vmatpush.msra.mxu2 %v1654_v55  ;;  %v1733_v55 = vld [vmem:[%s5439_s1 + $0xc38] sm:$0xff] }
 0x934   : > { %1686 = vmatpush.msra.mxu2 %v1653_v56  ;;  %v1782_v56 = vld [vmem:[%s5439_s1 + $0xdc0] sm:$0xff] }
 0x936   : > { %1687 = vmatpush.msra.mxu2 %v1652_v42  ;;  %v1749_v42 = vld [vmem:[%s5439_s1 + $0xcb8] sm:$0xff] }
 0x938   : > { %1688 = vmatpush.msra.mxu2 %v1651_v57  ;;  %v1765_v57 = vld [vmem:[%s5439_s1 + $0xd38] sm:$0xff] }
 0x93a   : > { %1689 = vmatpush.msra.mxu2 %v1650_v58  ;;  %v1732_v58 = vld [vmem:[%s5439_s1 + $0xc30] sm:$0xff] }
 0x93c   : > { %1690 = vmatpush.msra.mxu2 %v1649_v60  ;;  %v1748_v60 = vld [vmem:[%s5439_s1 + $0xcb0] sm:$0xff] }
 0x93e   : > { %1691 = vmatpush.msra.mxu2 %v1648_v23  ;;  %v1731_v23 = vld [vmem:[%s5439_s1 + $0xc28] sm:$0xff] }
 0x940   : > { %1692 = vmatpush.msra.mxu2 %v1647_v63  ;;  %v1747_v63 = vld [vmem:[%s5439_s1 + $0xca8] sm:$0xff] }
 0x942   : > { %1693 = vmatpush.msra.mxu2 %v1646_v26  ;;  %v1775_v26 = vld [vmem:[%s5439_s1 + $0xd88] sm:$0xff] }
 0x944   : > { %1694 = vmatpush.msra.mxu2 %v1645_v28  ;;  %v1742_v28 = vld [vmem:[%s5439_s1 + $0xc80] sm:$0xff] }
 0x946   : > { %1695 = vmatpush.msra.mxu2 %v1644_v30 }
 0x948   : > { %1696 = vmatpush.msra.mxu2 %v1643_v31  ;;  %v1725_v31 = vld [vmem:[%s5439_s1 + $0xbf8] sm:$0xff] }
 0x94a   : > { %1914 = vmatpush.msrb.mxu2 %v1787_v0  ;;  %v1757_v0 = vld [vmem:[%s5439_s1 + $0xcf8] sm:$0xff] }
 0x94c   : > { %1915 = vmatpush.msrb.mxu2 %v1786_v45  ;;  %v1773_v45 = vld [vmem:[%s5439_s1 + $0xd78] sm:$0xff] }
 0x9ac   : > { %v4187_v2 = vpop.f32.mrf.mxu2 }
 0x9ad   : > { %v1474_v4 = vrot.slane %v4187_v2, 1 }
 0x9af   : > { %1475 = vrot.lane.b32.xlu2 %v1474_v4, %s2952_s18 }
 0xa09   : > { %v1476_v32 = vpop.permute.xlu2 %1475 }
 0xa0a   : > { %v4262_v34 = vsel %vm1366_vm12, %v4187_v2, %v1476_v32  ;;  %v1739_v32 = vld [vmem:[%s5439_s1 + $0xc68] sm:$0xff] }
 0xa0b   : > { %2819 = vmatmul.msk.f32.vlgmr.msrb.gmra.mxu3 %vm287_vm9, %v4262_v34  ;;  %1854 = vmatpush.msra.mxu1 %v1739_v32  ;;  %v1774_v32 = vld [vmem:[%s5439_s1 + $0xd80] sm:$0xff] }
 0xa0d   : > { %1855 = vmatpush.msra.mxu1 %v1738_v35  ;;  %v1741_v35 = vld [vmem:[%s5439_s1 + $0xc78] sm:$0xff] }
 0xa0f   : > { %1856 = vmatpush.msra.mxu1 %v1737_v43 }
 0xa8e   : > { %v1504_v48 = vpop.f32.mrf.mxu3 }
 0xa8f   : > { %v1505_v49 = vadd.f32 %v1504_v48, %v1483_v47  ;;  %v1736_v47 = vld [vmem:[%s5439_s1 + $0xc50] sm:$0xff]  ;;  %v1785_v48 = vld [vmem:[%s5439_s1 + $0xdd8] sm:$0xff] }
 0xa90   : > { %1857 = vmatpush.msra.mxu1 %v1736_v47  ;;  %1916 = vmatpush.msrb.mxu2 %v1785_v48  ;;  %v1802_v47 = vld [vmem:[%s5439_s1 + $0xe60] sm:$0xff]  ;;  %v1772_v48 = vld [vmem:[%s5439_s1 + $0xd70] sm:$0xff] }
 0xa91   : > { %v1507_v40 = vmax.f32 %v1505_v49, 0.0  ;;  %v1752_v49 = vld [vmem:[%s5439_s1 + $0xcd0] sm:$0xff] }
 0xa92   : > { %1877 = vmatpush.msrb.mxu0 %v1752_v49  ;;  %v1819_v49 = vld [vmem:[%s5439_s1 + $0xee8] sm:$0xff] }
 0xa93   : > { %v1509_v9 = vrot.slane %v1507_v40, 5  ;;  %v1768_v40 = vld [vmem:[%s5439_s1 + $0xd50] sm:$0xff] }
 0xa95   : > { %v1511_v50 = vsel %vm206_vm4, 0.0, %v1509_v9  ;;  %v1735_v9 = vld [vmem:[%s5439_s1 + $0xc48] sm:$0xff] }
 0xa96   : > { %v1512_v51 = vsel %vm198_vm3, %v1511_v50, 0.0  ;;  %2820 = vmatmul.msk.f32.vlgmr.msrb.gmra.mxu1 %vm198_vm3, %v1511_v50  ;;  %v1784_v50 = vld [vmem:[%s5439_s1 + $0xdd0] sm:$0xff] }
 0xa97   : > { %v1514_v52 = vrot.slane %v1512_v51, 5  ;;  %v1751_v51 = vld [vmem:[%s5439_s1 + $0xcc8] sm:$0xff]  ;;  %1858 = vmatpush.msra.mxu1 %v1735_v9  ;;  %1917 = vmatpush.msrb.mxu2 %v1784_v50  ;;  %v1801_v50 = vld [vmem:[%s5439_s1 + $0xe58] sm:$0xff] }
 0xa98   : > { %1878 = vmatpush.msrb.mxu0 %v1751_v51  ;;  %v1851_v9 = vld [vmem:[%s5439_s1 + $0xfe8] sm:$0xff]  ;;  %v1818_v51 = vld [vmem:[%s5439_s1 + $0xee0] sm:$0xff] }
 0xa99   : > { %1586 = vmatmul.f32.vlgmr.msra.gmra.mxu0 %v1514_v52  ;;  %v1767_v52 = vld [vmem:[%s5439_s1 + $0xd48] sm:$0xff]  ;;  %1859 = vmatpush.msra.mxu1 %v1734_v53  ;;  %v1850_v53 = vld [vmem:[%s5439_s1 + $0xfe0] sm:$0xff] }
 0xa9a   : > { %1918 = vmatpush.msrb.mxu2 %v1783_v17  ;;  %1879 = vmatpush.msrb.mxu0 %v1750_v54  ;;  %v1800_v17 = vld [vmem:[%s5439_s1 + $0xe50] sm:$0xff]  ;;  %v1817_v54 = vld [vmem:[%s5439_s1 + $0xed8] sm:$0xff] }
 0xa9b   : > { %1860 = vmatpush.msra.mxu1 %v1733_v55  ;;  %v1849_v55 = vld [vmem:[%s5439_s1 + $0xfd8] sm:$0xff] }
 0xa9c   : > { %1919 = vmatpush.msrb.mxu2 %v1782_v56  ;;  %1880 = vmatpush.msrb.mxu0 %v1749_v42  ;;  %v1799_v56 = vld [vmem:[%s5439_s1 + $0xe48] sm:$0xff]  ;;  %v1816_v42 = vld [vmem:[%s5439_s1 + $0xed0] sm:$0xff] }
 0xa9d   : > { %1861 = vmatpush.msra.mxu1 %v1732_v58  ;;  %v1848_v58 = vld [vmem:[%s5439_s1 + $0xfd0] sm:$0xff] }
 0xa9e   : > { %1881 = vmatpush.msrb.mxu0 %v1748_v60  ;;  %v1815_v60 = vld [vmem:[%s5439_s1 + $0xec8] sm:$0xff] }
 0xa9f   : > { %1862 = vmatpush.msra.mxu1 %v1731_v23  ;;  %v1847_v23 = vld [vmem:[%s5439_s1 + $0xfc8] sm:$0xff] }
 0xaa0   : > { %1882 = vmatpush.msrb.mxu0 %v1747_v63  ;;  %v1814_v63 = vld [vmem:[%s5439_s1 + $0xec0] sm:$0xff] }
 0xb13   : > { %v1567_v61 = vpop.f32.mrf.mxu1 }
 0xb14   : > { %v1568_v62 = vadd.f32 %v2930_v59, %v1567_v61  ;;  %v1781_v59 = vld [vmem:[%s5439_s1 + $0xdb8] sm:$0xff]  ;;  %v1764_v61 = vld [vmem:[%s5439_s1 + $0xd30] sm:$0xff] }
 0xb15   : > { %1920 = vmatpush.msrb.mxu2 %v1781_v59  ;;  %v1798_v59 = vld [vmem:[%s5439_s1 + $0xe40] sm:$0xff] }
 0xb16   : > { %v1587_v4 = vpop.f32.mrf.mxu0 }
 0xb17   : > { %v1588_v5 = vadd.f32 %v1587_v4, %v1568_v62  ;;  %v1780_v62 = vld [vmem:[%s5439_s1 + $0xdb0] sm:$0xff]  ;;  %v1763_v4 = vld [vmem:[%s5439_s1 + $0xd28] sm:$0xff] }
 0xb18   : > { %1921 = vmatpush.msrb.mxu2 %v1780_v62  ;;  %v1797_v62 = vld [vmem:[%s5439_s1 + $0xe38] sm:$0xff] }
 0xb19   : > { %v1590_v6 = vmax.f32 %v1588_v5, 0.0  ;;  %v1730_v5 = vld [vmem:[%s5439_s1 + $0xc20] sm:$0xff] }
 0xb1a   : > { %1863 = vmatpush.msra.mxu1 %v1730_v5  ;;  %v1846_v5 = vld [vmem:[%s5439_s1 + $0xfc0] sm:$0xff] }
 0xb1b   : > { %2821 = vmatpush.msk.msra.mxu3 %vm263_vm8, %v1590_v6  ;;  %v1779_v6 = vld [vmem:[%s5439_s1 + $0xda8] sm:$0xff] }
 0xb1c   : > { %2822 = vmatmul.msk.f32.vlgmr.msra.gmra.mxu3 %vm1592_vm14, %v1591_v7  ;;  %v1746_v7 = vld [vmem:[%s5439_s1 + $0xca0] sm:$0xff]  ;;  %1922 = vmatpush.msrb.mxu2 %v1779_v6  ;;  %v1796_v6 = vld [vmem:[%s5439_s1 + $0xe30] sm:$0xff] }
 0xb1d   : > { %1661 = vmatpush.msrb.mxu3 %v1642_v10  ;;  %v1762_v10 = vld [vmem:[%s5439_s1 + $0xd20] sm:$0xff]  ;;  %1883 = vmatpush.msrb.mxu0 %v1746_v7  ;;  %v1813_v7 = vld [vmem:[%s5439_s1 + $0xeb8] sm:$0xff] }
 0xb1f   : > { %1662 = vmatpush.msrb.mxu3 %v1641_v11  ;;  %v1729_v11 = vld [vmem:[%s5439_s1 + $0xc18] sm:$0xff] }
 0xb20   : > { %1864 = vmatpush.msra.mxu1 %v1729_v11  ;;  %v1845_v11 = vld [vmem:[%s5439_s1 + $0xfb8] sm:$0xff] }
 0xb21   : > { %1663 = vmatpush.msrb.mxu3 %v1640_v12  ;;  %v1778_v12 = vld [vmem:[%s5439_s1 + $0xda0] sm:$0xff] }
 0xb22   : > { %1923 = vmatpush.msrb.mxu2 %v1778_v12  ;;  %v1795_v12 = vld [vmem:[%s5439_s1 + $0xe28] sm:$0xff] }
 0xb23   : > { %1664 = vmatpush.msrb.mxu3 %v1639_v13  ;;  %v1745_v13 = vld [vmem:[%s5439_s1 + $0xc98] sm:$0xff] }
 0xb24   : > { %1884 = vmatpush.msrb.mxu0 %v1745_v13  ;;  %v1812_v13 = vld [vmem:[%s5439_s1 + $0xeb0] sm:$0xff] }
 0xb25   : > { %1665 = vmatpush.msrb.mxu3 %v1638_v14  ;;  %v1761_v14 = vld [vmem:[%s5439_s1 + $0xd18] sm:$0xff] }
 0xb27   : > { %1666 = vmatpush.msrb.mxu3 %v1637_v15  ;;  %v1728_v15 = vld [vmem:[%s5439_s1 + $0xc10] sm:$0xff] }
 0xb28   : > { %1865 = vmatpush.msra.mxu1 %v1728_v15  ;;  %v1844_v15 = vld [vmem:[%s5439_s1 + $0xfb0] sm:$0xff] }
 0xb29   : > { %1667 = vmatpush.msrb.mxu3 %v1636_v16  ;;  %v1777_v16 = vld [vmem:[%s5439_s1 + $0xd98] sm:$0xff] }
 0xb2a   : > { %1924 = vmatpush.msrb.mxu2 %v1777_v16  ;;  %v1794_v16 = vld [vmem:[%s5439_s1 + $0xe20] sm:$0xff] }
 0xb2b   : > { %1668 = vmatpush.msrb.mxu3 %v1635_v18  ;;  %v1744_v18 = vld [vmem:[%s5439_s1 + $0xc90] sm:$0xff] }
 0xb2c   : > { %1885 = vmatpush.msrb.mxu0 %v1744_v18  ;;  %v1811_v18 = vld [vmem:[%s5439_s1 + $0xea8] sm:$0xff] }
 0xb2d   : > { %1669 = vmatpush.msrb.mxu3 %v1634_v19  ;;  %v1760_v19 = vld [vmem:[%s5439_s1 + $0xd10] sm:$0xff] }
 0xb2f   : > { %1670 = vmatpush.msrb.mxu3 %v1633_v33  ;;  %v1727_v33 = vld [vmem:[%s5439_s1 + $0xc08] sm:$0xff] }
 0xb30   : > { %1866 = vmatpush.msra.mxu1 %v1727_v33  ;;  %v1843_v33 = vld [vmem:[%s5439_s1 + $0xfa8] sm:$0xff] }
 0xb31   : > { %1671 = vmatpush.msrb.mxu3 %v1632_v20  ;;  %v1776_v20 = vld [vmem:[%s5439_s1 + $0xd90] sm:$0xff] }
 0xb32   : > { %1925 = vmatpush.msrb.mxu2 %v1776_v20  ;;  %v1793_v20 = vld [vmem:[%s5439_s1 + $0xe18] sm:$0xff] }
 0xb33   : > { %1672 = vmatpush.msrb.mxu3 %v1631_v21  ;;  %v1743_v21 = vld [vmem:[%s5439_s1 + $0xc88] sm:$0xff] }
 0xb34   : > { %1886 = vmatpush.msrb.mxu0 %v1743_v21  ;;  %1926 = vmatpush.msrb.mxu2 %v1775_v26  ;;  %v1810_v21 = vld [vmem:[%s5439_s1 + $0xea0] sm:$0xff]  ;;  %v1792_v26 = vld [vmem:[%s5439_s1 + $0xe10] sm:$0xff] }
 0xb35   : > { %1673 = vmatpush.msrb.mxu3 %v1630_v24  ;;  %v1759_v24 = vld [vmem:[%s5439_s1 + $0xd08] sm:$0xff] }
 0xb36   : > { %1887 = vmatpush.msrb.mxu0 %v1742_v28  ;;  %1927 = vmatpush.msrb.mxu2 %v1774_v32  ;;  %v1825_v28 = vld [vmem:[%s5439_s1 + $0xf18] sm:$0xff]  ;;  %v1824_v32 = vld [vmem:[%s5439_s1 + $0xf10] sm:$0xff] }
 0xb37   : > { %1674 = vmatpush.msrb.mxu3 %v1629_v25  ;;  %v1726_v25 = vld [vmem:[%s5439_s1 + $0xc00] sm:$0xff] }
 0xb38   : > { %1867 = vmatpush.msra.mxu1 %v1726_v25  ;;  %1888 = vmatpush.msrb.mxu0 %v1741_v35  ;;  %v1842_v25 = vld [vmem:[%s5439_s1 + $0xfa0] sm:$0xff]  ;;  %v1840_v35 = vld [vmem:[%s5439_s1 + $0xf90] sm:$0xff] }
 0xb39   : > { %1675 = vmatpush.msrb.mxu3 %v1628_v27  ;;  %1928 = vmatpush.msrb.mxu2 %v1773_v45  ;;  %v1822_v45 = vld [vmem:[%s5439_s1 + $0xf00] sm:$0xff] }
 0xb3a   : > { %1868 = vmatpush.msra.mxu1 %v1725_v31  ;;  %1889 = vmatpush.msrb.mxu0 %v1740_v46  ;;  %v1808_v31 = vld [vmem:[%s5439_s1 + $0xe90] sm:$0xff]  ;;  %v1838_v46 = vld [vmem:[%s5439_s1 + $0xf80] sm:$0xff] }
 0xb3b   : > { %1676 = vmatpush.msrb.mxu3 %v1627_v29  ;;  %v1758_v29 = vld [vmem:[%s5439_s1 + $0xd00] sm:$0xff]  ;;  %1929 = vmatpush.msrb.mxu2 %v1772_v48  ;;  %v1821_v48 = vld [vmem:[%s5439_s1 + $0xef8] sm:$0xff] }
 0xb3c   : > { %1954 = vmatpush.msra.mxu0 %v1819_v49  ;;  %v1837_v49 = vld [vmem:[%s5439_s1 + $0xf78] sm:$0xff] }
 0xb3d   : > { %1894 = vmatpush.msra.mxu3 %v1771_v37  ;;  %v1724_v37 = vld [vmem:[%s5439_s1 + $0xbf0] sm:$0xff] }
 0xb3e   : > { %1869 = vmatpush.msra.mxu1 %v1724_v37  ;;  %1955 = vmatpush.msra.mxu0 %v1818_v51  ;;  %v1807_v37 = vld [vmem:[%s5439_s1 + $0xe88] sm:$0xff]  ;;  %v2931_v51 = vld [vmem:[%s5439_s1 + $0x14f6] ss:$0 sm:$0xff] }
 0xb3f   : > { %1895 = vmatpush.msra.mxu3 %v1770_v44 }
 0xb40   : > { %1934 = vmatpush.msrb.mxu1 %v1803_v1  ;;  %1956 = vmatpush.msra.mxu0 %v1817_v54  ;;  %v1789_v1 = vld [vmem:[%s5439_s1 + $0xdf8] sm:$0xff] }
 0xb41   : > { %1896 = vmatpush.msra.mxu3 %v1769_v8  ;;  %v1756_v8 = vld [vmem:[%s5439_s1 + $0xcf0] sm:$0xff] }
 0xb42   : > { %1935 = vmatpush.msrb.mxu1 %v1802_v47  ;;  %1957 = vmatpush.msra.mxu0 %v1816_v42  ;;  %v1805_v47 = vld [vmem:[%s5439_s1 + $0xe78] sm:$0xff] }
 0xb43   : > { %1897 = vmatpush.msra.mxu3 %v1768_v40  ;;  %v1835_v40 = vld [vmem:[%s5439_s1 + $0xf68] sm:$0xff] }
 0xb44   : > { %1936 = vmatpush.msrb.mxu1 %v1801_v50  ;;  %1958 = vmatpush.msra.mxu0 %v1815_v60  ;;  %v1836_v50 = vld [vmem:[%s5439_s1 + $0xf70] sm:$0xff] }
 0xb45   : > { %1898 = vmatpush.msra.mxu3 %v1767_v52  ;;  %v1834_v52 = vld [vmem:[%s5439_s1 + $0xf60] sm:$0xff] }
 0xb46   : > { %1937 = vmatpush.msrb.mxu1 %v1800_v17  ;;  %1959 = vmatpush.msra.mxu0 %v1814_v63 }
 0xb47   : > { %1899 = vmatpush.msra.mxu3 %v1766_v41  ;;  %v1833_v41 = vld [vmem:[%s5439_s1 + $0xf58] sm:$0xff] }
 0xb48   : > { %1938 = vmatpush.msrb.mxu1 %v1799_v56  ;;  %1960 = vmatpush.msra.mxu0 %v1813_v7  ;;  %v2932_v7 = vld [vmem:[%s5439_s1 + $0x14f7] ss:$0 sm:$0xff] }
 0xb49   : > { %1900 = vmatpush.msra.mxu3 %v1765_v57  ;;  %v1832_v57 = vld [vmem:[%s5439_s1 + $0xf50] sm:$0xff] }
 0xb4a   : > { %1939 = vmatpush.msrb.mxu1 %v1798_v59  ;;  %1961 = vmatpush.msra.mxu0 %v1812_v13  ;;  %v2038_v13 = vld [vmem:[%s5439_s1 + $0x1048] sm:$0xff] }
 0xb4b   : > { %1901 = vmatpush.msra.mxu3 %v1764_v61  ;;  %v1831_v61 = vld [vmem:[%s5439_s1 + $0xf48] sm:$0xff] }
 0xb4c   : > { %1940 = vmatpush.msrb.mxu1 %v1797_v62  ;;  %1962 = vmatpush.msra.mxu0 %v1811_v18  ;;  %v2036_v18 = vld [vmem:[%s5439_s1 + $0x1038] sm:$0xff] }
 0xb4d   : > { %1902 = vmatpush.msra.mxu3 %v1763_v4  ;;  %v1830_v4 = vld [vmem:[%s5439_s1 + $0xf40] sm:$0xff] }
 0xb4e   : > { %1941 = vmatpush.msrb.mxu1 %v1796_v6  ;;  %1963 = vmatpush.msra.mxu0 %v1810_v21  ;;  %v2041_v6 = vld [vmem:[%s5439_s1 + $0x1060] sm:$0xff] }
 0xb4f   : > { %1903 = vmatpush.msra.mxu3 %v1762_v10  ;;  %v1829_v10 = vld [vmem:[%s5439_s1 + $0xf38] sm:$0xff] }
 0xb50   : > { %1942 = vmatpush.msrb.mxu1 %v1795_v12 }
 0xb51   : > { %1904 = vmatpush.msra.mxu3 %v1761_v14  ;;  %v1828_v14 = vld [vmem:[%s5439_s1 + $0xf30] sm:$0xff] }
 0xb52   : > { %1943 = vmatpush.msrb.mxu1 %v1794_v16 }
 0xb53   : > { %1905 = vmatpush.msra.mxu3 %v1760_v19  ;;  %v1827_v19 = vld [vmem:[%s5439_s1 + $0xf28] sm:$0xff] }
 0xb54   : > { %1944 = vmatpush.msrb.mxu1 %v1793_v20  ;;  %v2035_v20 = vld [vmem:[%s5439_s1 + $0x1030] sm:$0xff] }
 0xb55   : > { %1906 = vmatpush.msra.mxu3 %v1759_v24  ;;  %v1826_v24 = vld [vmem:[%s5439_s1 + $0xf20] sm:$0xff] }
 0xb56   : > { %1945 = vmatpush.msrb.mxu1 %v1792_v26 }
 0xb57   : > { %1907 = vmatpush.msra.mxu3 %v1758_v29  ;;  %v1841_v29 = vld [vmem:[%s5439_s1 + $0xf98] sm:$0xff] }
 0xb59   : > { %1908 = vmatpush.msra.mxu3 %v1757_v0  ;;  %v1823_v0 = vld [vmem:[%s5439_s1 + $0xf08] sm:$0xff] }
 0xb5b   : > { %1909 = vmatpush.msra.mxu3 %v1756_v8  ;;  %v1788_v8 = vld [vmem:[%s5439_s1 + $0xdf0] sm:$0xff] }
 0xb9f   : > { %v1616_v27 = vpop.f32.mrf.mxu3 }
 0xba0   : > { %v1620_v30 = vrot.slane %v1616_v27, 7  ;;  %v1809_v27 = vld [vmem:[%s5439_s1 + $0xe98] sm:$0xff] }
 0xba1   : > { %1964 = vmatpush.msra.mxu0 %v1809_v27 }
 0xba2   : > { %v1622_v36 = vsel %vm275_vm6, 0.0, %v1620_v30  ;;  %v1791_v30 = vld [vmem:[%s5439_s1 + $0xe08] sm:$0xff] }
 0xba3   : > { %v1623_v43 = vsel %vm198_vm3, %v1622_v36, 0.0  ;;  %2823 = vmatmul.msk.f32.vlgmr.msrb.gmra.mxu3 %vm198_vm3, %v1622_v36  ;;  %1946 = vmatpush.msrb.mxu1 %v1791_v30  ;;  %v1790_v36 = vld [vmem:[%s5439_s1 + $0xe00] sm:$0xff] }
 0xba4   : > { %v1625_v44 = vrot.slane %v1623_v43, 1  ;;  %1974 = vmatpush.msrb.mxu3 %v1835_v40  ;;  %1965 = vmatpush.msra.mxu0 %v1808_v31  ;;  %v1839_v43 = vld [vmem:[%s5439_s1 + $0xf88] sm:$0xff]  ;;  %v1804_v40 = vld [vmem:[%s5439_s1 + $0xe70] sm:$0xff]  ;;  %v2032_v31 = vld [vmem:[%s5439_s1 + $0x1018] sm:$0xff] }
 0xba5   : > { %1947 = vmatpush.msrb.mxu1 %v1790_v36  ;;  %v2031_v36 = vld [vmem:[%s5439_s1 + $0x1010] sm:$0xff] }
 0xba6   : > { %1697 = vmatmul.f32.vlgmr.msra.gmra.mxu2 %v1625_v44  ;;  %1975 = vmatpush.msrb.mxu3 %v1834_v52  ;;  %v1806_v44 = vld [vmem:[%s5439_s1 + $0xe80] sm:$0xff] }
 0xba7   : > { %1994 = vmatpush.msra.mxu2 %v1851_v9  ;;  %1966 = vmatpush.msra.mxu0 %v1807_v37  ;;  %v1820_v9 = vld [vmem:[%s5439_s1 + $0xef0] sm:$0xff] }
 0xba8   : > { %1976 = vmatpush.msrb.mxu3 %v1833_v41  ;;  %1948 = vmatpush.msrb.mxu1 %v1789_v1  ;;  %v2029_v1 = vld [vmem:[%s5439_s1 + $0x1000] sm:$0xff] }
 0xba9   : > { %1995 = vmatpush.msra.mxu2 %v1850_v53  ;;  %1967 = vmatpush.msra.mxu0 %v1806_v44 }
 0xbaa   : > { %1977 = vmatpush.msrb.mxu3 %v1832_v57  ;;  %1949 = vmatpush.msrb.mxu1 %v1788_v8 }
 0xbab   : > { %1996 = vmatpush.msra.mxu2 %v1849_v55  ;;  %1968 = vmatpush.msra.mxu0 %v1805_v47 }
 0xbac   : > { %1978 = vmatpush.msrb.mxu3 %v1831_v61 }
 0xbad   : > { %1997 = vmatpush.msra.mxu2 %v1848_v58  ;;  %1969 = vmatpush.msra.mxu0 %v1804_v40 }
 0xbae   : > { %1979 = vmatpush.msrb.mxu3 %v1830_v4 }
 0xbaf   : > { %1998 = vmatpush.msra.mxu2 %v1847_v23 }
 0xbb0   : > { %1980 = vmatpush.msrb.mxu3 %v1829_v10  ;;  %v2040_v10 = vld [vmem:[%s5439_s1 + $0x1058] sm:$0xff] }
 0xbb1   : > { %1999 = vmatpush.msra.mxu2 %v1846_v5  ;;  %v2042_v5 = vld [vmem:[%s5439_s1 + $0x1068] sm:$0xff] }
 0xbb2   : > { %1981 = vmatpush.msrb.mxu3 %v1828_v14  ;;  %v2037_v14 = vld [vmem:[%s5439_s1 + $0x1040] sm:$0xff] }
 0xbb3   : > { %2000 = vmatpush.msra.mxu2 %v1845_v11 }
 0xbb4   : > { %1982 = vmatpush.msrb.mxu3 %v1827_v19 }
 0xbb5   : > { %2001 = vmatpush.msra.mxu2 %v1844_v15 }
 0xbb6   : > { %1983 = vmatpush.msrb.mxu3 %v1826_v24 }
 0xbb7   : > { %2002 = vmatpush.msra.mxu2 %v1843_v33 }
 0xbb8   : > { %1984 = vmatpush.msrb.mxu3 %v1825_v28  ;;  %v2033_v28 = vld [vmem:[%s5439_s1 + $0x1020] sm:$0xff] }
 0xbb9   : > { %2003 = vmatpush.msra.mxu2 %v1842_v25  ;;  %v2034_v25 = vld [vmem:[%s5439_s1 + $0x1028] sm:$0xff] }
 0xbba   : > { %1985 = vmatpush.msrb.mxu3 %v1824_v32 }
 0xbbb   : > { %2004 = vmatpush.msra.mxu2 %v1841_v29 }
 0xbbc   : > { %1986 = vmatpush.msrb.mxu3 %v1823_v0  ;;  %v2030_v0 = vld [vmem:[%s5439_s1 + $0x1008] sm:$0xff] }
 0xbbd   : > { %2005 = vmatpush.msra.mxu2 %v1840_v35 }
 0xbbe   : > { %1987 = vmatpush.msrb.mxu3 %v1822_v45  ;;  %v2028_v45 = vld [vmem:[%s5439_s1 + $0xff8] sm:$0xff] }
 0xbbf   : > { %2006 = vmatpush.msra.mxu2 %v1839_v43 }
 0xbc0   : > { %1988 = vmatpush.msrb.mxu3 %v1821_v48 }
 0xbc1   : > { %2007 = vmatpush.msra.mxu2 %v1838_v46 }
 0xbc2   : > { %1989 = vmatpush.msrb.mxu3 %v1820_v9 }
 0xbc3   : > { %2008 = vmatpush.msra.mxu2 %v1837_v49  ;;  %v2027_v49 = vld [vmem:[%s5439_s1 + $0xff0] sm:$0xff] }
 0xbc5   : > { %2009 = vmatpush.msra.mxu2 %v1836_v50  ;;  %v2933_v50 = vld [vmem:[%s5439_s1 + $0x14f8] ss:$0 sm:$0xff] }
 0xc26   : > { %v1678_v52 = vpop.f32.mrf.mxu3 }
 0xc27   : > { %v1679_v53 = vadd.f32 %v2931_v51, %v1678_v52 }
 0xc29   : > { %v1698_v17 = vpop.f32.mrf.mxu2 }
 0xc2a   : > { %v1699_v54 = vadd.f32 %v1698_v17, %v1679_v53  ;;  %v2120_v17 = vld [vmem:[%s5439_s1 + $0x10e8] sm:$0xff] }
 0xc2c   : > { %v1701_v41 = vmax.f32 %v1699_v54, 0.0  ;;  %v2119_v54 = vld [vmem:[%s5439_s1 + $0x10e0] sm:$0xff] }
 0xc2e   : > { %v1703_v55 = vrot.slane %v1701_v41, 5  ;;  %v2118_v41 = vld [vmem:[%s5439_s1 + $0x10d8] sm:$0xff] }
 0xc30   : > { %v1705_v56 = vsel %vm206_vm4, 0.0, %v1703_v55  ;;  %v2117_v55 = vld [vmem:[%s5439_s1 + $0x10d0] sm:$0xff] }
 0xc31   : > { %v1706_v42 = vsel %vm148_vm0, %v1705_v56, 0.0  ;;  %2824 = vmatmul.msk.f32.vlgmr.msra.gmra.mxu1 %vm148_vm0, %v1705_v56  ;;  %v2116_v56 = vld [vmem:[%s5439_s1 + $0x10c8] sm:$0xff] }
 0xc32   : > { %v1708_v57 = vrot.slane %v1706_v42, 1  ;;  %v1710_v58 = vrot.slane %v1706_v42, 2  ;;  %v1712_v59 = vrot.slane %v1706_v42, 3  ;;  %v1714_v60 = vrot.slane %v1706_v42, 4  ;;  %2045 = vmatpush.msra.mxu1 %v2042_v5 }
 0xc33   : > { %v1718_v61 = vrot.slane %v1706_v42, 6  ;;  %v1721_v23 = vrot.slane %v1706_v42, 7  ;;  %v1716_v62 = vrot.slane %v1706_v42, 5  ;;  %v2115_v42 = vld [vmem:[%s5439_s1 + $0x10c0] sm:$0xff] }
 0xc34   : > { %1890 = vmatmul.f32.vlgmr.msrb.gmra.mxu0 %v1708_v57  ;;  %1910 = vmatmul.f32.vlgmr.msra.gmra.mxu3 %v1710_v58  ;;  %v2114_v57 = vld [vmem:[%s5439_s1 + $0x10b8] sm:$0xff]  ;;  %v2113_v58 = vld [vmem:[%s5439_s1 + $0x10b0] sm:$0xff] }
 0xc35   : > { %1930 = vmatmul.f32.vlgmr.msrb.gmra.mxu2 %v1712_v59  ;;  %v1719_v63 = vsel %vm263_vm8, %v1718_v61, %v3958_v22  ;;  %v1722_v4 = vsel %vm275_vm6, %v1721_v23, %v3964_v3  ;;  %2046 = vmatpush.msra.mxu1 %v2041_v6  ;;  %v2039_v3 = vld [vmem:[%s5439_s1 + $0x1050] sm:$0xff]  ;;  %v2112_v59 = vld [vmem:[%s5439_s1 + $0x10a8] sm:$0xff]  ;;  %v2110_v61 = vld [vmem:[%s5439_s1 + $0x1098] sm:$0xff] }
 0xc36   : > { %v2109_v23 = vld [vmem:[%s5439_s1 + $0x1090] sm:$0xff]  ;;  %v2106_v6 = vld [vmem:[%s5439_s1 + $0x1078] sm:$0xff] }
 0xc37   : > { %2047 = vmatpush.msra.mxu1 %v2040_v10 }
 0xc39   : > { %1950 = vmatmul.f32.vlgmr.msrb.gmra.mxu1 %v1714_v60  ;;  %v2111_v60 = vld [vmem:[%s5439_s1 + $0x10a0] sm:$0xff] }
 0xc3a   : > { %2048 = vmatpush.msra.mxu1 %v2039_v3 }
 0xc3c   : > { %1970 = vmatmul.f32.vlgmr.msra.gmra.mxu0 %v1716_v62  ;;  %1990 = vmatmul.f32.vlgmr.msrb.gmra.mxu3 %v1719_v63  ;;  %v2108_v62 = vld [vmem:[%s5439_s1 + $0x1088] sm:$0xff]  ;;  %v2107_v63 = vld [vmem:[%s5439_s1 + $0x1080] sm:$0xff] }
 0xc3d   : > { %2010 = vmatmul.f32.vlgmr.msra.gmra.mxu2 %v1722_v4  ;;  %2049 = vmatpush.msra.mxu1 %v2038_v13 }
 0xc3f   : > { %2050 = vmatpush.msra.mxu1 %v2037_v14  ;;  %v2220_v14 = vld [vmem:[%s5439_s1 + $0x11e8] sm:$0xff] }
 0xc40   : > { %2275 = vmatpush.msrb.mxu2 %v2220_v14  ;;  %v2247_v14 = vld [vmem:[%s5439_s1 + $0x12c0] sm:$0xff] }
 0xc41   : > { %2051 = vmatpush.msra.mxu1 %v2036_v18  ;;  %v2202_v18 = vld [vmem:[%s5439_s1 + $0x1158] sm:$0xff] }
 0xc43   : > { %2052 = vmatpush.msra.mxu1 %v2035_v20  ;;  %v2217_v20 = vld [vmem:[%s5439_s1 + $0x11d0] sm:$0xff] }
 0xc45   : > { %2053 = vmatpush.msra.mxu1 %v2034_v25  ;;  %v2199_v25 = vld [vmem:[%s5439_s1 + $0x1140] sm:$0xff] }
 0xc47   : > { %2054 = vmatpush.msra.mxu1 %v2033_v28  ;;  %v2198_v28 = vld [vmem:[%s5439_s1 + $0x1138] sm:$0xff] }
 0xc49   : > { %2055 = vmatpush.msra.mxu1 %v2032_v31  ;;  %v2235_v31 = vld [vmem:[%s5439_s1 + $0x1260] sm:$0xff] }
 0xc4b   : > { %2056 = vmatpush.msra.mxu1 %v2031_v36  ;;  %v2213_v36 = vld [vmem:[%s5439_s1 + $0x11b0] sm:$0xff] }
 0xc4d   : > { %2057 = vmatpush.msra.mxu1 %v2030_v0  ;;  %v2212_v0 = vld [vmem:[%s5439_s1 + $0x11a8] sm:$0xff] }
 0xc4f   : > { %2058 = vmatpush.msra.mxu1 %v2029_v1  ;;  %v2195_v1 = vld [vmem:[%s5439_s1 + $0x1120] sm:$0xff] }
 0xc51   : > { %2059 = vmatpush.msra.mxu1 %v2028_v45 }
 0xc53   : > { %2060 = vmatpush.msra.mxu1 %v2027_v49  ;;  %v2209_v49 = vld [vmem:[%s5439_s1 + $0x1190] sm:$0xff] }
 0xcae   : > { %v1871_v22 = vpop.f32.mrf.mxu1 }
 0xcaf   : > { %v1872_v11 = vadd.f32 %v2932_v7, %v1871_v22  ;;  %v4913_v7 = vrot.slane %v2951_v38, 1  ;;  %v2204_v38 = vld [vmem:[%s5439_s1 + $0x1168] sm:$0xff] }
 0xcb0   : > { %2255 = vmatpush.msra.mxu3 %v2204_v38  ;;  %v2231_v38 = vld [vmem:[%s5439_s1 + $0x1240] sm:$0xff] }
 0xcb1   : > { %v1891_v12 = vpop.f32.mrf.mxu0 }
 0xcb2   : > { %v1892_v15 = vadd.f32 %v1891_v12, %v1872_v11  ;;  %v2105_v11 = vld [vmem:[%s5439_s1 + $0x1070] sm:$0xff] }
 0xcb6   : > { %v1951_v24 = vpop.f32.mrf.mxu1 }
 0xcb7   : > { %v1911_v16 = vpop.f32.mrf.mxu3 }
 0xcb8   : > { %v1912_v19 = vadd.f32 %v1911_v16, %v1892_v15  ;;  %v1931_v33 = vpop.f32.mrf.mxu2  ;;  %v2203_v15 = vld [vmem:[%s5439_s1 + $0x1160] sm:$0xff] }
 0xcb9   : > { %v1971_v27 = vpop.f32.mrf.mxu0  ;;  %v2219_v16 = vld [vmem:[%s5439_s1 + $0x11e0] sm:$0xff]  ;;  %2256 = vmatpush.msra.mxu3 %v2203_v15  ;;  %v2230_v15 = vld [vmem:[%s5439_s1 + $0x1238] sm:$0xff] }
 0xcba   : > { %v1932_v21 = vadd.f32 %v1931_v33, %v1912_v19  ;;  %v2218_v19 = vld [vmem:[%s5439_s1 + $0x11d8] sm:$0xff]  ;;  %2276 = vmatpush.msrb.mxu2 %v2219_v16  ;;  %v2201_v33 = vld [vmem:[%s5439_s1 + $0x1150] sm:$0xff] }
 0xcbb   : > { %2257 = vmatpush.msra.mxu3 %v2202_v18  ;;  %v2246_v16 = vld [vmem:[%s5439_s1 + $0x12b8] sm:$0xff]  ;;  %v2229_v18 = vld [vmem:[%s5439_s1 + $0x1230] sm:$0xff] }
 0xcbc   : > { %v1952_v26 = vadd.f32 %v1951_v24, %v1932_v21  ;;  %2277 = vmatpush.msrb.mxu2 %v2218_v19  ;;  %v2200_v21 = vld [vmem:[%s5439_s1 + $0x1148] sm:$0xff]  ;;  %v2245_v19 = vld [vmem:[%s5439_s1 + $0x12b0] sm:$0xff] }
 0xcbd   : > { %v2216_v24 = vld [vmem:[%s5439_s1 + $0x11c8] sm:$0xff]  ;;  %2258 = vmatpush.msra.mxu3 %v2201_v33 }
 0xcbe   : > { %v1972_v29 = vadd.f32 %v1971_v27, %v1952_v26  ;;  %2278 = vmatpush.msrb.mxu2 %v2217_v20  ;;  %v2215_v26 = vld [vmem:[%s5439_s1 + $0x11c0] sm:$0xff]  ;;  %v2236_v27 = vld [vmem:[%s5439_s1 + $0x1268] sm:$0xff] }
 0xcbf   : > { %v1991_v30 = vpop.f32.mrf.mxu3  ;;  %2259 = vmatpush.msra.mxu3 %v2200_v21  ;;  %2295 = vmatpush.msrb.mxu1 %v2236_v27  ;;  %v2228_v33 = vld [vmem:[%s5439_s1 + $0x1228] sm:$0xff]  ;;  %v2227_v21 = vld [vmem:[%s5439_s1 + $0x1220] sm:$0xff]  ;;  %v2225_v27 = vld [vmem:[%s5439_s1 + $0x1210] sm:$0xff] }
 0xcc0   : > { %v1992_v32 = vadd.f32 %v1991_v30, %v1972_v29  ;;  %v2011_v35 = vpop.f32.mrf.mxu2  ;;  %2279 = vmatpush.msrb.mxu2 %v2216_v24  ;;  %v2252_v29 = vld [vmem:[%s5439_s1 + $0x12e8] sm:$0xff]  ;;  %v2214_v30 = vld [vmem:[%s5439_s1 + $0x11b8] sm:$0xff]  ;;  %v2243_v24 = vld [vmem:[%s5439_s1 + $0x12a0] sm:$0xff] }
 0xcc1   : > { %2260 = vmatpush.msra.mxu3 %v2199_v25  ;;  %2296 = vmatpush.msrb.mxu1 %v2235_v31  ;;  %v2244_v20 = vld [vmem:[%s5439_s1 + $0x12a8] sm:$0xff]  ;;  %v2226_v25 = vld [vmem:[%s5439_s1 + $0x1218] sm:$0xff]  ;;  %v2223_v31 = vld [vmem:[%s5439_s1 + $0x1200] sm:$0xff] }
 0xcc2   : > { %v2012_v37 = vadd.f32 %v2011_v35, %v1992_v32  ;;  %v2251_v32 = vld [vmem:[%s5439_s1 + $0x12e0] sm:$0xff]  ;;  %2280 = vmatpush.msrb.mxu2 %v2215_v26  ;;  %v2197_v35 = vld [vmem:[%s5439_s1 + $0x1130] sm:$0xff]  ;;  %v2242_v26 = vld [vmem:[%s5439_s1 + $0x1298] sm:$0xff] }
 0xcc3   : > { %2261 = vmatpush.msra.mxu3 %v2198_v28  ;;  %v2241_v28 = vld [vmem:[%s5439_s1 + $0x1290] sm:$0xff] }
 0xcc4   : > { %v2014_v43 = vmax.f32 %v2012_v37, 0.0  ;;  %2281 = vmatpush.msrb.mxu2 %v2214_v30  ;;  %v2196_v37 = vld [vmem:[%s5439_s1 + $0x1128] sm:$0xff] }
 0xcc5   : > { %2262 = vmatpush.msra.mxu3 %v2197_v35  ;;  %v2240_v30 = vld [vmem:[%s5439_s1 + $0x1288] sm:$0xff]  ;;  %v2222_v35 = vld [vmem:[%s5439_s1 + $0x11f8] sm:$0xff] }
 0xcc6   : > { %v2016_v44 = vrot.slane %v2014_v43, 5  ;;  %v2934_v43 = vld [vmem:[%s5439_s1 + $0x14f9] ss:$0 sm:$0xff]  ;;  %2282 = vmatpush.msrb.mxu2 %v2213_v36 }
 0xcc7   : > { %2263 = vmatpush.msra.mxu3 %v2196_v37  ;;  %v2238_v36 = vld [vmem:[%s5439_s1 + $0x1278] sm:$0xff]  ;;  %v2221_v37 = vld [vmem:[%s5439_s1 + $0x11f0] sm:$0xff] }
 0xcc8   : > { %v2018_v46 = vsel %vm206_vm4, 0.0, %v2016_v44  ;;  %v2211_v44 = vld [vmem:[%s5439_s1 + $0x11a0] sm:$0xff]  ;;  %2283 = vmatpush.msrb.mxu2 %v2212_v0  ;;  %v2237_v0 = vld [vmem:[%s5439_s1 + $0x1270] sm:$0xff] }
 0xcc9   : > { %v2019_v8 = vsel %vm221_vm7, %v2018_v46, 0.0  ;;  %v2194_v46 = vld [vmem:[%s5439_s1 + $0x1118] sm:$0xff]  ;;  %2264 = vmatpush.msra.mxu3 %v2195_v1 }
 0xcca   : > { %v2021_v47 = vrot.slane %v2019_v8, 5  ;;  %2284 = vmatpush.msrb.mxu2 %v2211_v44 }
 0xccb   : > { %2265 = vmatpush.msra.mxu3 %v2194_v46 }
 0xccc   : > { %v2022_v48 = vsel %vm206_vm4, %v2021_v47, %v3541_v39  ;;  %v2066_v39 = vld [vmem:[%s5439_s1 + $0x14d0] sm:$0x7f] }
 0xccd   : > { %2023 = vrot.lane.b32.xlu0 %v2022_v48, %s2949_s21  ;;  %v2193_v48 = vld [vmem:[%s5439_s1 + $0x1110] sm:$0xff] }
 0xcce   : > { %2266 = vmatpush.msra.mxu3 %v2193_v48 }
 0xd3f   : > { %v2024_v40 = vpop.permute.xlu0 %2023 }
 0xd40   : > { %v2026_v9 = vsel %vm290_vm10, %v2019_v8, %v2024_v40  ;;  %v2210_v8 = vld [vmem:[%s5439_s1 + $0x1198] sm:$0xff] }
 0xd41   : > { %2061 = vmatmul.f32.vlgmr.msra.gmra.mxu1 %v2026_v9  ;;  %2285 = vmatpush.msrb.mxu2 %v2210_v8  ;;  %v2192_v9 = vld [vmem:[%s5439_s1 + $0x1108] sm:$0xff] }
 0xd42   : > { %2267 = vmatpush.msra.mxu3 %v2192_v9 }
 0xd43   : > { %2286 = vmatpush.msrb.mxu2 %v2209_v49 }
 0xdbe   : > { %v2062_v51 = vpop.f32.mrf.mxu1 }
 0xdbf   : > { %v2063_v52 = vadd.f32 %v2933_v50, %v2062_v51  ;;  %v2208_v50 = vld [vmem:[%s5439_s1 + $0x1188] sm:$0xff] }
 0xdc0   : > { %2287 = vmatpush.msrb.mxu2 %v2208_v50 }
 0xdc1   : > { %v2065_v53 = vmax.f32 %v2063_v52, 0.0  ;;  %v2191_v52 = vld [vmem:[%s5439_s1 + $0x1100] sm:$0xff] }
 0xdc2   : > { %2268 = vmatpush.msra.mxu3 %v2191_v52 }
 0xdc3   : > { %2825 = vmatpush.msk.msrb.mxu0 %vm198_vm3, %v2065_v53  ;;  %v2207_v53 = vld [vmem:[%s5439_s1 + $0x1180] sm:$0xff] }
 0xdc4   : > { %2826 = vmatmul.msk.f32.vlgmr.msrb.gmra.mxu0 %vm158_vm1, %v2066_v39  ;;  %2288 = vmatpush.msrb.mxu2 %v2207_v53 }
 0xdc5   : > { %2123 = vmatpush.msra.mxu0 %v2120_v17 }
 0xdc7   : > { %2124 = vmatpush.msra.mxu0 %v2119_v54 }
 0xdc9   : > { %2125 = vmatpush.msra.mxu0 %v2118_v41 }
 0xdcb   : > { %2126 = vmatpush.msra.mxu0 %v2117_v55 }
 0xdcd   : > { %2127 = vmatpush.msra.mxu0 %v2116_v56 }
 0xdcf   : > { %2128 = vmatpush.msra.mxu0 %v2115_v42 }
 0xdd1   : > { %2129 = vmatpush.msra.mxu0 %v2114_v57 }
 0xdd3   : > { %2130 = vmatpush.msra.mxu0 %v2113_v58 }
 0xdd5   : > { %2131 = vmatpush.msra.mxu0 %v2112_v59 }
 0xdd7   : > { %2132 = vmatpush.msra.mxu0 %v2111_v60 }
 0xdd9   : > { %2133 = vmatpush.msra.mxu0 %v2110_v61 }
 0xddb   : > { %2134 = vmatpush.msra.mxu0 %v2109_v23 }
 0xddd   : > { %2135 = vmatpush.msra.mxu0 %v2108_v62 }
 0xddf   : > { %2136 = vmatpush.msra.mxu0 %v2107_v63  ;;  %v2190_v63 = vld [vmem:[%s5439_s1 + $0x10f8] sm:$0xff] }
 0xde0   : > { %2269 = vmatpush.msra.mxu3 %v2190_v63 }
 0xde1   : > { %2137 = vmatpush.msra.mxu0 %v2106_v6  ;;  %v2250_v6 = vld [vmem:[%s5439_s1 + $0x12d8] sm:$0xff] }
 0xde3   : > { %2138 = vmatpush.msra.mxu0 %v2105_v11  ;;  %v2249_v11 = vld [vmem:[%s5439_s1 + $0x12d0] sm:$0xff] }
 0xde5   : > { %2315 = vmatpush.msrb.mxu0 %v2252_v29  ;;  %v2224_v29 = vld [vmem:[%s5439_s1 + $0x1208] sm:$0xff] }
 0xde7   : > { %2316 = vmatpush.msrb.mxu0 %v2251_v32  ;;  %v2239_v32 = vld [vmem:[%s5439_s1 + $0x1280] sm:$0xff] }
 0xde9   : > { %2317 = vmatpush.msrb.mxu0 %v2250_v6 }
 0xdeb   : > { %2318 = vmatpush.msrb.mxu0 %v2249_v11 }
 0xe41   : > { %v2090_v4 = vpop.f32.mrf.mxu0 }
 0xe42   : > { %v2094_v5 = vrot.slane %v2090_v4, 7  ;;  %v2206_v4 = vld [vmem:[%s5439_s1 + $0x1178] sm:$0xff] }
 0xe43   : > { %2289 = vmatpush.msrb.mxu2 %v2206_v4 }
 0xe44   : > { %v2096_v22 = vsel %vm275_vm6, 0.0, %v2094_v5  ;;  %v2234_v5 = vld [vmem:[%s5439_s1 + $0x1258] sm:$0xff] }
 0xe45   : > { %v2098_v10 = vrot.slane %v2096_v22, 1  ;;  %2297 = vmatpush.msrb.mxu1 %v2234_v5 }
 0xe47   : > { %v2100_v3 = vsel %vm148_vm0, %v2098_v10, %v4913_v7  ;;  %v2205_v10 = vld [vmem:[%s5439_s1 + $0x1170] sm:$0xff] }
 0xe48   : > { %2101 = vrot.lane.b32.xlu1 %v2100_v3, %s2949_s21  ;;  %v2233_v3 = vld [vmem:[%s5439_s1 + $0x1250] sm:$0xff]  ;;  %2290 = vmatpush.msrb.mxu2 %v2205_v10 }
 0xe49   : > { %2298 = vmatpush.msrb.mxu1 %v2233_v3 }
 0xeba   : > { %v2102_v12 = vpop.permute.xlu1 %2101 }
 0xebb   : > { %v2104_v13 = vsel %vm290_vm10, %v2096_v22, %v2102_v12  ;;  %v2189_v22 = vld [vmem:[%s5439_s1 + $0x10f0] sm:$0xff]  ;;  %v2232_v12 = vld [vmem:[%s5439_s1 + $0x1248] sm:$0xff] }
 0xebc   : > { %2139 = vmatmul.f32.vlgmr.msra.gmra.mxu0 %v2104_v13  ;;  %2270 = vmatpush.msra.mxu3 %v2189_v22  ;;  %v2248_v13 = vld [vmem:[%s5439_s1 + $0x12c8] sm:$0xff] }
 0xebd   : > { %2299 = vmatpush.msrb.mxu1 %v2232_v12  ;;  %2319 = vmatpush.msrb.mxu0 %v2248_v13 }
 0xebf   : > { %2300 = vmatpush.msrb.mxu1 %v2231_v38  ;;  %2320 = vmatpush.msrb.mxu0 %v2247_v14 }
 0xec1   : > { %2301 = vmatpush.msrb.mxu1 %v2230_v15  ;;  %2321 = vmatpush.msrb.mxu0 %v2246_v16  ;;  %v2350_v16 = vld [vmem:[%s5439_s1 + $0x12f0] sm:$0xff] }
 0xec3   : > { %2302 = vmatpush.msrb.mxu1 %v2229_v18  ;;  %2322 = vmatpush.msrb.mxu0 %v2245_v19 }
 0xec5   : > { %2303 = vmatpush.msrb.mxu1 %v2228_v33  ;;  %2323 = vmatpush.msrb.mxu0 %v2244_v20  ;;  %v2936_v33 = vld [vmem:[%s5439_s1 + $0x14fb] ss:$0 sm:$0xff] }
 0xec7   : > { %2304 = vmatpush.msrb.mxu1 %v2227_v21  ;;  %2324 = vmatpush.msrb.mxu0 %v2243_v24 }
 0xec9   : > { %2305 = vmatpush.msrb.mxu1 %v2226_v25  ;;  %2325 = vmatpush.msrb.mxu0 %v2242_v26  ;;  %v2384_v25 = vld [vmem:[%s5439_s1 + $0x14d8] sm:$0xff]  ;;  %v2385_v26 = vld [vmem:[%s5439_s1 + $0x14e0] sm:$0x7f] }
 0xecb   : > { %2306 = vmatpush.msrb.mxu1 %v2225_v27  ;;  %2326 = vmatpush.msrb.mxu0 %v2241_v28  ;;  %v2443_v27 = vld [vmem:[%s5439_s1 + $0x1368] sm:$0xff]  ;;  %v2442_v28 = vld [vmem:[%s5439_s1 + $0x1360] sm:$0xff] }
 0xecd   : > { %2307 = vmatpush.msrb.mxu1 %v2224_v29  ;;  %2327 = vmatpush.msrb.mxu0 %v2240_v30  ;;  %v2441_v29 = vld [vmem:[%s5439_s1 + $0x1358] sm:$0xff]  ;;  %v2440_v30 = vld [vmem:[%s5439_s1 + $0x1350] sm:$0xff] }
 0xecf   : > { %2308 = vmatpush.msrb.mxu1 %v2223_v31  ;;  %2328 = vmatpush.msrb.mxu0 %v2239_v32  ;;  %v2439_v31 = vld [vmem:[%s5439_s1 + $0x1348] sm:$0xff]  ;;  %v2438_v32 = vld [vmem:[%s5439_s1 + $0x1340] sm:$0xff] }
 0xed1   : > { %2309 = vmatpush.msrb.mxu1 %v2222_v35  ;;  %2329 = vmatpush.msrb.mxu0 %v2238_v36  ;;  %v2437_v35 = vld [vmem:[%s5439_s1 + $0x1338] sm:$0xff] }
 0xed3   : > { %2310 = vmatpush.msrb.mxu1 %v2221_v37  ;;  %2330 = vmatpush.msrb.mxu0 %v2237_v0 }
 0xf39   : > { %v2140_v45 = vpop.f32.mrf.mxu0 }
 0xf3a   : > { %v2141_v47 = vadd.f32 %v2934_v43, %v2140_v45 }
 0xf3c   : > { %v2143_v40 = vmax.f32 %v2141_v47, 0.0 }
 0xf3e   : > { %v2145_v51 = vrot.slane %v2143_v40, 5 }
 0xf40   : > { %v5023_v39 = vsel %vm206_vm4, 0.0, %v2145_v51  ;;  %v5026_v17 = vsel %vm206_vm4, %v2145_v51, 0.0 }
 0xf41   : > { %v2169_v54 = vrot.slane %v5023_v39, 5  ;;  %v2170_v41 = vrot.slane %v5026_v17, 5  ;;  %v2179_v55 = vrot.slane %v5023_v39, 7  ;;  %v2180_v56 = vrot.slane %v5026_v17, 7 }
 0xf42   : > { %v2150_v42 = vrot.slane %v5023_v39, 1  ;;  %v2159_v57 = vrot.slane %v5023_v39, 3  ;;  %v2160_v58 = vrot.slane %v5026_v17, 3  ;;  %v2155_v43 = vrot.slane %v5023_v39, 2 }
 0xf43   : > { %v2171_v59 = vsel %vm206_vm4, %v2169_v54, %v2170_v41  ;;  %v2181_v60 = vsel %vm275_vm6, %v2179_v55, %v2180_v56  ;;  %v2156_v1 = vrot.slane %v5026_v17, 2  ;;  %v2165_v49 = vrot.slane %v5023_v39, 4 }
 0xf44   : > { %v2898_v61 = vpack.i.bf16 %v2181_v60, %v2171_v59  ;;  %v2161_v23 = vsel %vm233_vm5, %v2159_v57, %v2160_v58  ;;  %v2166_v40 = vrot.slane %v5026_v17, 4  ;;  %v2175_v9 = vrot.slane %v5023_v39, 6  ;;  %v2354_v57 = vld [vmem:[%s5439_s1 + $0x1310] sm:$0xff]  ;;  %v2353_v58 = vld [vmem:[%s5439_s1 + $0x1308] sm:$0xff]  ;;  %v2352_v59 = vld [vmem:[%s5439_s1 + $0x1300] sm:$0xff] }
 0xf45   : > { %v2893_v62 = vpack.i.bf16 %v2161_v23, %v2150_v42  ;;  %v2157_v8 = vsel %vm221_vm7, %v2155_v43, %v2156_v1  ;;  %v2176_v50 = vrot.slane %v5026_v17, 6  ;;  %v2357_v42 = vld [vmem:[%s5439_s1 + $0x1328] sm:$0xff]  ;;  %v2355_v17 = vld [vmem:[%s5439_s1 + $0x1318] sm:$0xff] }
 0xf46   : > { %2899 = vrot.lane.b32.xlu0 %v2898_v61, %s2949_s21  ;;  %v2167_v54 = vsel %vm198_vm3, %v2165_v49, %v2166_v40  ;;  %2371 = vmatpush.msrb.mxu3 %v2357_v42  ;;  %v2935_v60 = vld [vmem:[%s5439_s1 + $0x14fa] ss:$0 sm:$0xff]  ;;  %v2690_v40 = vld [vmem:[%s5439_s1 + $0x1490] sm:$0xff]  ;;  %v2587_v42 = vld [vmem:[%s5439_s1 + $0x13e8] sm:$0xff] }
 0xf47   : > { %2894 = vrot.lane.b32.xlu2 %v2893_v62, %s2949_s21  ;;  %v2177_v41 = vsel %vm263_vm8, %v2175_v9, %v2176_v50  ;;  %v2351_v61 = vld [vmem:[%s5439_s1 + $0x12f8] sm:$0xff]  ;;  %v2688_v9 = vld [vmem:[%s5439_s1 + $0x1480] sm:$0xff] }
 0xf48   : > { %v2691_v49 = vld [vmem:[%s5439_s1 + $0x1498] sm:$0xff] }
 0xfa1   : > { %v2895_v44 = vpop.permute.xlu2 %2894 }
 0xfa2   : > { %v2897_v45 = vunpack.i.h.bf16 %v2895_v44  ;;  %v2896_v46 = vunpack.i.l.bf16 %v2895_v44 }
 0xfa4   : > { %v2185_v47 = vsel %vm290_vm10, %v5023_v39, %v2896_v46  ;;  %v2186_v48 = vsel %vm290_vm10, %v2157_v8, %v2897_v45  ;;  %v2356_v39 = vld [vmem:[%s5439_s1 + $0x1320] sm:$0xff] }
 0xfa5   : > { %2271 = vmatmul.f32.vlgmr.msra.gmra.mxu3 %v2185_v47  ;;  %2291 = vmatmul.f32.vlgmr.msrb.gmra.mxu2 %v2186_v48  ;;  %v2436_v48 = vld [vmem:[%s5439_s1 + $0x1330] sm:$0xff] }
 0xfa6   : > { %2372 = vmatpush.msrb.mxu3 %v2356_v39 }
 0xfa8   : > { %2373 = vmatpush.msrb.mxu3 %v2355_v17 }
 0xfaa   : > { %2374 = vmatpush.msrb.mxu3 %v2354_v57 }
 0xfac   : > { %2375 = vmatpush.msrb.mxu3 %v2353_v58 }
 0xfae   : > { %2376 = vmatpush.msrb.mxu3 %v2352_v59 }
 0xfb0   : > { %2377 = vmatpush.msrb.mxu3 %v2351_v61 }
 0xfb2   : > { %2378 = vmatpush.msrb.mxu3 %v2350_v16 }
 0xfb4   : > { %2606 = vmatpush.msra.mxu3 %v2587_v42  ;;  %v2593_v42 = vld [vmem:[%s5439_s1 + $0x1418] sm:$0xff] }
 0xfb8   : > { %v2900_v51 = vpop.permute.xlu0 %2899 }
 0xfb9   : > { %v2902_v52 = vunpack.i.h.bf16 %v2900_v51  ;;  %v2901_v53 = vunpack.i.l.bf16 %v2900_v51 }
 0xfbb   : > { %v2187_v55 = vsel %vm290_vm10, %v2167_v54, %v2901_v53  ;;  %v2188_v56 = vsel %vm290_vm10, %v2177_v41, %v2902_v52  ;;  %v2937_v54 = vld [vmem:[%s5439_s1 + $0x14fc] ss:$0 sm:$0xff] }
 0xfbc   : > { %2311 = vmatmul.f32.vlgmr.msrb.gmra.mxu1 %v2187_v55  ;;  %2331 = vmatmul.f32.vlgmr.msrb.gmra.mxu0 %v2188_v56 }
0x1028   : > { %v2272_v23 = vpop.f32.mrf.mxu3  ;;  %v2292_v63 = vpop.f32.mrf.mxu2 }
0x1029   : > { %v2273_v62 = vadd.f32 %v2935_v60, %v2272_v23 }
0x102b   : > { %v2293_v4 = vadd.f32 %v2292_v63, %v2273_v62 }
0x1039   : > { %v2312_v5 = vpop.f32.mrf.mxu1  ;;  %v2332_v22 = vpop.f32.mrf.mxu0 }
0x103a   : > { %v2313_v6 = vadd.f32 %v2312_v5, %v2293_v4 }
0x103c   : > { %v2333_v10 = vadd.f32 %v2332_v22, %v2313_v6 }
0x103e   : > { %v2335_v3 = vmax.f32 %v2333_v10, 0.0 }
0x1040   : > { %v2337_v11 = vrot.slane %v2335_v3, 6 }
0x1042   : > { %v2339_v12 = vsel %vm263_vm8, 0.0, %v2337_v11  ;;  %v2340_v13 = vsel %vm275_vm6, %v2337_v11, 0.0 }
0x1043   : > { %v2343_v38 = vrot.slane %v2339_v12, 3  ;;  %v2344_v14 = vrot.slane %v2340_v13, 3 }
0x1045   : > { %v2345_v15 = vsel %vm233_vm5, %v2343_v38, %v2344_v14 }
0x1046   : > { %2346 = vrot.lane.b32.xlu1 %v2345_v15, %s2950_s22 }
0x10b8   : > { %v2347_v18 = vpop.permute.xlu1 %2346 }
0x10b9   : > { %v2349_v19 = vsel %vm287_vm9, %v2339_v12, %v2347_v18 }
0x10ba   : > { %2827 = vmatmul.msk.f32.vlgmr.msrb.gmra.mxu3 %vm290_vm10, %v2349_v19 }
0x113d   : > { %v2380_v20 = vpop.f32.mrf.mxu3 }
0x113e   : > { %v2381_v21 = vadd.f32 %v2936_v33, %v2380_v20 }
0x1140   : > { %v2383_v24 = vmax.f32 %v2381_v21, 0.0 }
0x1142   : > { %2407 = vmatpush.msra.mxu2 %v2383_v24 }
0x1143   : > { %2828 = vmatmul.msk.f32.vlgmr.msra.gmra.mxu2 %vm164_vm2, %v2384_v25 }
0x1144   : > { %2460 = vmatpush.msrb.mxu2 %v2443_v27 }
0x1146   : > { %2461 = vmatpush.msrb.mxu2 %v2442_v28 }
0x1148   : > { %2462 = vmatpush.msrb.mxu2 %v2441_v29 }
0x114a   : > { %2463 = vmatpush.msrb.mxu2 %v2440_v30 }
0x114b   : > { %2829 = vmatmul.msk.f32.gmra.mxu2 %vm164_vm2, %v2385_v26 }
0x114c   : > { %2464 = vmatpush.msrb.mxu2 %v2439_v31 }
0x114e   : > { %2465 = vmatpush.msrb.mxu2 %v2438_v32 }
0x1150   : > { %2466 = vmatpush.msrb.mxu2 %v2437_v35 }
0x1152   : > { %2467 = vmatpush.msrb.mxu2 %v2436_v48  ;;  %v2599_v48 = vld [vmem:[%s5439_s1 + $0x1448] sm:$0xff] }
0x1154   : > { %2705 = vmatpush.msra.mxu2 %v2691_v49  ;;  %v2580_v49 = vld [vmem:[%s5439_s1 + $0x13b0] sm:$0xff] }
0x1156   : > { %2706 = vmatpush.msra.mxu2 %v2690_v40  ;;  %v2598_v40 = vld [vmem:[%s5439_s1 + $0x1440] sm:$0xff] }
0x11c6   : > { %v2409_v36 = vpop.f32.mrf.mxu2 }
0x11c7   : > { %v2417_v37 = vrot.slane %v2409_v36, 7  ;;  %v2586_v36 = vld [vmem:[%s5439_s1 + $0x13e0] sm:$0xff] }
0x11c8   : > { %2607 = vmatpush.msra.mxu3 %v2586_v36 }
0x11c9   : > { %v2422_v43 = vsel %vm275_vm6, 0.0, %v2417_v37 }
0x11ca   : > { %v2424_v45 = vrot.slane %v2422_v43, 1 }
0x11ce   : > { %v2412_v0 = vpop.f32.mrf.mxu2 }
0x11cf   : > { %v2418_v1 = vrot.slane %v2412_v0, 7  ;;  %v2603_v0 = vld [vmem:[%s5439_s1 + $0x1468] sm:$0xff] }
0x11d0   : > { %2629 = vmatpush.msra.mxu1 %v2603_v0 }
0x11d1   : > { %v2419_v44 = vsel %vm275_vm6, %v2417_v37, %v2418_v1  ;;  %v2585_v37 = vld [vmem:[%s5439_s1 + $0x13d8] sm:$0xff]  ;;  %v2584_v1 = vld [vmem:[%s5439_s1 + $0x13d0] sm:$0xff] }
0x11d2   : > { %v2425_v46 = vrot.slane %v2419_v44, 1  ;;  %2608 = vmatpush.msra.mxu3 %v2585_v37 }
0x11d4   : > { %v2427_v8 = vsel %vm148_vm0, %v2425_v46, %v4913_v7  ;;  %v2426_v47 = vsel %vm148_vm0, %v2424_v45, %v2425_v46  ;;  %v2689_v7 = vld [vmem:[%s5439_s1 + $0x1488] sm:$0xff]  ;;  %2609 = vmatpush.msra.mxu3 %v2584_v1  ;;  %v2582_v45 = vld [vmem:[%s5439_s1 + $0x13c0] sm:$0xff]  ;;  %v2601_v46 = vld [vmem:[%s5439_s1 + $0x1458] sm:$0xff] }
0x11d5   : > { %2430 = vrot.lane.b32.xlu0 %v2427_v8, %s2950_s22  ;;  %2428 = vrot.lane.b32.xlu2 %v2426_v47, %s2950_s22  ;;  %v2581_v8 = vld [vmem:[%s5439_s1 + $0x13b8] sm:$0xff]  ;;  %v2600_v47 = vld [vmem:[%s5439_s1 + $0x1450] sm:$0xff] }
0x11d6   : > { %2707 = vmatpush.msra.mxu2 %v2689_v7  ;;  %v2579_v7 = vld [vmem:[%s5439_s1 + $0x13a8] sm:$0xff] }
0x11d8   : > { %2708 = vmatpush.msra.mxu2 %v2688_v9  ;;  %v2578_v9 = vld [vmem:[%s5439_s1 + $0x13a0] sm:$0xff] }
0x122f   : > { %v2429_v50 = vpop.permute.xlu2 %2428 }
0x1230   : > { %v2434_v51 = vsel %vm287_vm9, %v2422_v43, %v2429_v50  ;;  %v2602_v43 = vld [vmem:[%s5439_s1 + $0x1460] sm:$0xff]  ;;  %v2597_v50 = vld [vmem:[%s5439_s1 + $0x1438] sm:$0xff] }
0x1231   : > { %2830 = vmatmul.msk.f32.vlgmr.msrb.gmra.mxu2 %vm290_vm10, %v2434_v51  ;;  %2630 = vmatpush.msra.mxu1 %v2602_v43  ;;  %v2577_v51 = vld [vmem:[%s5439_s1 + $0x1398] sm:$0xff] }
0x1233   : > { %2631 = vmatpush.msra.mxu1 %v2601_v46 }
0x1235   : > { %2632 = vmatpush.msra.mxu1 %v2600_v47 }
0x1237   : > { %2633 = vmatpush.msra.mxu1 %v2599_v48 }
0x1239   : > { %2634 = vmatpush.msra.mxu1 %v2598_v40  ;;  %v2655_v40 = vld [vmem:[%s5439_s1 + $0x1470] sm:$0xff] }
0x123b   : > { %2635 = vmatpush.msra.mxu1 %v2597_v50 }
0x1247   : > { %v2431_v52 = vpop.permute.xlu0 %2430 }
0x1248   : > { %v2435_v53 = vsel %vm287_vm9, %v2419_v44, %v2431_v52  ;;  %v2583_v44 = vld [vmem:[%s5439_s1 + $0x13c8] sm:$0xff]  ;;  %v2596_v52 = vld [vmem:[%s5439_s1 + $0x1430] sm:$0xff] }
0x1249   : > { %2831 = vmatmul.msk.f32.gmra.mxu2 %vm290_vm10, %v2435_v53  ;;  %2610 = vmatpush.msra.mxu3 %v2583_v44  ;;  %v2595_v53 = vld [vmem:[%s5439_s1 + $0x1428] sm:$0xff] }
0x124a   : > { %2636 = vmatpush.msra.mxu1 %v2596_v52  ;;  %v2714_v52 = vsel %vm1366_vm12, %v4187_v2, 0.0 }
0x124b   : > { %2611 = vmatpush.msra.mxu3 %v2582_v45 }
0x124c   : > { %2637 = vmatpush.msra.mxu1 %v2595_v53 }
0x124d   : > { %2612 = vmatpush.msra.mxu3 %v2581_v8 }
0x124f   : > { %2613 = vmatpush.msra.mxu3 %v2580_v49 }
0x1251   : > { %2834 = vmatmul.msk.f32.vlgmr.msra.gmra.mxu2 %vm287_vm9, %v4262_v34  ;;  %2614 = vmatpush.msra.mxu3 %v2579_v7  ;;  %v2656_v7 = vld [vmem:[%s5439_s1 + $0x1478] sm:$0xff] }
0x1253   : > { %2615 = vmatpush.msra.mxu3 %v2578_v9  ;;  %v2692_v9 = vld [vmem:[%s5439_s1 + $0x14fe] sm:$0x1] }
0x1255   : > { %2616 = vmatpush.msra.mxu3 %v2577_v51 }
0x12b4   : > { %v2469_v41 = vpop.f32.mrf.mxu2 }
0x12b5   : > { %v2470_v55 = vadd.f32 %v2937_v54, %v2469_v41  ;;  %v2575_v41 = vld [vmem:[%s5439_s1 + $0x1388] sm:$0xff] }
0x12b7   : > { %v2475_v56 = vmax.f32 %v2470_v55, 0.0  ;;  %v2594_v55 = vld [vmem:[%s5439_s1 + $0x1420] sm:$0xff] }
0x12b8   : > { %2638 = vmatpush.msra.mxu1 %v2594_v55  ;;  %v2718_v55 = vrot.slane %v2714_v52, 7 }
0x12b9   : > { %v2479_v39 = vrot.slane %v2475_v56, 5  ;;  %v2574_v56 = vld [vmem:[%s5439_s1 + $0x1380] sm:$0xff] }
0x12ba   : > { %2639 = vmatpush.msra.mxu1 %v2593_v42 }
0x12bb   : > { %v5250_v58 = vsel %vm206_vm4, 0.0, %v2479_v39 }
0x12bc   : > { %v2509_v60 = vrot.slane %v5250_v58, 3  ;;  %v2498_v62 = vrot.slane %v5250_v58, 2  ;;  %v2488_v63 = vrot.slane %v5250_v58, 1  ;;  %v2549_v16 = vrot.slane %v5250_v58, 7 }
0x12bd   : > { %v2538_v24 = vrot.slane %v5250_v58, 6  ;;  %v2527_v25 = vrot.slane %v5250_v58, 5 }
0x12cc   : > { %v2472_v17 = vpop.f32.mrf.mxu2 }
0x12cd   : > { %v2473_v57 = vadd.f32 %v2937_v54, %v2472_v17  ;;  %v2576_v54 = vld [vmem:[%s5439_s1 + $0x1390] sm:$0xff] }
0x12ce   : > { %2617 = vmatpush.msra.mxu3 %v2576_v54  ;;  %v2592_v17 = vld [vmem:[%s5439_s1 + $0x1410] sm:$0xff] }
0x12cf   : > { %v2476_v59 = vmax.f32 %v2473_v57, 0.0  ;;  %v2572_v57 = vld [vmem:[%s5439_s1 + $0x1370] sm:$0xff]  ;;  %2640 = vmatpush.msra.mxu1 %v2592_v17 }
0x12d0   : > { %2618 = vmatpush.msra.mxu3 %v2575_v41 }
0x12d1   : > { %v2480_v34 = vrot.slane %v2476_v59, 5  ;;  %v2591_v59 = vld [vmem:[%s5439_s1 + $0x1408] sm:$0xff] }
0x12d2   : > { %2619 = vmatpush.msra.mxu3 %v2574_v56  ;;  %2641 = vmatpush.msra.mxu1 %v2591_v59 }
0x12d3   : > { %v5254_v61 = vsel %vm206_vm4, %v2479_v39, %v2480_v34  ;;  %v5257_v23 = vsel %vm206_vm4, %v2480_v34, 0.0  ;;  %v2573_v39 = vld [vmem:[%s5439_s1 + $0x1378] sm:$0xff]  ;;  %v2590_v34 = vld [vmem:[%s5439_s1 + $0x1400] sm:$0xff] }
0x12d4   : > { %v2510_v4 = vrot.slane %v5254_v61, 3  ;;  %v2499_v5 = vrot.slane %v5254_v61, 2  ;;  %v2501_v6 = vrot.slane %v5257_v23, 2  ;;  %v2489_v22 = vrot.slane %v5254_v61, 1  ;;  %2620 = vmatpush.msra.mxu3 %v2573_v39  ;;  %2642 = vmatpush.msra.mxu1 %v2590_v34  ;;  %v2710_v50 = vpop.f32.mrf.mxu2 }
0x12d5   : > { %v2512_v10 = vrot.slane %v5257_v23, 3  ;;  %v2550_v3 = vrot.slane %v5254_v61, 7  ;;  %v2539_v33 = vrot.slane %v5254_v61, 6  ;;  %v2528_v20 = vrot.slane %v5254_v61, 5 }
0x12d6   : > { %v2511_v11 = vsel %vm233_vm5, %v2509_v60, %v2510_v4  ;;  %v2500_v12 = vsel %vm221_vm7, %v2498_v62, %v2499_v5  ;;  %v2502_v13 = vsel %vm221_vm7, %v2499_v5, %v2501_v6  ;;  %v2490_v38 = vsel %vm148_vm0, %v2488_v63, %v2489_v22  ;;  %2621 = vmatpush.msra.mxu3 %v2572_v57  ;;  %v2589_v60 = vld [vmem:[%s5439_s1 + $0x13f8] sm:$0xff]  ;;  %v2588_v62 = vld [vmem:[%s5439_s1 + $0x13f0] sm:$0xff] }
0x12d7   : > { %2514 = vrot.lane.b32.xlu0 %v2511_v11, %s2948_s20  ;;  %v2908_v14 = vpack.i.bf16 %v2502_v13, %v2500_v12  ;;  %v2903_v15 = vpack.i.bf16 %v2489_v22, %v2490_v38  ;;  %v2513_v18 = vsel %vm233_vm5, %v2510_v4, %v2512_v10  ;;  %v2551_v19 = vsel %vm275_vm6, %v2549_v16, %v2550_v3 }
0x12d8   : > { %v2913_v21 = vpack.i.bf16 %v2551_v19, %v2513_v18  ;;  %v2540_v26 = vsel %vm263_vm8, %v2538_v24, %v2539_v33  ;;  %v2529_v27 = vsel %vm206_vm4, %v2527_v25, %v2528_v20  ;;  %v2552_v28 = vrot.slane %v5257_v23, 7  ;;  %2643 = vmatpush.msra.mxu1 %v2589_v60 }
0x12d9   : > { %2909 = vrot.lane.b32.xlu2 %v2908_v14, %s2949_s21  ;;  %2904 = vrot.lane.b32.xlu1 %v2903_v15, %s2950_s22  ;;  %v2541_v29 = vrot.slane %v5257_v23, 6  ;;  %v2530_v30 = vrot.slane %v5257_v23, 5  ;;  %v2521_v11 = vrot.slane %v5254_v61, 4  ;;  %v2520_v14 = vrot.slane %v5250_v58, 4 }
0x12da   : > { %v2553_v31 = vsel %vm275_vm6, %v2550_v3, %v2552_v28  ;;  %2644 = vmatpush.msra.mxu1 %v2588_v62  ;;  %v2711_v51 = vadd.f32 %v2710_v50, %v2692_v9 }
0x12db   : > { %v2542_v32 = vsel %vm263_vm8, %v2539_v33, %v2541_v29  ;;  %v2531_v35 = vsel %vm206_vm4, %v2528_v20, %v2530_v30  ;;  %v2522_v16 = vsel %vm198_vm3, %v2520_v14, %v2521_v11 }
0x12dc   : > { %v2713_v41 = vsel %vm1246_vm15, %v2711_v51, 0.0 }
0x12dd   : > { %v2728_v39 = vsel %vm275_vm6, %v2713_v41, %v2718_v55 }
0x12df   : > { %2914 = vrot.lane.b32.xlu0 %v2913_v21, %s2948_s20 }
0x12e1   : > { %2543 = vrot.lane.b32.xlu2 %v2540_v26, %s2949_s21  ;;  %2532 = vrot.lane.b32.xlu1 %v2529_v27, %s2950_s22 }
0x12e7   : > { %2556 = vrot.lane.b32.xlu0 %v2553_v31, %s2948_s20 }
0x12e9   : > { %2545 = vrot.lane.b32.xlu2 %v2542_v32, %s2949_s21  ;;  %2534 = vrot.lane.b32.xlu1 %v2531_v35, %s2950_s22 }
0x1333   : > { %v2910_v63 = vpop.permute.xlu2 %2909 }
0x1334   : > { %v2911_v22 = vunpack.i.l.bf16 %v2910_v63  ;;  %v2912_v24 = vunpack.i.h.bf16 %v2910_v63 }
0x133b   : > { %v2544_v15 = vpop.permute.xlu2 %2543 }
0x1343   : > { %v2546_v31 = vpop.permute.xlu2 %2545 }
0x1349   : > { %v2515_v4 = vpop.permute.xlu0 %2514 }
0x134b   : > { %v2905_v5 = vpop.permute.xlu1 %2904 }
0x134c   : > { %v2906_v6 = vunpack.i.l.bf16 %v2905_v5  ;;  %v2907_v12 = vunpack.i.h.bf16 %v2905_v5 }
0x134e   : > { %v2560_v10 = vsel %vm287_vm9, %v5250_v58, %v2906_v6  ;;  %v2561_v21 = vsel %vm287_vm9, %v5254_v61, %v2907_v12  ;;  %v2523_v58 = vrot.slane %v5257_v23, 4  ;;  %v2938_v23 = vld [vmem:[%s5439_s1 + $0x14fd] ss:$0 sm:$0xff] }
0x134f   : > { %v2562_v3 = vsel %vm290_vm10, %v2560_v10, %v2911_v22  ;;  %v2563_v27 = vsel %vm290_vm10, %v2561_v21, %v2912_v24 }
0x1350   : > { %v2564_v13 = vsel %vm293_vm11, %v2562_v3, %v2515_v4  ;;  %v2524_v29 = vsel %vm198_vm3, %v2521_v11, %v2523_v58 }
0x1351   : > { %v2915_v38 = vpop.permute.xlu0 %2914  ;;  %2622 = vmatmul.f32.vlgmr.msra.gmra.mxu3 %v2564_v13 }
0x1352   : > { %v2917_v19 = vunpack.i.h.bf16 %v2915_v38  ;;  %v2916_v33 = vunpack.i.l.bf16 %v2915_v38 }
0x1353   : > { %v2533_v18 = vpop.permute.xlu1 %2532 }
0x1354   : > { %v2566_v20 = vsel %vm287_vm9, %v2522_v16, %v2533_v18  ;;  %v2565_v28 = vsel %vm293_vm11, %v2563_v27, %v2916_v33 }
0x1355   : > { %v2568_v25 = vsel %vm290_vm10, %v2566_v20, %v2544_v15 }
0x1356   : > { %v2570_v26 = vsel %vm293_vm11, %v2568_v25, %v2917_v19 }
0x1357   : > { %2645 = vmatmul.f32.vlgmr.msra.gmra.mxu1 %v2570_v26 }
0x1359   : > { %2625 = vmatmul.f32.gmra.mxu3 %v2565_v28  ;;  %v2557_v61 = vpop.permute.xlu0 %2556 }
0x135b   : > { %v2535_v30 = vpop.permute.xlu1 %2534 }
0x135c   : > { %v2567_v32 = vsel %vm287_vm9, %v2524_v29, %v2535_v30 }
0x135d   : > { %v2569_v35 = vsel %vm290_vm10, %v2567_v32, %v2546_v31 }
0x135e   : > { %v2571_v36 = vsel %vm293_vm11, %v2569_v35, %v2557_v61 }
0x135f   : > { %2648 = vmatmul.f32.gmra.mxu1 %v2571_v36 }
0x13d4   : > { %v2623_v37 = vpop.f32.mrf.mxu3  ;;  %v2646_v0 = vpop.f32.mrf.mxu1 }
0x13d5   : > { %v2624_v43 = vadd.f32 %v2938_v23, %v2623_v37 }
0x13d7   : > { %v2647_v8 = vadd.f32 %v2646_v0, %v2624_v43 }
0x13d9   : > { %v2652_v49 = vmax.f32 %v2647_v8, 0.0 }
0x13dc   : > { %v2626_v1 = vpop.f32.mrf.mxu3  ;;  %v2649_v45 = vpop.f32.mrf.mxu1 }
0x13dd   : > { %v2627_v44 = vadd.f32 %v2938_v23, %v2626_v1 }
0x13df   : > { %v2650_v46 = vadd.f32 %v2649_v45, %v2627_v44 }
0x13e1   : > { %v2653_v47 = vmax.f32 %v2650_v46, 0.0 }
0x13e3   : > { %v2654_v48 = vsel %vm148_vm0, %v2653_v47, 1.0 }
0x13e4   : > { %2677 = vmatpush.msra.mxu0 %v2654_v48 }
0x13e6   : > { %2678 = vmatpush.msra.mxu0 %v2652_v49 }
0x13e7   : > { %2832 = vmatmul.msk.f32.vlgmr.msra.gmra.mxu0 %vm1366_vm12, %v2655_v40 }
0x13ef   : > { %2833 = vmatmul.msk.f32.gmra.mxu0 %vm1366_vm12, %v2656_v7 }
0x1464   : > { %v2680_v53 = vpop.f32.mrf.mxu0 }
0x1465   : > { %v2686_v54 = vmax.f32 %v2680_v53, 0.0 }
0x1467   : > { %v2715_v56 = vsel %vm158_vm1, %v2686_v54, 0.0 }
0x1468   : > { %v2722_v42 = vrot.slane %v2715_v56, 5 }
0x146a   : > { %v2729_v17 = vsel %vm206_vm4, %v2728_v39, %v2722_v42 }
0x146b   : > { %2731 = vst [vmem:[%s143_s15] sm:$0xff] %v2729_v17 }
0x146c   : > { %v2683_v57 = vpop.f32.mrf.mxu0 }
0x146d   : > { %v2687_v2 = vmax.f32 %v2683_v57, 0.0 }
0x146f   : > { %v2716_v59 = vsel %vm158_vm1, %v2687_v2, 0.0 }
0x1470   : > { %v2723_v34 = vrot.slane %v2716_v59, 5 }
0x1472   : > { %v2724_v60 = vsel %vm206_vm4, %v2722_v42, %v2723_v34  ;;  %v2730_v62 = vsel %vm206_vm4, %v2723_v34, 0.0 }
0x1473   : > { %2732 = vst [vmem:[%s143_s15 + $0x8] sm:$0xff] %v2724_v60 }
0x1474   : > { %2733 = vst [vmem:[%s143_s15 + $0x10] sm:$0xff] %v2730_v62 }
0x1475 PF: > { %s12_s9 = sadd.s32 1, %s2945_s9  }
0x1476   : > { %p9_p4 = scmp.ge.s32.totalorder %s12_s9, 4  }
0x1478   :  { %11 = sbr.rel (!%p9_p4) target bundleno = 1 (0x1), region = 58 }

</bundles_post_ra>
